<compile_context>
chip_gen: v5e
topology: v5e:2x2
jax: 0.10.0
libtpu: 0.0.40
codegen_flags: <defaults>
</compile_context>

<pallas_src>
import numpy as np

import jax
import jax.numpy as jnp
from jax.experimental import pallas as pl
from jax.experimental.pallas import tpu as pltpu

BATCH_BLOCK = 8  # images processed per grid step


# ----------------------------------------------------------------------------
# Fused whole-network kernel (one grid step = one batch tile of B images)
# ----------------------------------------------------------------------------
def _net_kernel(x_ref, w1c_ref, b1_ref, w2c_ref, b2_ref,
                wf1_ref, bf1_ref, wf2_ref, bf2_ref, wf3_ref, bf3_ref,
                o_ref, a1_ref, a2_ref):
    """x_ref   : (B, 40, 96)   f32  input rows (H padded 32->40), lane = w*3 + c
       w1c_ref : (5, 96, 256)  bf16 conv1 banded weights (per filter row)
       b1_ref  : (1, 128)      f32  conv1 bias in pooled-lane layout (c*14 + ow')
       w2c_ref : (5, 128, 256) bf16 conv2 banded weights
       b2_ref  : (1, 128)      f32  conv2 bias in pooled-lane layout (c*5 + ow')
       wf1_ref : (5, 128, 128) bf16 fc1 per-row weights ; bf1/bf2/bf3: (1,128) f32
       wf2_ref / wf3_ref : (128, 128) bf16
       o_ref   : (B, 128)      f32  logits in lanes 0..9
       a1_ref  : (B, 24, 128)  f32  pooled conv1 activations (rows 0..13 real)
       a2_ref  : (B, 8, 128)   f32  pooled conv2 activations (rows 0..4 real)
    """
    B = x_ref.shape[0]
    f32 = jnp.float32
    bf16 = jnp.bfloat16

    # ---------------- conv1 + bias + ReLU + 2x2 max-pool ----------------
    # Banded formulation: for filter row i, w1c[i][w*3+c, r*128 + co*14 + ow'] holds
    # conv1_w[co, c, i, (2*ow'+r) ... ] so one matmul per filter row produces all
    # output columns; even/odd output rows are separate row blocks of the same matmul.
    acc1 = None
    for i in range(5):
        xe = x_ref[:, pl.ds(i, 16, 2), :]        # input rows for even conv rows (oh=2t)
        xo = x_ref[:, pl.ds(i + 1, 16, 2), :]    # input rows for odd  conv rows (oh=2t+1)
        lhs = jnp.concatenate([xe, xo], axis=0).reshape(2 * B * 16, 96).astype(bf16)
        t = jnp.dot(lhs, w1c_ref[i], preferred_element_type=f32)      # (2B*16, 256)
        acc1 = t if acc1 is None else acc1 + t
    hmax = jnp.maximum(acc1[:B * 16], acc1[B * 16:])                  # pool over row pairs
    wmax = jnp.maximum(hmax[:, :128], hmax[:, 128:])                  # pool over col pairs
    act1 = jnp.maximum(wmax + b1_ref[...], 0.0)                       # bias + ReLU (B*16,128)
    a1_ref[...] = jnp.zeros_like(a1_ref)                              # keep spare rows defined
    for b in range(B):
        a1_ref[b, :16, :] = act1[b * 16:(b + 1) * 16, :]              # rows 0..13 are real

    # ---------------- conv2 + bias + ReLU + 2x2 max-pool ----------------
    # Same banded trick; act1 lanes are (c*14 + w).  8 output rows per image are
    # computed (rows 5..7 are padding, never read) so every slice stays 8-aligned.
    acc2 = None
    for i in range(5):
        le = a1_ref[:, pl.ds(i, 8, 2), :]
        lo = a1_ref[:, pl.ds(i + 1, 8, 2), :]
        lhs = jnp.concatenate([le, lo], axis=0).reshape(2 * B * 8, 128).astype(bf16)
        t = jnp.dot(lhs, w2c_ref[i], preferred_element_type=f32)      # (2B*8, 256)
        acc2 = t if acc2 is None else acc2 + t
    hmax2 = jnp.maximum(acc2[:B * 8], acc2[B * 8:])
    wmax2 = jnp.maximum(hmax2[:, :128], hmax2[:, 128:])
    act2 = jnp.maximum(wmax2 + b2_ref[...], 0.0)                      # (B*8, 128)
    for b in range(B):
        a2_ref[b] = act2[b * 8:(b + 1) * 8, :]

    # ---------------- fc1 -> ReLU -> fc2 -> ReLU -> fc3 ----------------
    accf = None
    for h in range(5):                                                # fold h into the K sum
        t = jnp.dot(a2_ref[:, h, :].astype(bf16), wf1_ref[h],
                    preferred_element_type=f32)                       # (B, 128)
        accf = t if accf is None else accf + t
    h1 = jnp.maximum(accf + bf1_ref[...], 0.0)
    h2 = jnp.dot(h1.astype(bf16), wf2_ref[...], preferred_element_type=f32)
    h2 = jnp.maximum(h2 + bf2_ref[...], 0.0)
    out = jnp.dot(h2.astype(bf16), wf3_ref[...], preferred_element_type=f32)
    o_ref[...] = out + bf3_ref[...]


# ----------------------------------------------------------------------------
# Wrapper: one pallas_call for the whole network, batch-blocked grid
# ----------------------------------------------------------------------------
def net_forward(prep, x_nchw):
    n, c, hh, ww = x_nchw.shape
    assert (c, hh, ww) == (3, 32, 32), "Net is defined for 3x32x32 inputs"
    B = BATCH_BLOCK
    npad = ((n + B - 1) // B) * B
    # NHWC with (w, c) flattened into one 96-wide lane axis; pad H 32->40 so the
    # kernel's 16-row stride-2 slices stay in bounds; pad batch to the block size.
    x = jnp.transpose(x_nchw, (0, 2, 3, 1)).reshape(n, 32, 96)
    x = jnp.pad(x, ((0, npad - n), (0, 8), (0, 0)))

    out = pl.pallas_call(
        _net_kernel,
        out_shape=jax.ShapeDtypeStruct((npad, 128), jnp.float32),
        grid=(npad // B,),
        in_specs=[
            pl.BlockSpec((B, 40, 96), lambda i: (i, 0, 0)),
            pl.BlockSpec((5, 96, 256), lambda i: (0, 0, 0)),
            pl.BlockSpec((1, 128), lambda i: (0, 0)),
            pl.BlockSpec((5, 128, 256), lambda i: (0, 0, 0)),
            pl.BlockSpec((1, 128), lambda i: (0, 0)),
            pl.BlockSpec((5, 128, 128), lambda i: (0, 0, 0)),
            pl.BlockSpec((1, 128), lambda i: (0, 0)),
            pl.BlockSpec((128, 128), lambda i: (0, 0)),
            pl.BlockSpec((1, 128), lambda i: (0, 0)),
            pl.BlockSpec((128, 128), lambda i: (0, 0)),
            pl.BlockSpec((1, 128), lambda i: (0, 0)),
        ],
        out_specs=pl.BlockSpec((B, 128), lambda i: (i, 0)),
        scratch_shapes=[
            pltpu.VMEM((B, 24, 128), jnp.float32),   # pooled conv1 activations
            pltpu.VMEM((B, 8, 128), jnp.float32),    # pooled conv2 activations
        ],
        compiler_params=pltpu.CompilerParams(
            dimension_semantics=("parallel",)),
    )(x, prep["w1c"], prep["b1"], prep["w2c"], prep["b2"],
      prep["wf1"], prep["bf1"], prep["wf2"], prep["bf2"],
      prep["wf3"], prep["bf3"])
    return out[:n, :10]


# ----------------------------------------------------------------------------
# One-time parameter re-layout (banded conv weights, packed fc weights) on host
# ----------------------------------------------------------------------------
def prepare_params(p):
    f32 = np.float32
    w1 = np.asarray(p["conv1_w"], f32)   # (6, 3, 5, 5)
    b1 = np.asarray(p["conv1_b"], f32)   # (6,)
    w2 = np.asarray(p["conv2_w"], f32)   # (16, 6, 5, 5)
    b2 = np.asarray(p["conv2_b"], f32)   # (16,)
    fw1 = np.asarray(p["fc1_w"], f32)    # (120, 400)
    fb1 = np.asarray(p["fc1_b"], f32)
    fw2 = np.asarray(p["fc2_w"], f32)    # (84, 120)
    fb2 = np.asarray(p["fc2_b"], f32)
    fw3 = np.asarray(p["fc3_w"], f32)    # (10, 84)
    fb3 = np.asarray(p["fc3_b"], f32)

    # conv1 banded weights: input lane p = w*3 + c ; output lane = r*128 + co*14 + ow'
    # (r = ow parity, ow' = pooled column index), one (96,256) matrix per filter row i.
    W1c = np.zeros((5, 96, 256), f32)
    for i in range(5):
        for j in range(5):
            for r in range(2):
                for owp in range(14):
                    wcol = 2 * owp + r + j                     # input column, 0..31
                    for ci in range(3):
                        W1c[i, wcol * 3 + ci,
                            r * 128 + np.arange(6) * 14 + owp] = w1[:, ci, i, j]
    b1row = np.zeros((1, 128), f32)
    for co in range(6):
        b1row[0, co * 14: co * 14 + 14] = b1[co]

    # conv2 banded weights: input lane = c*14 + w ; output lane = r*128 + co*5 + ow'
    W2c = np.zeros((5, 128, 256), f32)
    for i in range(5):
        for j in range(5):
            for r in range(2):
                for owp in range(5):
                    wcol = 2 * owp + r + j                     # input column, 0..13
                    for ci in range(6):
                        W2c[i, ci * 14 + wcol,
                            r * 128 + np.arange(16) * 5 + owp] = w2[:, ci, i, j]
    b2row = np.zeros((1, 128), f32)
    for co in range(16):
        b2row[0, co * 5: co * 5 + 5] = b2[co]

    # fc1: act2 lane = co*5 + w, row = h ; torch flatten index = co*25 + h*5 + w
    Wf1 = np.zeros((5, 128, 128), f32)
    for h in range(5):
        for co in range(16):
            for w_ in range(5):
                Wf1[h, co * 5 + w_, :120] = fw1[:, co * 25 + h * 5 + w_]
    bf1r = np.zeros((1, 128), f32); bf1r[0, :120] = fb1

    Wf2 = np.zeros((128, 128), f32); Wf2[:120, :84] = fw2.T
    bf2r = np.zeros((1, 128), f32); bf2r[0, :84] = fb2
    Wf3 = np.zeros((128, 128), f32); Wf3[:84, :10] = fw3.T
    bf3r = np.zeros((1, 128), f32); bf3r[0, :10] = fb3

    bcast = lambda a: jnp.asarray(a, jnp.bfloat16)
    fcast = lambda a: jnp.asarray(a, jnp.float32)
    return dict(w1c=bcast(W1c), b1=fcast(b1row),
                w2c=bcast(W2c), b2=fcast(b2row),
                wf1=bcast(Wf1), bf1=fcast(bf1r),
                wf2=bcast(Wf2), bf2=fcast(bf2r),
                wf3=bcast(Wf3), bf3=fcast(bf3r))


# ----------------------------------------------------------------------------
# Parameter init (deterministic, PyTorch-default-style uniform(-1/sqrt(fan_in)))
# ----------------------------------------------------------------------------
def _uniform(key, shape, fan_in):
    bound = 1.0 / jnp.sqrt(jnp.float32(fan_in))
    return jax.random.uniform(key, shape, jnp.float32, -bound, bound)


def init_params(key):
    ks = jax.random.split(key, 10)
    p = {}
    p["conv1_w"] = _uniform(ks[0], (6, 3, 5, 5), 3 * 5 * 5)
    p["conv1_b"] = _uniform(ks[1], (6,), 3 * 5 * 5)
    p["conv2_w"] = _uniform(ks[2], (16, 6, 5, 5), 6 * 5 * 5)
    p["conv2_b"] = _uniform(ks[3], (16,), 6 * 5 * 5)
    p["fc1_w"] = _uniform(ks[4], (120, 400), 400)
    p["fc1_b"] = _uniform(ks[5], (120,), 400)
    p["fc2_w"] = _uniform(ks[6], (84, 120), 120)
    p["fc2_b"] = _uniform(ks[7], (84,), 120)
    p["fc3_w"] = _uniform(ks[8], (10, 84), 84)
    p["fc3_b"] = _uniform(ks[9], (10,), 84)
    return p


# ----------------------------------------------------------------------------
# Pure-JAX reference (same math, PyTorch layout) for a correctness sanity check
# ----------------------------------------------------------------------------
def _reference_forward(params, x_nchw):
    def conv(x, w, b):
        cout, cin, kh, kw = w.shape
        n, _, hh, ww = x.shape
        ho, wo = hh - kh + 1, ww - kw + 1
        cols = [x[:, :, i:i + ho, j:j + wo] for i in range(kh) for j in range(kw)]
        p = jnp.stack(cols, 0).transpose(1, 3, 4, 2, 0)                # (n,ho,wo,cin,kh*kw)
        p = p.reshape(n * ho * wo, cin * kh * kw)
        y = p @ w.reshape(cout, cin * kh * kw).T + b
        return y.reshape(n, ho, wo, cout)

    def pool(y):
        n, hh, ww, c = y.shape
        return jnp.max(y.reshape(n, hh // 2, 2, ww // 2, 2, c), axis=(2, 4))

    relu = lambda z: jnp.maximum(z, 0.0)
    x1 = pool(relu(conv(x_nchw, params["conv1_w"], params["conv1_b"])))
    x2 = pool(relu(conv(x1.transpose(0, 3, 1, 2), params["conv2_w"], params["conv2_b"])))
    flat = x2.transpose(0, 3, 1, 2).reshape(x_nchw.shape[0], 400)
    h = relu(flat @ params["fc1_w"].T + params["fc1_b"])
    h = relu(h @ params["fc2_w"].T + params["fc2_b"])
    return h @ params["fc3_w"].T + params["fc3_b"]


if __name__ == "__main__":
    key = jax.random.PRNGKey(0)
    pkey, xkey = jax.random.split(key)
    params = init_params(pkey)
    prep = prepare_params(params)                  # one-time weight re-layout (host)
    # fc1 (16*5*5) pins the spatial size to 32x32; batch kept small for the demo.
    x = jax.random.normal(xkey, (2, 3, 32, 32), jnp.float32)

    fwd = jax.jit(net_forward)
    logits = jax.block_until_ready(fwd(prep, x))

    assert logits.shape == (2, 10) and logits.dtype == jnp.float32
    assert bool(jnp.all(jnp.isfinite(logits)))

    # loose bf16-tolerance check against a pure-JAX reference of the same module
    ref = _reference_forward(params, x)
    err = float(jnp.max(jnp.abs(logits - ref)))
    scale = float(jnp.max(jnp.abs(ref)))
    assert err <= 0.05 + 0.05 * scale, f"mismatch: max|diff|={err}, max|ref|={scale}"

    print("KERNEL_OK")
</pallas_src>

<mosaic_0001>
module attributes {stable_mosaic.version = 11 : i64} {
  func.func @_net_kernel(%arg0: i32, %arg1: memref<8x40x96xf32, #tpu.memory_space<vmem>>, %arg2: memref<5x96x256xbf16, #tpu.memory_space<vmem>>, %arg3: memref<1x128xf32, #tpu.memory_space<vmem>>, %arg4: memref<5x128x256xbf16, #tpu.memory_space<vmem>>, %arg5: memref<1x128xf32, #tpu.memory_space<vmem>>, %arg6: memref<5x128x128xbf16, #tpu.memory_space<vmem>>, %arg7: memref<1x128xf32, #tpu.memory_space<vmem>>, %arg8: memref<128x128xbf16, #tpu.memory_space<vmem>>, %arg9: memref<1x128xf32, #tpu.memory_space<vmem>>, %arg10: memref<128x128xbf16, #tpu.memory_space<vmem>>, %arg11: memref<1x128xf32, #tpu.memory_space<vmem>>, %arg12: memref<8x128xf32, #tpu.memory_space<vmem>>, %arg13: memref<8x24x128xf32, #tpu.memory_space<vmem>>, %arg14: memref<8x8x128xf32, #tpu.memory_space<vmem>>) attributes {dimension_semantics = [#tpu.dimension_semantics<parallel>], iteration_bounds = array<i64: 1>, scalar_prefetch = 0 : i64, scratch_operands = 2 : i64, tpu.core_type = #tpu.core_type<tc>, window_params = [{transform_indices = @transform_0, window_bounds = array<i64: 8, 40, 96>}, {pipeline_mode = #tpu.pipeline_mode<synchronous>, transform_indices = @transform_1, window_bounds = array<i64: 5, 96, 256>}, {pipeline_mode = #tpu.pipeline_mode<synchronous>, transform_indices = @transform_2, window_bounds = array<i64: 1, 128>}, {pipeline_mode = #tpu.pipeline_mode<synchronous>, transform_indices = @transform_3, window_bounds = array<i64: 5, 128, 256>}, {pipeline_mode = #tpu.pipeline_mode<synchronous>, transform_indices = @transform_4, window_bounds = array<i64: 1, 128>}, {pipeline_mode = #tpu.pipeline_mode<synchronous>, transform_indices = @transform_5, window_bounds = array<i64: 5, 128, 128>}, {pipeline_mode = #tpu.pipeline_mode<synchronous>, transform_indices = @transform_6, window_bounds = array<i64: 1, 128>}, {pipeline_mode = #tpu.pipeline_mode<synchronous>, transform_indices = @transform_7, window_bounds = array<i64: 128, 128>}, {pipeline_mode = #tpu.pipeline_mode<synchronous>, transform_indices = @transform_8, window_bounds = array<i64: 1, 128>}, {pipeline_mode = #tpu.pipeline_mode<synchronous>, transform_indices = @transform_9, window_bounds = array<i64: 128, 128>}, {pipeline_mode = #tpu.pipeline_mode<synchronous>, transform_indices = @transform_10, window_bounds = array<i64: 1, 128>}, {transform_indices = @transform_11, window_bounds = array<i64: 8, 128>}]} {
    %c0 = arith.constant 0 : index
    %c0_0 = arith.constant 0 : index
    %c0_1 = arith.constant 0 : index
    %0 = tpu.strided_load %arg1[%c0, %c0_0, %c0_1] {strides = array<i32: 1, 2, 1>} : memref<8x40x96xf32, #tpu.memory_space<vmem>>, vector<8x16x96xf32>
    %c0_2 = arith.constant 0 : index
    %c1 = arith.constant 1 : index
    %c0_3 = arith.constant 0 : index
    %1 = tpu.strided_load %arg1[%c0_2, %c1, %c0_3] {strides = array<i32: 1, 2, 1>} : memref<8x40x96xf32, #tpu.memory_space<vmem>>, vector<8x16x96xf32>
    %2 = tpu.concatenate %0, %1 in 0 : vector<8x16x96xf32>, vector<8x16x96xf32> -> vector<16x16x96xf32>
    %3 = vector.shape_cast %2 : vector<16x16x96xf32> to vector<256x96xf32>
    %4 = arith.truncf %3 : vector<256x96xf32> to vector<256x96xbf16>
    %c0_4 = arith.constant 0 : index
    %c0_5 = arith.constant 0 : index
    %c0_6 = arith.constant 0 : index
    %5 = vector.load %arg2[%c0_4, %c0_5, %c0_6] : memref<5x96x256xbf16, #tpu.memory_space<vmem>>, vector<1x96x256xbf16>
    %6 = vector.shape_cast %5 : vector<1x96x256xbf16> to vector<96x256xbf16>
    %cst = arith.constant dense<0.000000e+00> : vector<256x256xf32>
    %7 = tpu.matmul %4, %6, %cst {dimension_numbers = #tpu.dot_dimension_numbers<[1], [0], [0], [1], [0, 0, 1, 1], [], []>} : vector<256x96xbf16>, vector<96x256xbf16>, vector<256x256xf32> -> vector<256x256xf32>
    %c0_7 = arith.constant 0 : index
    %c1_8 = arith.constant 1 : index
    %c0_9 = arith.constant 0 : index
    %8 = tpu.strided_load %arg1[%c0_7, %c1_8, %c0_9] {strides = array<i32: 1, 2, 1>} : memref<8x40x96xf32, #tpu.memory_space<vmem>>, vector<8x16x96xf32>
    %c0_10 = arith.constant 0 : index
    %c2 = arith.constant 2 : index
    %c0_11 = arith.constant 0 : index
    %9 = tpu.strided_load %arg1[%c0_10, %c2, %c0_11] {strides = array<i32: 1, 2, 1>} : memref<8x40x96xf32, #tpu.memory_space<vmem>>, vector<8x16x96xf32>
    %10 = tpu.concatenate %8, %9 in 0 : vector<8x16x96xf32>, vector<8x16x96xf32> -> vector<16x16x96xf32>
    %11 = vector.shape_cast %10 : vector<16x16x96xf32> to vector<256x96xf32>
    %12 = arith.truncf %11 : vector<256x96xf32> to vector<256x96xbf16>
    %c1_12 = arith.constant 1 : index
    %c0_13 = arith.constant 0 : index
    %c0_14 = arith.constant 0 : index
    %13 = vector.load %arg2[%c1_12, %c0_13, %c0_14] : memref<5x96x256xbf16, #tpu.memory_space<vmem>>, vector<1x96x256xbf16>
    %14 = vector.shape_cast %13 : vector<1x96x256xbf16> to vector<96x256xbf16>
    %cst_15 = arith.constant dense<0.000000e+00> : vector<256x256xf32>
    %15 = tpu.matmul %12, %14, %cst_15 {dimension_numbers = #tpu.dot_dimension_numbers<[1], [0], [0], [1], [0, 0, 1, 1], [], []>} : vector<256x96xbf16>, vector<96x256xbf16>, vector<256x256xf32> -> vector<256x256xf32>
    %16 = arith.addf %7, %15 : vector<256x256xf32>
    %c0_16 = arith.constant 0 : index
    %c2_17 = arith.constant 2 : index
    %c0_18 = arith.constant 0 : index
    %17 = tpu.strided_load %arg1[%c0_16, %c2_17, %c0_18] {strides = array<i32: 1, 2, 1>} : memref<8x40x96xf32, #tpu.memory_space<vmem>>, vector<8x16x96xf32>
    %c0_19 = arith.constant 0 : index
    %c3 = arith.constant 3 : index
    %c0_20 = arith.constant 0 : index
    %18 = tpu.strided_load %arg1[%c0_19, %c3, %c0_20] {strides = array<i32: 1, 2, 1>} : memref<8x40x96xf32, #tpu.memory_space<vmem>>, vector<8x16x96xf32>
    %19 = tpu.concatenate %17, %18 in 0 : vector<8x16x96xf32>, vector<8x16x96xf32> -> vector<16x16x96xf32>
    %20 = vector.shape_cast %19 : vector<16x16x96xf32> to vector<256x96xf32>
    %21 = arith.truncf %20 : vector<256x96xf32> to vector<256x96xbf16>
    %c2_21 = arith.constant 2 : index
    %c0_22 = arith.constant 0 : index
    %c0_23 = arith.constant 0 : index
    %22 = vector.load %arg2[%c2_21, %c0_22, %c0_23] : memref<5x96x256xbf16, #tpu.memory_space<vmem>>, vector<1x96x256xbf16>
    %23 = vector.shape_cast %22 : vector<1x96x256xbf16> to vector<96x256xbf16>
    %cst_24 = arith.constant dense<0.000000e+00> : vector<256x256xf32>
    %24 = tpu.matmul %21, %23, %cst_24 {dimension_numbers = #tpu.dot_dimension_numbers<[1], [0], [0], [1], [0, 0, 1, 1], [], []>} : vector<256x96xbf16>, vector<96x256xbf16>, vector<256x256xf32> -> vector<256x256xf32>
    %25 = arith.addf %16, %24 : vector<256x256xf32>
    %c0_25 = arith.constant 0 : index
    %c3_26 = arith.constant 3 : index
    %c0_27 = arith.constant 0 : index
    %26 = tpu.strided_load %arg1[%c0_25, %c3_26, %c0_27] {strides = array<i32: 1, 2, 1>} : memref<8x40x96xf32, #tpu.memory_space<vmem>>, vector<8x16x96xf32>
    %c0_28 = arith.constant 0 : index
    %c4 = arith.constant 4 : index
    %c0_29 = arith.constant 0 : index
    %27 = tpu.strided_load %arg1[%c0_28, %c4, %c0_29] {strides = array<i32: 1, 2, 1>} : memref<8x40x96xf32, #tpu.memory_space<vmem>>, vector<8x16x96xf32>
    %28 = tpu.concatenate %26, %27 in 0 : vector<8x16x96xf32>, vector<8x16x96xf32> -> vector<16x16x96xf32>
    %29 = vector.shape_cast %28 : vector<16x16x96xf32> to vector<256x96xf32>
    %30 = arith.truncf %29 : vector<256x96xf32> to vector<256x96xbf16>
    %c3_30 = arith.constant 3 : index
    %c0_31 = arith.constant 0 : index
    %c0_32 = arith.constant 0 : index
    %31 = vector.load %arg2[%c3_30, %c0_31, %c0_32] : memref<5x96x256xbf16, #tpu.memory_space<vmem>>, vector<1x96x256xbf16>
    %32 = vector.shape_cast %31 : vector<1x96x256xbf16> to vector<96x256xbf16>
    %cst_33 = arith.constant dense<0.000000e+00> : vector<256x256xf32>
    %33 = tpu.matmul %30, %32, %cst_33 {dimension_numbers = #tpu.dot_dimension_numbers<[1], [0], [0], [1], [0, 0, 1, 1], [], []>} : vector<256x96xbf16>, vector<96x256xbf16>, vector<256x256xf32> -> vector<256x256xf32>
    %34 = arith.addf %25, %33 : vector<256x256xf32>
    %c0_34 = arith.constant 0 : index
    %c4_35 = arith.constant 4 : index
    %c0_36 = arith.constant 0 : index
    %35 = tpu.strided_load %arg1[%c0_34, %c4_35, %c0_36] {strides = array<i32: 1, 2, 1>} : memref<8x40x96xf32, #tpu.memory_space<vmem>>, vector<8x16x96xf32>
    %c0_37 = arith.constant 0 : index
    %c5 = arith.constant 5 : index
    %c0_38 = arith.constant 0 : index
    %36 = tpu.strided_load %arg1[%c0_37, %c5, %c0_38] {strides = array<i32: 1, 2, 1>} : memref<8x40x96xf32, #tpu.memory_space<vmem>>, vector<8x16x96xf32>
    %37 = tpu.concatenate %35, %36 in 0 : vector<8x16x96xf32>, vector<8x16x96xf32> -> vector<16x16x96xf32>
    %38 = vector.shape_cast %37 : vector<16x16x96xf32> to vector<256x96xf32>
    %39 = arith.truncf %38 : vector<256x96xf32> to vector<256x96xbf16>
    %c4_39 = arith.constant 4 : index
    %c0_40 = arith.constant 0 : index
    %c0_41 = arith.constant 0 : index
    %40 = vector.load %arg2[%c4_39, %c0_40, %c0_41] : memref<5x96x256xbf16, #tpu.memory_space<vmem>>, vector<1x96x256xbf16>
    %41 = vector.shape_cast %40 : vector<1x96x256xbf16> to vector<96x256xbf16>
    %cst_42 = arith.constant dense<0.000000e+00> : vector<256x256xf32>
    %42 = tpu.matmul %39, %41, %cst_42 {dimension_numbers = #tpu.dot_dimension_numbers<[1], [0], [0], [1], [0, 0, 1, 1], [], []>} : vector<256x96xbf16>, vector<96x256xbf16>, vector<256x256xf32> -> vector<256x256xf32>
    %43 = arith.addf %34, %42 : vector<256x256xf32>
    %44 = vector.extract_strided_slice %43 {offsets = [0, 0], sizes = [128, 256], strides = [1, 1]} : vector<256x256xf32> to vector<128x256xf32>
    %45 = vector.extract_strided_slice %43 {offsets = [128, 0], sizes = [128, 256], strides = [1, 1]} : vector<256x256xf32> to vector<128x256xf32>
    %46 = arith.maximumf %44, %45 : vector<128x256xf32>
    %47 = vector.extract_strided_slice %46 {offsets = [0, 0], sizes = [128, 128], strides = [1, 1]} : vector<128x256xf32> to vector<128x128xf32>
    %48 = vector.extract_strided_slice %46 {offsets = [0, 128], sizes = [128, 128], strides = [1, 1]} : vector<128x256xf32> to vector<128x128xf32>
    %49 = arith.maximumf %47, %48 : vector<128x128xf32>
    %c0_43 = arith.constant 0 : index
    %c0_44 = arith.constant 0 : index
    %50 = vector.load %arg3[%c0_43, %c0_44] : memref<1x128xf32, #tpu.memory_space<vmem>>, vector<1x128xf32>
    %51 = vector.broadcast %50 : vector<1x128xf32> to vector<128x128xf32>
    %52 = arith.addf %49, %51 : vector<128x128xf32>
    %cst_45 = arith.constant 0.000000e+00 : f32
    %53 = vector.broadcast %cst_45 : f32 to vector<128x128xf32>
    %54 = arith.maximumf %52, %53 : vector<128x128xf32>
    %cst_46 = arith.constant 0.000000e+00 : f32
    %55 = vector.broadcast %cst_46 : f32 to vector<8x24x128xf32>
    %c0_47 = arith.constant 0 : index
    %c0_48 = arith.constant 0 : index
    %c0_49 = arith.constant 0 : index
    %56 = vector.load %arg13[%c0_47, %c0_48, %c0_49] : memref<8x24x128xf32, #tpu.memory_space<vmem>>, vector<8x24x128xf32>
    tpu.vector_store %arg13[%c0_47, %c0_48, %c0_49], %55 {strides = array<i32>} : memref<8x24x128xf32, #tpu.memory_space<vmem>>, vector<8x24x128xf32>,
    %57 = vector.extract_strided_slice %54 {offsets = [0, 0], sizes = [16, 128], strides = [1, 1]} : vector<128x128xf32> to vector<16x128xf32>
    %c0_50 = arith.constant 0 : index
    %c0_51 = arith.constant 0 : index
    %c0_52 = arith.constant 0 : index
    %58 = vector.load %arg13[%c0_50, %c0_51, %c0_52] : memref<8x24x128xf32, #tpu.memory_space<vmem>>, vector<1x16x128xf32>
    %59 = vector.shape_cast %58 : vector<1x16x128xf32> to vector<16x128xf32>
    %60 = vector.shape_cast %57 : vector<16x128xf32> to vector<1x16x128xf32>
    tpu.vector_store %arg13[%c0_50, %c0_51, %c0_52], %60 {strides = array<i32>} : memref<8x24x128xf32, #tpu.memory_space<vmem>>, vector<1x16x128xf32>,
    %61 = vector.extract_strided_slice %54 {offsets = [16, 0], sizes = [16, 128], strides = [1, 1]} : vector<128x128xf32> to vector<16x128xf32>
    %c1_53 = arith.constant 1 : index
    %c0_54 = arith.constant 0 : index
    %c0_55 = arith.constant 0 : index
    %62 = vector.load %arg13[%c1_53, %c0_54, %c0_55] : memref<8x24x128xf32, #tpu.memory_space<vmem>>, vector<1x16x128xf32>
    %63 = vector.shape_cast %62 : vector<1x16x128xf32> to vector<16x128xf32>
    %64 = vector.shape_cast %61 : vector<16x128xf32> to vector<1x16x128xf32>
    tpu.vector_store %arg13[%c1_53, %c0_54, %c0_55], %64 {strides = array<i32>} : memref<8x24x128xf32, #tpu.memory_space<vmem>>, vector<1x16x128xf32>,
    %65 = vector.extract_strided_slice %54 {offsets = [32, 0], sizes = [16, 128], strides = [1, 1]} : vector<128x128xf32> to vector<16x128xf32>
    %c2_56 = arith.constant 2 : index
    %c0_57 = arith.constant 0 : index
    %c0_58 = arith.constant 0 : index
    %66 = vector.load %arg13[%c2_56, %c0_57, %c0_58] : memref<8x24x128xf32, #tpu.memory_space<vmem>>, vector<1x16x128xf32>
    %67 = vector.shape_cast %66 : vector<1x16x128xf32> to vector<16x128xf32>
    %68 = vector.shape_cast %65 : vector<16x128xf32> to vector<1x16x128xf32>
    tpu.vector_store %arg13[%c2_56, %c0_57, %c0_58], %68 {strides = array<i32>} : memref<8x24x128xf32, #tpu.memory_space<vmem>>, vector<1x16x128xf32>,
    %69 = vector.extract_strided_slice %54 {offsets = [48, 0], sizes = [16, 128], strides = [1, 1]} : vector<128x128xf32> to vector<16x128xf32>
    %c3_59 = arith.constant 3 : index
    %c0_60 = arith.constant 0 : index
    %c0_61 = arith.constant 0 : index
    %70 = vector.load %arg13[%c3_59, %c0_60, %c0_61] : memref<8x24x128xf32, #tpu.memory_space<vmem>>, vector<1x16x128xf32>
    %71 = vector.shape_cast %70 : vector<1x16x128xf32> to vector<16x128xf32>
    %72 = vector.shape_cast %69 : vector<16x128xf32> to vector<1x16x128xf32>
    tpu.vector_store %arg13[%c3_59, %c0_60, %c0_61], %72 {strides = array<i32>} : memref<8x24x128xf32, #tpu.memory_space<vmem>>, vector<1x16x128xf32>,
    %73 = vector.extract_strided_slice %54 {offsets = [64, 0], sizes = [16, 128], strides = [1, 1]} : vector<128x128xf32> to vector<16x128xf32>
    %c4_62 = arith.constant 4 : index
    %c0_63 = arith.constant 0 : index
    %c0_64 = arith.constant 0 : index
    %74 = vector.load %arg13[%c4_62, %c0_63, %c0_64] : memref<8x24x128xf32, #tpu.memory_space<vmem>>, vector<1x16x128xf32>
    %75 = vector.shape_cast %74 : vector<1x16x128xf32> to vector<16x128xf32>
    %76 = vector.shape_cast %73 : vector<16x128xf32> to vector<1x16x128xf32>
    tpu.vector_store %arg13[%c4_62, %c0_63, %c0_64], %76 {strides = array<i32>} : memref<8x24x128xf32, #tpu.memory_space<vmem>>, vector<1x16x128xf32>,
    %77 = vector.extract_strided_slice %54 {offsets = [80, 0], sizes = [16, 128], strides = [1, 1]} : vector<128x128xf32> to vector<16x128xf32>
    %c5_65 = arith.constant 5 : index
    %c0_66 = arith.constant 0 : index
    %c0_67 = arith.constant 0 : index
    %78 = vector.load %arg13[%c5_65, %c0_66, %c0_67] : memref<8x24x128xf32, #tpu.memory_space<vmem>>, vector<1x16x128xf32>
    %79 = vector.shape_cast %78 : vector<1x16x128xf32> to vector<16x128xf32>
    %80 = vector.shape_cast %77 : vector<16x128xf32> to vector<1x16x128xf32>
    tpu.vector_store %arg13[%c5_65, %c0_66, %c0_67], %80 {strides = array<i32>} : memref<8x24x128xf32, #tpu.memory_space<vmem>>, vector<1x16x128xf32>,
    %81 = vector.extract_strided_slice %54 {offsets = [96, 0], sizes = [16, 128], strides = [1, 1]} : vector<128x128xf32> to vector<16x128xf32>
    %c6 = arith.constant 6 : index
    %c0_68 = arith.constant 0 : index
    %c0_69 = arith.constant 0 : index
    %82 = vector.load %arg13[%c6, %c0_68, %c0_69] : memref<8x24x128xf32, #tpu.memory_space<vmem>>, vector<1x16x128xf32>
    %83 = vector.shape_cast %82 : vector<1x16x128xf32> to vector<16x128xf32>
    %84 = vector.shape_cast %81 : vector<16x128xf32> to vector<1x16x128xf32>
    tpu.vector_store %arg13[%c6, %c0_68, %c0_69], %84 {strides = array<i32>} : memref<8x24x128xf32, #tpu.memory_space<vmem>>, vector<1x16x128xf32>,
    %85 = vector.extract_strided_slice %54 {offsets = [112, 0], sizes = [16, 128], strides = [1, 1]} : vector<128x128xf32> to vector<16x128xf32>
    %c7 = arith.constant 7 : index
    %c0_70 = arith.constant 0 : index
    %c0_71 = arith.constant 0 : index
    %86 = vector.load %arg13[%c7, %c0_70, %c0_71] : memref<8x24x128xf32, #tpu.memory_space<vmem>>, vector<1x16x128xf32>
    %87 = vector.shape_cast %86 : vector<1x16x128xf32> to vector<16x128xf32>
    %88 = vector.shape_cast %85 : vector<16x128xf32> to vector<1x16x128xf32>
    tpu.vector_store %arg13[%c7, %c0_70, %c0_71], %88 {strides = array<i32>} : memref<8x24x128xf32, #tpu.memory_space<vmem>>, vector<1x16x128xf32>,
    %c0_72 = arith.constant 0 : index
    %c0_73 = arith.constant 0 : index
    %c0_74 = arith.constant 0 : index
    %89 = tpu.strided_load %arg13[%c0_72, %c0_73, %c0_74] {strides = array<i32: 1, 2, 1>} : memref<8x24x128xf32, #tpu.memory_space<vmem>>, vector<8x8x128xf32>
    %c0_75 = arith.constant 0 : index
    %c1_76 = arith.constant 1 : index
    %c0_77 = arith.constant 0 : index
    %90 = tpu.strided_load %arg13[%c0_75, %c1_76, %c0_77] {strides = array<i32: 1, 2, 1>} : memref<8x24x128xf32, #tpu.memory_space<vmem>>, vector<8x8x128xf32>
    %91 = tpu.concatenate %89, %90 in 0 : vector<8x8x128xf32>, vector<8x8x128xf32> -> vector<16x8x128xf32>
    %92 = vector.shape_cast %91 : vector<16x8x128xf32> to vector<128x128xf32>
    %93 = arith.truncf %92 : vector<128x128xf32> to vector<128x128xbf16>
    %c0_78 = arith.constant 0 : index
    %c0_79 = arith.constant 0 : index
    %c0_80 = arith.constant 0 : index
    %94 = vector.load %arg4[%c0_78, %c0_79, %c0_80] : memref<5x128x256xbf16, #tpu.memory_space<vmem>>, vector<1x128x256xbf16>
    %95 = vector.shape_cast %94 : vector<1x128x256xbf16> to vector<128x256xbf16>
    %cst_81 = arith.constant dense<0.000000e+00> : vector<128x256xf32>
    %96 = tpu.matmul %93, %95, %cst_81 {dimension_numbers = #tpu.dot_dimension_numbers<[1], [0], [0], [1], [0, 0, 1, 1], [], []>} : vector<128x128xbf16>, vector<128x256xbf16>, vector<128x256xf32> -> vector<128x256xf32>
    %c0_82 = arith.constant 0 : index
    %c1_83 = arith.constant 1 : index
    %c0_84 = arith.constant 0 : index
    %97 = tpu.strided_load %arg13[%c0_82, %c1_83, %c0_84] {strides = array<i32: 1, 2, 1>} : memref<8x24x128xf32, #tpu.memory_space<vmem>>, vector<8x8x128xf32>
    %c0_85 = arith.constant 0 : index
    %c2_86 = arith.constant 2 : index
    %c0_87 = arith.constant 0 : index
    %98 = tpu.strided_load %arg13[%c0_85, %c2_86, %c0_87] {strides = array<i32: 1, 2, 1>} : memref<8x24x128xf32, #tpu.memory_space<vmem>>, vector<8x8x128xf32>
    %99 = tpu.concatenate %97, %98 in 0 : vector<8x8x128xf32>, vector<8x8x128xf32> -> vector<16x8x128xf32>
    %100 = vector.shape_cast %99 : vector<16x8x128xf32> to vector<128x128xf32>
    %101 = arith.truncf %100 : vector<128x128xf32> to vector<128x128xbf16>
    %c1_88 = arith.constant 1 : index
    %c0_89 = arith.constant 0 : index
    %c0_90 = arith.constant 0 : index
    %102 = vector.load %arg4[%c1_88, %c0_89, %c0_90] : memref<5x128x256xbf16, #tpu.memory_space<vmem>>, vector<1x128x256xbf16>
    %103 = vector.shape_cast %102 : vector<1x128x256xbf16> to vector<128x256xbf16>
    %cst_91 = arith.constant dense<0.000000e+00> : vector<128x256xf32>
    %104 = tpu.matmul %101, %103, %cst_91 {dimension_numbers = #tpu.dot_dimension_numbers<[1], [0], [0], [1], [0, 0, 1, 1], [], []>} : vector<128x128xbf16>, vector<128x256xbf16>, vector<128x256xf32> -> vector<128x256xf32>
    %105 = arith.addf %96, %104 : vector<128x256xf32>
    %c0_92 = arith.constant 0 : index
    %c2_93 = arith.constant 2 : index
    %c0_94 = arith.constant 0 : index
    %106 = tpu.strided_load %arg13[%c0_92, %c2_93, %c0_94] {strides = array<i32: 1, 2, 1>} : memref<8x24x128xf32, #tpu.memory_space<vmem>>, vector<8x8x128xf32>
    %c0_95 = arith.constant 0 : index
    %c3_96 = arith.constant 3 : index
    %c0_97 = arith.constant 0 : index
    %107 = tpu.strided_load %arg13[%c0_95, %c3_96, %c0_97] {strides = array<i32: 1, 2, 1>} : memref<8x24x128xf32, #tpu.memory_space<vmem>>, vector<8x8x128xf32>
    %108 = tpu.concatenate %106, %107 in 0 : vector<8x8x128xf32>, vector<8x8x128xf32> -> vector<16x8x128xf32>
    %109 = vector.shape_cast %108 : vector<16x8x128xf32> to vector<128x128xf32>
    %110 = arith.truncf %109 : vector<128x128xf32> to vector<128x128xbf16>
    %c2_98 = arith.constant 2 : index
    %c0_99 = arith.constant 0 : index
    %c0_100 = arith.constant 0 : index
    %111 = vector.load %arg4[%c2_98, %c0_99, %c0_100] : memref<5x128x256xbf16, #tpu.memory_space<vmem>>, vector<1x128x256xbf16>
    %112 = vector.shape_cast %111 : vector<1x128x256xbf16> to vector<128x256xbf16>
    %cst_101 = arith.constant dense<0.000000e+00> : vector<128x256xf32>
    %113 = tpu.matmul %110, %112, %cst_101 {dimension_numbers = #tpu.dot_dimension_numbers<[1], [0], [0], [1], [0, 0, 1, 1], [], []>} : vector<128x128xbf16>, vector<128x256xbf16>, vector<128x256xf32> -> vector<128x256xf32>
    %114 = arith.addf %105, %113 : vector<128x256xf32>
    %c0_102 = arith.constant 0 : index
    %c3_103 = arith.constant 3 : index
    %c0_104 = arith.constant 0 : index
    %115 = tpu.strided_load %arg13[%c0_102, %c3_103, %c0_104] {strides = array<i32: 1, 2, 1>} : memref<8x24x128xf32, #tpu.memory_space<vmem>>, vector<8x8x128xf32>
    %c0_105 = arith.constant 0 : index
    %c4_106 = arith.constant 4 : index
    %c0_107 = arith.constant 0 : index
    %116 = tpu.strided_load %arg13[%c0_105, %c4_106, %c0_107] {strides = array<i32: 1, 2, 1>} : memref<8x24x128xf32, #tpu.memory_space<vmem>>, vector<8x8x128xf32>
    %117 = tpu.concatenate %115, %116 in 0 : vector<8x8x128xf32>, vector<8x8x128xf32> -> vector<16x8x128xf32>
    %118 = vector.shape_cast %117 : vector<16x8x128xf32> to vector<128x128xf32>
    %119 = arith.truncf %118 : vector<128x128xf32> to vector<128x128xbf16>
    %c3_108 = arith.constant 3 : index
    %c0_109 = arith.constant 0 : index
    %c0_110 = arith.constant 0 : index
    %120 = vector.load %arg4[%c3_108, %c0_109, %c0_110] : memref<5x128x256xbf16, #tpu.memory_space<vmem>>, vector<1x128x256xbf16>
    %121 = vector.shape_cast %120 : vector<1x128x256xbf16> to vector<128x256xbf16>
    %cst_111 = arith.constant dense<0.000000e+00> : vector<128x256xf32>
    %122 = tpu.matmul %119, %121, %cst_111 {dimension_numbers = #tpu.dot_dimension_numbers<[1], [0], [0], [1], [0, 0, 1, 1], [], []>} : vector<128x128xbf16>, vector<128x256xbf16>, vector<128x256xf32> -> vector<128x256xf32>
    %123 = arith.addf %114, %122 : vector<128x256xf32>
    %c0_112 = arith.constant 0 : index
    %c4_113 = arith.constant 4 : index
    %c0_114 = arith.constant 0 : index
    %124 = tpu.strided_load %arg13[%c0_112, %c4_113, %c0_114] {strides = array<i32: 1, 2, 1>} : memref<8x24x128xf32, #tpu.memory_space<vmem>>, vector<8x8x128xf32>
    %c0_115 = arith.constant 0 : index
    %c5_116 = arith.constant 5 : index
    %c0_117 = arith.constant 0 : index
    %125 = tpu.strided_load %arg13[%c0_115, %c5_116, %c0_117] {strides = array<i32: 1, 2, 1>} : memref<8x24x128xf32, #tpu.memory_space<vmem>>, vector<8x8x128xf32>
    %126 = tpu.concatenate %124, %125 in 0 : vector<8x8x128xf32>, vector<8x8x128xf32> -> vector<16x8x128xf32>
    %127 = vector.shape_cast %126 : vector<16x8x128xf32> to vector<128x128xf32>
    %128 = arith.truncf %127 : vector<128x128xf32> to vector<128x128xbf16>
    %c4_118 = arith.constant 4 : index
    %c0_119 = arith.constant 0 : index
    %c0_120 = arith.constant 0 : index
    %129 = vector.load %arg4[%c4_118, %c0_119, %c0_120] : memref<5x128x256xbf16, #tpu.memory_space<vmem>>, vector<1x128x256xbf16>
    %130 = vector.shape_cast %129 : vector<1x128x256xbf16> to vector<128x256xbf16>
    %cst_121 = arith.constant dense<0.000000e+00> : vector<128x256xf32>
    %131 = tpu.matmul %128, %130, %cst_121 {dimension_numbers = #tpu.dot_dimension_numbers<[1], [0], [0], [1], [0, 0, 1, 1], [], []>} : vector<128x128xbf16>, vector<128x256xbf16>, vector<128x256xf32> -> vector<128x256xf32>
    %132 = arith.addf %123, %131 : vector<128x256xf32>
    %133 = vector.extract_strided_slice %132 {offsets = [0, 0], sizes = [64, 256], strides = [1, 1]} : vector<128x256xf32> to vector<64x256xf32>
    %134 = vector.extract_strided_slice %132 {offsets = [64, 0], sizes = [64, 256], strides = [1, 1]} : vector<128x256xf32> to vector<64x256xf32>
    %135 = arith.maximumf %133, %134 : vector<64x256xf32>
    %136 = vector.extract_strided_slice %135 {offsets = [0, 0], sizes = [64, 128], strides = [1, 1]} : vector<64x256xf32> to vector<64x128xf32>
    %137 = vector.extract_strided_slice %135 {offsets = [0, 128], sizes = [64, 128], strides = [1, 1]} : vector<64x256xf32> to vector<64x128xf32>
    %138 = arith.maximumf %136, %137 : vector<64x128xf32>
    %c0_122 = arith.constant 0 : index
    %c0_123 = arith.constant 0 : index
    %139 = vector.load %arg5[%c0_122, %c0_123] : memref<1x128xf32, #tpu.memory_space<vmem>>, vector<1x128xf32>
    %140 = vector.broadcast %139 : vector<1x128xf32> to vector<64x128xf32>
    %141 = arith.addf %138, %140 : vector<64x128xf32>
    %cst_124 = arith.constant 0.000000e+00 : f32
    %142 = vector.broadcast %cst_124 : f32 to vector<64x128xf32>
    %143 = arith.maximumf %141, %142 : vector<64x128xf32>
    %144 = vector.extract_strided_slice %143 {offsets = [0, 0], sizes = [8, 128], strides = [1, 1]} : vector<64x128xf32> to vector<8x128xf32>
    %c0_125 = arith.constant 0 : index
    %c0_126 = arith.constant 0 : index
    %c0_127 = arith.constant 0 : index
    %145 = vector.load %arg14[%c0_125, %c0_126, %c0_127] : memref<8x8x128xf32, #tpu.memory_space<vmem>>, vector<1x8x128xf32>
    %146 = vector.shape_cast %145 : vector<1x8x128xf32> to vector<8x128xf32>
    %147 = vector.shape_cast %144 : vector<8x128xf32> to vector<1x8x128xf32>
    tpu.vector_store %arg14[%c0_125, %c0_126, %c0_127], %147 {strides = array<i32>} : memref<8x8x128xf32, #tpu.memory_space<vmem>>, vector<1x8x128xf32>,
    %148 = vector.extract_strided_slice %143 {offsets = [8, 0], sizes = [8, 128], strides = [1, 1]} : vector<64x128xf32> to vector<8x128xf32>
    %c1_128 = arith.constant 1 : index
    %c0_129 = arith.constant 0 : index
    %c0_130 = arith.constant 0 : index
    %149 = vector.load %arg14[%c1_128, %c0_129, %c0_130] : memref<8x8x128xf32, #tpu.memory_space<vmem>>, vector<1x8x128xf32>
    %150 = vector.shape_cast %149 : vector<1x8x128xf32> to vector<8x128xf32>
    %151 = vector.shape_cast %148 : vector<8x128xf32> to vector<1x8x128xf32>
    tpu.vector_store %arg14[%c1_128, %c0_129, %c0_130], %151 {strides = array<i32>} : memref<8x8x128xf32, #tpu.memory_space<vmem>>, vector<1x8x128xf32>,
    %152 = vector.extract_strided_slice %143 {offsets = [16, 0], sizes = [8, 128], strides = [1, 1]} : vector<64x128xf32> to vector<8x128xf32>
    %c2_131 = arith.constant 2 : index
    %c0_132 = arith.constant 0 : index
    %c0_133 = arith.constant 0 : index
    %153 = vector.load %arg14[%c2_131, %c0_132, %c0_133] : memref<8x8x128xf32, #tpu.memory_space<vmem>>, vector<1x8x128xf32>
    %154 = vector.shape_cast %153 : vector<1x8x128xf32> to vector<8x128xf32>
    %155 = vector.shape_cast %152 : vector<8x128xf32> to vector<1x8x128xf32>
    tpu.vector_store %arg14[%c2_131, %c0_132, %c0_133], %155 {strides = array<i32>} : memref<8x8x128xf32, #tpu.memory_space<vmem>>, vector<1x8x128xf32>,
    %156 = vector.extract_strided_slice %143 {offsets = [24, 0], sizes = [8, 128], strides = [1, 1]} : vector<64x128xf32> to vector<8x128xf32>
    %c3_134 = arith.constant 3 : index
    %c0_135 = arith.constant 0 : index
    %c0_136 = arith.constant 0 : index
    %157 = vector.load %arg14[%c3_134, %c0_135, %c0_136] : memref<8x8x128xf32, #tpu.memory_space<vmem>>, vector<1x8x128xf32>
    %158 = vector.shape_cast %157 : vector<1x8x128xf32> to vector<8x128xf32>
    %159 = vector.shape_cast %156 : vector<8x128xf32> to vector<1x8x128xf32>
    tpu.vector_store %arg14[%c3_134, %c0_135, %c0_136], %159 {strides = array<i32>} : memref<8x8x128xf32, #tpu.memory_space<vmem>>, vector<1x8x128xf32>,
    %160 = vector.extract_strided_slice %143 {offsets = [32, 0], sizes = [8, 128], strides = [1, 1]} : vector<64x128xf32> to vector<8x128xf32>
    %c4_137 = arith.constant 4 : index
    %c0_138 = arith.constant 0 : index
    %c0_139 = arith.constant 0 : index
    %161 = vector.load %arg14[%c4_137, %c0_138, %c0_139] : memref<8x8x128xf32, #tpu.memory_space<vmem>>, vector<1x8x128xf32>
    %162 = vector.shape_cast %161 : vector<1x8x128xf32> to vector<8x128xf32>
    %163 = vector.shape_cast %160 : vector<8x128xf32> to vector<1x8x128xf32>
    tpu.vector_store %arg14[%c4_137, %c0_138, %c0_139], %163 {strides = array<i32>} : memref<8x8x128xf32, #tpu.memory_space<vmem>>, vector<1x8x128xf32>,
    %164 = vector.extract_strided_slice %143 {offsets = [40, 0], sizes = [8, 128], strides = [1, 1]} : vector<64x128xf32> to vector<8x128xf32>
    %c5_140 = arith.constant 5 : index
    %c0_141 = arith.constant 0 : index
    %c0_142 = arith.constant 0 : index
    %165 = vector.load %arg14[%c5_140, %c0_141, %c0_142] : memref<8x8x128xf32, #tpu.memory_space<vmem>>, vector<1x8x128xf32>
    %166 = vector.shape_cast %165 : vector<1x8x128xf32> to vector<8x128xf32>
    %167 = vector.shape_cast %164 : vector<8x128xf32> to vector<1x8x128xf32>
    tpu.vector_store %arg14[%c5_140, %c0_141, %c0_142], %167 {strides = array<i32>} : memref<8x8x128xf32, #tpu.memory_space<vmem>>, vector<1x8x128xf32>,
    %168 = vector.extract_strided_slice %143 {offsets = [48, 0], sizes = [8, 128], strides = [1, 1]} : vector<64x128xf32> to vector<8x128xf32>
    %c6_143 = arith.constant 6 : index
    %c0_144 = arith.constant 0 : index
    %c0_145 = arith.constant 0 : index
    %169 = vector.load %arg14[%c6_143, %c0_144, %c0_145] : memref<8x8x128xf32, #tpu.memory_space<vmem>>, vector<1x8x128xf32>
    %170 = vector.shape_cast %169 : vector<1x8x128xf32> to vector<8x128xf32>
    %171 = vector.shape_cast %168 : vector<8x128xf32> to vector<1x8x128xf32>
    tpu.vector_store %arg14[%c6_143, %c0_144, %c0_145], %171 {strides = array<i32>} : memref<8x8x128xf32, #tpu.memory_space<vmem>>, vector<1x8x128xf32>,
    %172 = vector.extract_strided_slice %143 {offsets = [56, 0], sizes = [8, 128], strides = [1, 1]} : vector<64x128xf32> to vector<8x128xf32>
    %c7_146 = arith.constant 7 : index
    %c0_147 = arith.constant 0 : index
    %c0_148 = arith.constant 0 : index
    %173 = vector.load %arg14[%c7_146, %c0_147, %c0_148] : memref<8x8x128xf32, #tpu.memory_space<vmem>>, vector<1x8x128xf32>
    %174 = vector.shape_cast %173 : vector<1x8x128xf32> to vector<8x128xf32>
    %175 = vector.shape_cast %172 : vector<8x128xf32> to vector<1x8x128xf32>
    tpu.vector_store %arg14[%c7_146, %c0_147, %c0_148], %175 {strides = array<i32>} : memref<8x8x128xf32, #tpu.memory_space<vmem>>, vector<1x8x128xf32>,
    %c0_149 = arith.constant 0 : index
    %c0_150 = arith.constant 0 : index
    %c0_151 = arith.constant 0 : index
    %176 = vector.load %arg14[%c0_149, %c0_150, %c0_151] : memref<8x8x128xf32, #tpu.memory_space<vmem>>, vector<8x1x128xf32>
    %177 = vector.shape_cast %176 : vector<8x1x128xf32> to vector<8x128xf32>
    %178 = arith.truncf %177 : vector<8x128xf32> to vector<8x128xbf16>
    %c0_152 = arith.constant 0 : index
    %c0_153 = arith.constant 0 : index
    %c0_154 = arith.constant 0 : index
    %179 = vector.load %arg6[%c0_152, %c0_153, %c0_154] : memref<5x128x128xbf16, #tpu.memory_space<vmem>>, vector<1x128x128xbf16>
    %180 = vector.shape_cast %179 : vector<1x128x128xbf16> to vector<128x128xbf16>
    %cst_155 = arith.constant dense<0.000000e+00> : vector<8x128xf32>
    %181 = tpu.matmul %178, %180, %cst_155 {dimension_numbers = #tpu.dot_dimension_numbers<[1], [0], [0], [1], [0, 0, 1, 1], [], []>} : vector<8x128xbf16>, vector<128x128xbf16>, vector<8x128xf32> -> vector<8x128xf32>
    %c0_156 = arith.constant 0 : index
    %c1_157 = arith.constant 1 : index
    %c0_158 = arith.constant 0 : index
    %182 = vector.load %arg14[%c0_156, %c1_157, %c0_158] : memref<8x8x128xf32, #tpu.memory_space<vmem>>, vector<8x1x128xf32>
    %183 = vector.shape_cast %182 : vector<8x1x128xf32> to vector<8x128xf32>
    %184 = arith.truncf %183 : vector<8x128xf32> to vector<8x128xbf16>
    %c1_159 = arith.constant 1 : index
    %c0_160 = arith.constant 0 : index
    %c0_161 = arith.constant 0 : index
    %185 = vector.load %arg6[%c1_159, %c0_160, %c0_161] : memref<5x128x128xbf16, #tpu.memory_space<vmem>>, vector<1x128x128xbf16>
    %186 = vector.shape_cast %185 : vector<1x128x128xbf16> to vector<128x128xbf16>
    %cst_162 = arith.constant dense<0.000000e+00> : vector<8x128xf32>
    %187 = tpu.matmul %184, %186, %cst_162 {dimension_numbers = #tpu.dot_dimension_numbers<[1], [0], [0], [1], [0, 0, 1, 1], [], []>} : vector<8x128xbf16>, vector<128x128xbf16>, vector<8x128xf32> -> vector<8x128xf32>
    %188 = arith.addf %181, %187 : vector<8x128xf32>
    %c0_163 = arith.constant 0 : index
    %c2_164 = arith.constant 2 : index
    %c0_165 = arith.constant 0 : index
    %189 = vector.load %arg14[%c0_163, %c2_164, %c0_165] : memref<8x8x128xf32, #tpu.memory_space<vmem>>, vector<8x1x128xf32>
    %190 = vector.shape_cast %189 : vector<8x1x128xf32> to vector<8x128xf32>
    %191 = arith.truncf %190 : vector<8x128xf32> to vector<8x128xbf16>
    %c2_166 = arith.constant 2 : index
    %c0_167 = arith.constant 0 : index
    %c0_168 = arith.constant 0 : index
    %192 = vector.load %arg6[%c2_166, %c0_167, %c0_168] : memref<5x128x128xbf16, #tpu.memory_space<vmem>>, vector<1x128x128xbf16>
    %193 = vector.shape_cast %192 : vector<1x128x128xbf16> to vector<128x128xbf16>
    %cst_169 = arith.constant dense<0.000000e+00> : vector<8x128xf32>
    %194 = tpu.matmul %191, %193, %cst_169 {dimension_numbers = #tpu.dot_dimension_numbers<[1], [0], [0], [1], [0, 0, 1, 1], [], []>} : vector<8x128xbf16>, vector<128x128xbf16>, vector<8x128xf32> -> vector<8x128xf32>
    %195 = arith.addf %188, %194 : vector<8x128xf32>
    %c0_170 = arith.constant 0 : index
    %c3_171 = arith.constant 3 : index
    %c0_172 = arith.constant 0 : index
    %196 = vector.load %arg14[%c0_170, %c3_171, %c0_172] : memref<8x8x128xf32, #tpu.memory_space<vmem>>, vector<8x1x128xf32>
    %197 = vector.shape_cast %196 : vector<8x1x128xf32> to vector<8x128xf32>
    %198 = arith.truncf %197 : vector<8x128xf32> to vector<8x128xbf16>
    %c3_173 = arith.constant 3 : index
    %c0_174 = arith.constant 0 : index
    %c0_175 = arith.constant 0 : index
    %199 = vector.load %arg6[%c3_173, %c0_174, %c0_175] : memref<5x128x128xbf16, #tpu.memory_space<vmem>>, vector<1x128x128xbf16>
    %200 = vector.shape_cast %199 : vector<1x128x128xbf16> to vector<128x128xbf16>
    %cst_176 = arith.constant dense<0.000000e+00> : vector<8x128xf32>
    %201 = tpu.matmul %198, %200, %cst_176 {dimension_numbers = #tpu.dot_dimension_numbers<[1], [0], [0], [1], [0, 0, 1, 1], [], []>} : vector<8x128xbf16>, vector<128x128xbf16>, vector<8x128xf32> -> vector<8x128xf32>
    %202 = arith.addf %195, %201 : vector<8x128xf32>
    %c0_177 = arith.constant 0 : index
    %c4_178 = arith.constant 4 : index
    %c0_179 = arith.constant 0 : index
    %203 = vector.load %arg14[%c0_177, %c4_178, %c0_179] : memref<8x8x128xf32, #tpu.memory_space<vmem>>, vector<8x1x128xf32>
    %204 = vector.shape_cast %203 : vector<8x1x128xf32> to vector<8x128xf32>
    %205 = arith.truncf %204 : vector<8x128xf32> to vector<8x128xbf16>
    %c4_180 = arith.constant 4 : index
    %c0_181 = arith.constant 0 : index
    %c0_182 = arith.constant 0 : index
    %206 = vector.load %arg6[%c4_180, %c0_181, %c0_182] : memref<5x128x128xbf16, #tpu.memory_space<vmem>>, vector<1x128x128xbf16>
    %207 = vector.shape_cast %206 : vector<1x128x128xbf16> to vector<128x128xbf16>
    %cst_183 = arith.constant dense<0.000000e+00> : vector<8x128xf32>
    %208 = tpu.matmul %205, %207, %cst_183 {dimension_numbers = #tpu.dot_dimension_numbers<[1], [0], [0], [1], [0, 0, 1, 1], [], []>} : vector<8x128xbf16>, vector<128x128xbf16>, vector<8x128xf32> -> vector<8x128xf32>
    %209 = arith.addf %202, %208 : vector<8x128xf32>
    %c0_184 = arith.constant 0 : index
    %c0_185 = arith.constant 0 : index
    %210 = vector.load %arg7[%c0_184, %c0_185] : memref<1x128xf32, #tpu.memory_space<vmem>>, vector<1x128xf32>
    %211 = vector.broadcast %210 : vector<1x128xf32> to vector<8x128xf32>
    %212 = arith.addf %209, %211 : vector<8x128xf32>
    %cst_186 = arith.constant 0.000000e+00 : f32
    %213 = vector.broadcast %cst_186 : f32 to vector<8x128xf32>
    %214 = arith.maximumf %212, %213 : vector<8x128xf32>
    %215 = arith.truncf %214 : vector<8x128xf32> to vector<8x128xbf16>
    %c0_187 = arith.constant 0 : index
    %c0_188 = arith.constant 0 : index
    %216 = vector.load %arg8[%c0_187, %c0_188] : memref<128x128xbf16, #tpu.memory_space<vmem>>, vector<128x128xbf16>
    %cst_189 = arith.constant dense<0.000000e+00> : vector<8x128xf32>
    %217 = tpu.matmul %215, %216, %cst_189 {dimension_numbers = #tpu.dot_dimension_numbers<[1], [0], [0], [1], [0, 0, 1, 1], [], []>} : vector<8x128xbf16>, vector<128x128xbf16>, vector<8x128xf32> -> vector<8x128xf32>
    %c0_190 = arith.constant 0 : index
    %c0_191 = arith.constant 0 : index
    %218 = vector.load %arg9[%c0_190, %c0_191] : memref<1x128xf32, #tpu.memory_space<vmem>>, vector<1x128xf32>
    %219 = vector.broadcast %218 : vector<1x128xf32> to vector<8x128xf32>
    %220 = arith.addf %217, %219 : vector<8x128xf32>
    %cst_192 = arith.constant 0.000000e+00 : f32
    %221 = vector.broadcast %cst_192 : f32 to vector<8x128xf32>
    %222 = arith.maximumf %220, %221 : vector<8x128xf32>
    %223 = arith.truncf %222 : vector<8x128xf32> to vector<8x128xbf16>
    %c0_193 = arith.constant 0 : index
    %c0_194 = arith.constant 0 : index
    %224 = vector.load %arg10[%c0_193, %c0_194] : memref<128x128xbf16, #tpu.memory_space<vmem>>, vector<128x128xbf16>
    %cst_195 = arith.constant dense<0.000000e+00> : vector<8x128xf32>
    %225 = tpu.matmul %223, %224, %cst_195 {dimension_numbers = #tpu.dot_dimension_numbers<[1], [0], [0], [1], [0, 0, 1, 1], [], []>} : vector<8x128xbf16>, vector<128x128xbf16>, vector<8x128xf32> -> vector<8x128xf32>
    %c0_196 = arith.constant 0 : index
    %c0_197 = arith.constant 0 : index
    %226 = vector.load %arg11[%c0_196, %c0_197] : memref<1x128xf32, #tpu.memory_space<vmem>>, vector<1x128xf32>
    %227 = vector.broadcast %226 : vector<1x128xf32> to vector<8x128xf32>
    %228 = arith.addf %225, %227 : vector<8x128xf32>
    %c0_198 = arith.constant 0 : index
    %c0_199 = arith.constant 0 : index
    %229 = vector.load %arg12[%c0_198, %c0_199] : memref<8x128xf32, #tpu.memory_space<vmem>>, vector<8x128xf32>
    tpu.vector_store %arg12[%c0_198, %c0_199], %228 {strides = array<i32>} : memref<8x128xf32, #tpu.memory_space<vmem>>, vector<8x128xf32>,
    return
  }
  func.func @transform_0(%arg0: i32) -> (i32, i32, i32) {
    %c0_i32 = arith.constant 0 : i32
    %c0_i32_0 = arith.constant 0 : i32
    %c0_i32_1 = arith.constant 0 : i32
    return %arg0, %c0_i32, %c0_i32_0 : i32, i32, i32
  }
  func.func @transform_1(%arg0: i32) -> (i32, i32, i32) {
    %c0_i32 = arith.constant 0 : i32
    %c0_i32_0 = arith.constant 0 : i32
    %c0_i32_1 = arith.constant 0 : i32
    %c0_i32_2 = arith.constant 0 : i32
    return %c0_i32, %c0_i32_0, %c0_i32_1 : i32, i32, i32
  }
  func.func @transform_2(%arg0: i32) -> (i32, i32) {
    %c0_i32 = arith.constant 0 : i32
    %c0_i32_0 = arith.constant 0 : i32
    %c0_i32_1 = arith.constant 0 : i32
    return %c0_i32, %c0_i32_0 : i32, i32
  }
  func.func @transform_3(%arg0: i32) -> (i32, i32, i32) {
    %c0_i32 = arith.constant 0 : i32
    %c0_i32_0 = arith.constant 0 : i32
    %c0_i32_1 = arith.constant 0 : i32
    %c0_i32_2 = arith.constant 0 : i32
    return %c0_i32, %c0_i32_0, %c0_i32_1 : i32, i32, i32
  }
  func.func @transform_4(%arg0: i32) -> (i32, i32) {
    %c0_i32 = arith.constant 0 : i32
    %c0_i32_0 = arith.constant 0 : i32
    %c0_i32_1 = arith.constant 0 : i32
    return %c0_i32, %c0_i32_0 : i32, i32
  }
  func.func @transform_5(%arg0: i32) -> (i32, i32, i32) {
    %c0_i32 = arith.constant 0 : i32
    %c0_i32_0 = arith.constant 0 : i32
    %c0_i32_1 = arith.constant 0 : i32
    %c0_i32_2 = arith.constant 0 : i32
    return %c0_i32, %c0_i32_0, %c0_i32_1 : i32, i32, i32
  }
  func.func @transform_6(%arg0: i32) -> (i32, i32) {
    %c0_i32 = arith.constant 0 : i32
    %c0_i32_0 = arith.constant 0 : i32
    %c0_i32_1 = arith.constant 0 : i32
    return %c0_i32, %c0_i32_0 : i32, i32
  }
  func.func @transform_7(%arg0: i32) -> (i32, i32) {
    %c0_i32 = arith.constant 0 : i32
    %c0_i32_0 = arith.constant 0 : i32
    %c0_i32_1 = arith.constant 0 : i32
    return %c0_i32, %c0_i32_0 : i32, i32
  }
  func.func @transform_8(%arg0: i32) -> (i32, i32) {
    %c0_i32 = arith.constant 0 : i32
    %c0_i32_0 = arith.constant 0 : i32
    %c0_i32_1 = arith.constant 0 : i32
    return %c0_i32, %c0_i32_0 : i32, i32
  }
  func.func @transform_9(%arg0: i32) -> (i32, i32) {
    %c0_i32 = arith.constant 0 : i32
    %c0_i32_0 = arith.constant 0 : i32
    %c0_i32_1 = arith.constant 0 : i32
    return %c0_i32, %c0_i32_0 : i32, i32
  }
  func.func @transform_10(%arg0: i32) -> (i32, i32) {
    %c0_i32 = arith.constant 0 : i32
    %c0_i32_0 = arith.constant 0 : i32
    %c0_i32_1 = arith.constant 0 : i32
    return %c0_i32, %c0_i32_0 : i32, i32
  }
  func.func @transform_11(%arg0: i32) -> (i32, i32) {
    %c0_i32 = arith.constant 0 : i32
    %c0_i32_0 = arith.constant 0 : i32
    return %arg0, %c0_i32 : i32, i32
  }
}

</mosaic_0001>

<bundles_post_ra>
// kernel: net_forward.1
= control target key start
LH: loop header
LB: loop body
LE: loop exit
PB: predicated region body
PF: predicated region fallthrough
CT: control target
= control target key end

     0   :  { %16 = vsyncpa [#allocation5], 0  ;;  %s7931_s0 = inlined_call_operand.vmem [shape: f32[8,40,96], index: 0, kind: input, shape index: {}]   ;;  %s7932_s1 = inlined_call_operand.hbm [shape: bf16[5,96,256], index: 1, kind: input, shape index: {}]   ;;  %s7933_s2 = inlined_call_operand.vmem [shape: f32[1,128], index: 2, kind: input, shape index: {}]   ;;  %s7934_s3 = inlined_call_operand.vmem [shape: bf16[5,128,256], index: 3, kind: input, shape index: {}]   ;;  %s7935_s4 = inlined_call_operand.vmem [shape: f32[1,128], index: 4, kind: input, shape index: {}]   ;;  %s7936_s5 = inlined_call_operand.vmem [shape: bf16[5,128,128], index: 5, kind: input, shape index: {}]   ;;  %s7937_s6 = inlined_call_operand.vmem [shape: f32[1,128], index: 6, kind: input, shape index: {}]   ;;  %s7938_s7 = inlined_call_operand.vmem [shape: bf16[128,128], index: 7, kind: input, shape index: {}]   ;;  %s7939_s8 = inlined_call_operand.vmem [shape: f32[1,128], index: 8, kind: input, shape index: {}]   ;;  %s7940_s9 = inlined_call_operand.hbm [shape: bf16[128,128], index: 9, kind: input, shape index: {}]   ;;  %s7941_s10 = inlined_call_operand.vmem [shape: f32[1,128], index: 10, kind: input, shape index: {}]   ;;  %s7942_s11 = inlined_call_operand.vmem [shape: f32[8,128], index: 11, kind: output, shape index: {}]  }
   0x1   :  { %s24_s19 = sshll.u32 %s7932_s1, 4  ;;  %s25_s19 = int_to_ptr.hbm [resolvable:$true] %s24_s19 }
   0x2   :  { %17 = vsyncpa [#allocation7], 0  ;;  %s5524_s20 = smov [#allocation4]   ;;  %s51_s24 = sshll.u32 %s7940_s9, 4  ;;  %s52_s24 = int_to_ptr.hbm [resolvable:$true] %s51_s24 }
   0x3   :  { %s26_s21 = sshll.u32 %s5524_s20, 4  ;;  %s5525_s25 = smov 128   ;;  %s27_s21 = int_to_ptr.vmem [resolvable:$true] %s26_s21 }
   0x4   :  { %s5526_s26 = smov 8   ;;  %s5527_s27 = smov [#allocation6]  }
   0x5   :  { %32 = dma.hbm_to_vmem [thread:$0]  %s25_s19, 7680, %s27_s21, [#allocation5], %s5525_s25, %s5525_s25, %s5526_s26  }
   0x6   :  { %s53_s28 = sshll.u32 %s5527_s27, 4  ;;  %s5528_s29 = smov 64   ;;  %s54_s28 = int_to_ptr.vmem [resolvable:$true] %s53_s28 }
   0x7   :  { %s5529_s30 = smov 4  }
   0x8   :  { %59 = dma.hbm_to_vmem [thread:$0]  %s52_s24, 1024, %s54_s28, [#allocation7], %s5528_s29, %s5528_s29, %s5529_s30  }
   0x9   :  { %5520 = dma.done.wait [#allocation5], 7680  }
   0xa   :  { %5521 = vsyncadd [#allocation5], 4294959616 }
   0xb   :  { %5522 = dma.done.wait [#allocation7], 1024  }
   0xc   :  { %5523 = vsyncadd [#allocation7], 4294966272  ;;  %v4186_v0 = vld [vmem:[#allocation4 + $0xb0] sm:$0xf]  ;;  %v5287_v1 = vld [vmem:[#allocation4 + $0xb4] sm:$0xf0] }
   0xd   :  { %v5286_v2 = vld [vmem:[#allocation4 + $0xb4] sm:$0xf]  ;;  %v4187_v3 = vor.u32 %v5287_v1, %v4186_v0  ;;  %v4188_v4 = vld [vmem:[#allocation4 + $0xb8] sm:$0xf0]  ;;  %v4266_v5 = vld [vmem:[#allocation4 + $0x50] sm:$0xf] }
   0xe   :  { %v5275_v6 = vld [vmem:[#allocation4 + $0x54] sm:$0xf0]  ;;  %v4191_v7 = vor.u32 %v5286_v2, %v4188_v4  ;;  %v5274_v9 = vld [vmem:[#allocation4 + $0x54] sm:$0xf]  ;;  %v4268_v10 = vld [vmem:[#allocation4 + $0x58] sm:$0xf0] }
   0xf   :  { %v4267_v8 = vor.u32 %v5275_v6, %v4266_v5  ;;  %v4178_v11 = vld [vmem:[#allocation4 + $0xa0] sm:$0xf]  ;;  %326 = vmatpush.bf16.msra.mxu0 %v4187_v3  ;;  %v4271_v12 = vor.u32 %v5274_v9, %v4268_v10  ;;  %v5285_v13 = vld [vmem:[#allocation4 + $0xa4] sm:$0xf0]  ;;  %v5284_v14 = vld [vmem:[#allocation4 + $0xa4] sm:$0xf] }
  0x10   :  { %v4180_v15 = vld [vmem:[#allocation4 + $0xa8] sm:$0xf0]  ;;  %415 = vmatpush.bf16.msra.mxu1 %v4191_v7  ;;  %v4179_v16 = vor.u32 %v5285_v13, %v4178_v11  ;;  %v4258_v18 = vld [vmem:[#allocation4 + $0x40] sm:$0xf]  ;;  %v5273_v19 = vld [vmem:[#allocation4 + $0x44] sm:$0xf0] }
  0x11   :  { %588 = vmatpush.bf16.msra.mxu2 %v4267_v8  ;;  %v4183_v17 = vor.u32 %v5284_v14, %v4180_v15  ;;  %v5272_v20 = vld [vmem:[#allocation4 + $0x44] sm:$0xf]  ;;  %677 = vmatpush.bf16.msra.mxu3 %v4271_v12  ;;  %v4259_v21 = vor.u32 %v5273_v19, %v4258_v18  ;;  %v4260_v22 = vld [vmem:[#allocation4 + $0x48] sm:$0xf0]  ;;  %v4170_v23 = vld [vmem:[#allocation4 + $0x90] sm:$0xf] }
  0x12   :  { %v5283_v24 = vld [vmem:[#allocation4 + $0x94] sm:$0xf0]  ;;  %v4263_v25 = vor.u32 %v5272_v20, %v4260_v22  ;;  %v5282_v26 = vld [vmem:[#allocation4 + $0x94] sm:$0xf]  ;;  %v4172_v27 = vld [vmem:[#allocation4 + $0x98] sm:$0xf0] }
  0x13   :  { %v4250_v28 = vld [vmem:[#allocation4 + $0x30] sm:$0xf]  ;;  %327 = vmatpush.bf16.msra.mxu0 %v4179_v16  ;;  %v4171_v29 = vor.u32 %v5283_v24, %v4170_v23  ;;  %v5271_v30 = vld [vmem:[#allocation4 + $0x34] sm:$0xf0]  ;;  %v5270_v31 = vld [vmem:[#allocation4 + $0x34] sm:$0xf]  ;;  %v4175_v33 = vor.u32 %v5282_v26, %v4172_v27 }
  0x14   :  { %v4252_v32 = vld [vmem:[#allocation4 + $0x38] sm:$0xf0]  ;;  %416 = vmatpush.bf16.msra.mxu1 %v4183_v17  ;;  %v4251_v34 = vor.u32 %v5271_v30, %v4250_v28  ;;  %v4162_v35 = vld [vmem:[#allocation4 + $0x80] sm:$0xf]  ;;  %v5281_v36 = vld [vmem:[#allocation4 + $0x84] sm:$0xf0] }
  0x15   :  { %589 = vmatpush.bf16.msra.mxu2 %v4259_v21  ;;  %v5280_v37 = vld [vmem:[#allocation4 + $0x84] sm:$0xf]  ;;  %678 = vmatpush.bf16.msra.mxu3 %v4263_v25  ;;  %v4255_v38 = vor.u32 %v5270_v31, %v4252_v32  ;;  %v4164_v39 = vld [vmem:[#allocation4 + $0x88] sm:$0xf0]  ;;  %v4242_v40 = vld [vmem:[#allocation4 + $0x20] sm:$0xf]  ;;  %v4163_v44 = vor.u32 %v5281_v36, %v4162_v35 }
  0x16   :  { %v5269_v41 = vld [vmem:[#allocation4 + $0x24] sm:$0xf0]  ;;  %v5268_v42 = vld [vmem:[#allocation4 + $0x24] sm:$0xf]  ;;  %v4244_v43 = vld [vmem:[#allocation4 + $0x28] sm:$0xf0]  ;;  %v4167_v45 = vor.u32 %v5280_v37, %v4164_v39 }
  0x17   :  { %328 = vmatpush.bf16.msra.mxu0 %v4171_v29  ;;  %v4243_v46 = vor.u32 %v5269_v41, %v4242_v40  ;;  %v4154_v47 = vld [vmem:[#allocation4 + $0x70] sm:$0xf]  ;;  %v5279_v48 = vld [vmem:[#allocation4 + $0x74] sm:$0xf0]  ;;  %v5278_v49 = vld [vmem:[#allocation4 + $0x74] sm:$0xf]  ;;  %v4247_v50 = vor.u32 %v5268_v42, %v4244_v43 }
  0x18   :  { %417 = vmatpush.bf16.msra.mxu1 %v4175_v33  ;;  %v4156_v51 = vld [vmem:[#allocation4 + $0x78] sm:$0xf0]  ;;  %v4234_v52 = vld [vmem:[#allocation4 + $0x10] sm:$0xf]  ;;  %v5267_v53 = vld [vmem:[#allocation4 + $0x14] sm:$0xf0]  ;;  %v4155_v56 = vor.u32 %v5279_v48, %v4154_v47 }
  0x19   :  { %590 = vmatpush.bf16.msra.mxu2 %v4251_v34  ;;  %679 = vmatpush.bf16.msra.mxu3 %v4255_v38  ;;  %v5266_v54 = vld [vmem:[#allocation4 + $0x14] sm:$0xf]  ;;  %v4236_v55 = vld [vmem:[#allocation4 + $0x18] sm:$0xf0]  ;;  %v4146_v57 = vld [vmem:[#allocation4 + $0x60] sm:$0xf]  ;;  %v4159_v59 = vor.u32 %v5278_v49, %v4156_v51  ;;  %v4235_v60 = vor.u32 %v5267_v53, %v4234_v52 }
  0x1a   :  { %v5277_v58 = vld [vmem:[#allocation4 + $0x64] sm:$0xf0]  ;;  %v5276_v61 = vld [vmem:[#allocation4 + $0x64] sm:$0xf]  ;;  %v4148_v62 = vld [vmem:[#allocation4 + $0x68] sm:$0xf0]  ;;  %v4239_v0 = vor.u32 %v5266_v54, %v4236_v55 }
  0x1b   :  { %329 = vmatpush.bf16.msra.mxu0 %v4163_v44  ;;  %v4226_v63 = vld [vmem:[#allocation4] sm:$0xf]  ;;  %v5265_v1 = vld [vmem:[#allocation4 + $0x4] sm:$0xf0]  ;;  %v5264_v2 = vld [vmem:[#allocation4 + $0x4] sm:$0xf]  ;;  %v4147_v7 = vor.u32 %v5277_v58, %v4146_v57  ;;  %v4151_v11 = vor.u32 %v5276_v61, %v4148_v62 }
  0x1c   :  { %418 = vmatpush.bf16.msra.mxu1 %v4167_v45  ;;  %v4228_v3 = vld [vmem:[#allocation4 + $0x8] sm:$0xf0]  ;;  %v4362_v5 = vld [vmem:[#allocation4 + $0x110] sm:$0xf]  ;;  %v5299_v6 = vld [vmem:[#allocation4 + $0x114] sm:$0xf0]  ;;  %v4227_v12 = vor.u32 %v5265_v1, %v4226_v63 }
  0x1d   :  { %591 = vmatpush.bf16.msra.mxu2 %v4243_v46  ;;  %680 = vmatpush.bf16.msra.mxu3 %v4247_v50  ;;  %v4112_v4 = vld [vmem:[%s7931_s0 + $0x1] ss:$2 sm:$0xff]  ;;  %v4113_v8 = vld [vmem:[%s7931_s0 + $0x11] ss:$2 sm:$0xff]  ;;  %v71_v13 = vld [vmem:[%s7931_s0] ss:$2 sm:$0xff]  ;;  %v4231_v15 = vor.u32 %v5264_v2, %v4228_v3  ;;  %v4363_v16 = vor.u32 %v5299_v6, %v4362_v5 }
  0x1e   :  { %v5298_v9 = vld [vmem:[#allocation4 + $0x114] sm:$0xf]  ;;  %v4364_v10 = vld [vmem:[#allocation4 + $0x118] sm:$0xf0]  ;;  %v5609_v17 = vpack.c.bf16 %v4113_v8, %v4112_v4  ;;  %vm275_vm0 = vcmask 785408   ;;  %vm3362_vm1 = vcmask 1041409  }
  0x1f   :  { %330 = vmatpush.bf16.msra.mxu0 %v4155_v56  ;;  %v4097_v14 = vld [vmem:[%s7931_s0 + $0x10] ss:$2 sm:$0xff]  ;;  %v4367_v18 = vor.u32 %v5298_v9, %v4364_v10  ;;  %v4354_v20 = vld [vmem:[#allocation4 + $0x100] sm:$0xf]  ;;  %v5297_v21 = vld [vmem:[#allocation4 + $0x104] sm:$0xf0] }
  0x20   :  { %419 = vmatpush.bf16.msra.mxu1 %v4159_v59  ;;  %v134_v19 = vpack.c.bf16 %v4097_v14, %v71_v13  ;;  %v5296_v22 = vld [vmem:[#allocation4 + $0x104] sm:$0xf]  ;;  %v4355_v23 = vor.u32 %v5297_v21, %v4354_v20  ;;  %v4356_v24 = vld [vmem:[#allocation4 + $0x108] sm:$0xf0]  ;;  %v4116_v32 = vld [vmem:[%s7931_s0 + $0x51] ss:$2 sm:$0xff] }
  0x21   :  { %592 = vmatpush.bf16.msra.mxu2 %v4235_v60  ;;  %681 = vmatpush.bf16.msra.mxu3 %v4239_v0  ;;  %v4359_v25 = vor.u32 %v5296_v22, %v4356_v24  ;;  %v4114_v26 = vld [vmem:[%s7931_s0 + $0x29] ss:$2 sm:$0xff]  ;;  %v4115_v27 = vld [vmem:[%s7931_s0 + $0x39] ss:$2 sm:$0xff]  ;;  %v4098_v28 = vld [vmem:[%s7931_s0 + $0x28] ss:$2 sm:$0xff] }
  0x22   :  { %v4099_v29 = vld [vmem:[%s7931_s0 + $0x38] ss:$2 sm:$0xff]  ;;  %v5629_v30 = vpack.c.bf16 %v4115_v27, %v4114_v26  ;;  %v4117_v33 = vld [vmem:[%s7931_s0 + $0x61] ss:$2 sm:$0xff]  ;;  %v4103_v41 = vld [vmem:[%s7931_s0 + $0x88] ss:$2 sm:$0xff] }
  0x23   :  { %331 = vmatpush.bf16.msra.mxu0 %v4147_v7  ;;  %v135_v31 = vpack.c.bf16 %v4099_v29, %v4098_v28  ;;  %v4100_v34 = vld [vmem:[%s7931_s0 + $0x50] ss:$2 sm:$0xff]  ;;  %v4101_v35 = vld [vmem:[%s7931_s0 + $0x60] ss:$2 sm:$0xff]  ;;  %v5649_v36 = vpack.c.bf16 %v4117_v33, %v4116_v32  ;;  %v4118_v38 = vld [vmem:[%s7931_s0 + $0x79] ss:$2 sm:$0xff] }
  0x24   :  { %420 = vmatpush.bf16.msra.mxu1 %v4151_v11  ;;  %v136_v37 = vpack.c.bf16 %v4101_v35, %v4100_v34  ;;  %v4119_v39 = vld [vmem:[%s7931_s0 + $0x89] ss:$2 sm:$0xff]  ;;  %v4102_v40 = vld [vmem:[%s7931_s0 + $0x78] ss:$2 sm:$0xff]  ;;  %v4123_v57 = vld [vmem:[%s7931_s0 + $0xd9] ss:$2 sm:$0xff] }
  0x25   :  { %593 = vmatpush.bf16.msra.mxu2 %v4227_v12  ;;  %682 = vmatpush.bf16.msra.mxu3 %v4231_v15  ;;  %v5669_v42 = vpack.c.bf16 %v4119_v39, %v4118_v38  ;;  %v137_v43 = vpack.c.bf16 %v4103_v41, %v4102_v40  ;;  %v4346_v44 = vld [vmem:[#allocation4 + $0xf0] sm:$0xf]  ;;  %v5295_v45 = vld [vmem:[#allocation4 + $0xf4] sm:$0xf0]  ;;  %v5294_v46 = vld [vmem:[#allocation4 + $0xf4] sm:$0xf] }
  0x26   :  { %4192 = vmatmul.msk.bf16.vlgmr.msra.gmra.mxu0 %vm275_vm0, %v5609_v17  ;;  %v4347_v47 = vor.u32 %v5295_v45, %v4346_v44  ;;  %v4348_v48 = vld [vmem:[#allocation4 + $0xf8] sm:$0xf0]  ;;  %v4120_v50 = vld [vmem:[%s7931_s0 + $0xa1] ss:$2 sm:$0xff]  ;;  %v4104_v52 = vld [vmem:[%s7931_s0 + $0xa0] ss:$2 sm:$0xff] }
  0x27   :  { %903 = vmatpush.bf16.msrb.mxu0 %v4363_v16  ;;  %4208 = vmatmul.msk.bf16.vlgmr.msra.gmra.mxu1 %vm275_vm0, %v5609_v17  ;;  %v4351_v49 = vor.u32 %v5294_v46, %v4348_v48  ;;  %v4121_v51 = vld [vmem:[%s7931_s0 + $0xb1] ss:$2 sm:$0xff]  ;;  %v4105_v53 = vld [vmem:[%s7931_s0 + $0xb0] ss:$2 sm:$0xff]  ;;  %v4125_v63 = vld [vmem:[%s7931_s0 + $0x101] ss:$2 sm:$0xff] }
  0x28   :  { %992 = vmatpush.bf16.msrb.mxu1 %v4367_v18  ;;  %4272 = vmatmul.msk.bf16.vlgmr.msra.gmra.mxu2 %vm275_vm0, %v134_v19  ;;  %v5689_v54 = vpack.c.bf16 %v4121_v51, %v4120_v50  ;;  %v138_v55 = vpack.c.bf16 %v4105_v53, %v4104_v52  ;;  %v4122_v56 = vld [vmem:[%s7931_s0 + $0xc9] ss:$2 sm:$0xff]  ;;  %v4106_v58 = vld [vmem:[%s7931_s0 + $0xc8] ss:$2 sm:$0xff]  ;;  %v4107_v59 = vld [vmem:[%s7931_s0 + $0xd8] ss:$2 sm:$0xff] }
  0x29   :  { %4288 = vmatmul.msk.bf16.vlgmr.msra.gmra.mxu3 %vm275_vm0, %v134_v19  ;;  %v5709_v60 = vpack.c.bf16 %v4123_v57, %v4122_v56  ;;  %v139_v61 = vpack.c.bf16 %v4107_v59, %v4106_v58  ;;  %v4124_v62 = vld [vmem:[%s7931_s0 + $0xf1] ss:$2 sm:$0xff]  ;;  %v4108_v0 = vld [vmem:[%s7931_s0 + $0xf0] ss:$2 sm:$0xff]  ;;  %v4109_v1 = vld [vmem:[%s7931_s0 + $0x100] ss:$2 sm:$0xff] }
  0x2a   :  { %v5729_v2 = vpack.c.bf16 %v4125_v63, %v4124_v62  ;;  %v140_v3 = vpack.c.bf16 %v4109_v1, %v4108_v0  ;;  %v4338_v4 = vld [vmem:[#allocation4 + $0xe0] sm:$0xf]  ;;  %v5293_v5 = vld [vmem:[#allocation4 + $0xe4] sm:$0xf0]  ;;  %v5292_v6 = vld [vmem:[#allocation4 + $0xe4] sm:$0xf] }
  0x2b   :  { %904 = vmatpush.bf16.msrb.mxu0 %v4355_v23  ;;  %v4339_v7 = vor.u32 %v5293_v5, %v4338_v4  ;;  %v4340_v8 = vld [vmem:[#allocation4 + $0xe8] sm:$0xf0]  ;;  %v4126_v10 = vld [vmem:[%s7931_s0 + $0x119] ss:$2 sm:$0xff]  ;;  %v4110_v12 = vld [vmem:[%s7931_s0 + $0x118] ss:$2 sm:$0xff] }
  0x2c   :  { %993 = vmatpush.bf16.msrb.mxu1 %v4359_v25  ;;  %v4343_v9 = vor.u32 %v5292_v6, %v4340_v8  ;;  %v4127_v11 = vld [vmem:[%s7931_s0 + $0x129] ss:$2 sm:$0xff]  ;;  %v4111_v13 = vld [vmem:[%s7931_s0 + $0x128] ss:$2 sm:$0xff]  ;;  %v5291_v39 = vld [vmem:[#allocation4 + $0xd4] sm:$0xf0] }
  0x2d   :  { %v5749_v14 = vpack.c.bf16 %v4127_v11, %v4126_v10  ;;  %v141_v15 = vpack.c.bf16 %v4111_v13, %v4110_v12  ;;  %v4128_v16 = vld [vmem:[%s7931_s0 + $0x2] ss:$2 sm:$0xff]  ;;  %v4129_v18 = vld [vmem:[%s7931_s0 + $0x12] ss:$2 sm:$0xff]  ;;  %vm3365_vm2 = vcmask 1042434   ;;  %vm3368_vm3 = vcmask 1043459  }
  0x2e   :  { %v5763_v19 = vpack.c.bf16 %v4129_v18, %v4128_v16  ;;  %v4130_v28 = vld [vmem:[%s7931_s0 + $0x2a] ss:$2 sm:$0xff]  ;;  %v4131_v29 = vld [vmem:[%s7931_s0 + $0x3a] ss:$2 sm:$0xff]  ;;  %vm3371_vm4 = vcmask 1044484   ;;  %vm3374_vm5 = vcmask 1045509  }
  0x2f   :  { %905 = vmatpush.bf16.msrb.mxu0 %v4347_v47  ;;  %v5783_v32 = vpack.c.bf16 %v4131_v29, %v4130_v28  ;;  %v4330_v38 = vld [vmem:[#allocation4 + $0xd0] sm:$0xf]  ;;  %v5290_v40 = vld [vmem:[#allocation4 + $0xd4] sm:$0xf]  ;;  %v4134_v4 = vld [vmem:[%s7931_s0 + $0x7a] ss:$2 sm:$0xff] }
  0x30   :  { %994 = vmatpush.bf16.msrb.mxu1 %v4351_v49  ;;  %v4331_v41 = vor.u32 %v5291_v39, %v4330_v38  ;;  %v4132_v51 = vld [vmem:[%s7931_s0 + $0x52] ss:$2 sm:$0xff]  ;;  %v4133_v52 = vld [vmem:[%s7931_s0 + $0x62] ss:$2 sm:$0xff]  ;;  %vm3377_vm6 = vcmask 1046534   ;;  %vm3380_vm7 = vcmask 1047559  }
  0x31   :  { %v4135_v5 = vld [vmem:[%s7931_s0 + $0x8a] ss:$2 sm:$0xff] }
  0x32   :  { %v4136_v29 = vld [vmem:[%s7931_s0 + $0xa2] ss:$2 sm:$0xff] }
  0x33   :  { %906 = vmatpush.bf16.msrb.mxu0 %v4339_v7  ;;  %v5831_v7 = vpack.c.bf16 %v4135_v5, %v4134_v4  ;;  %v5308_v4 = vld [vmem:[#allocation4 + $0x164] sm:$0xf] }
  0x34   :  { %995 = vmatpush.bf16.msrb.mxu1 %v4343_v9 }
  0x36   :  { %4193 = vmatmul.msk.bf16.gmra.mxu0 %vm275_vm0, %v5629_v30 }
  0x37   :  { %4209 = vmatmul.msk.bf16.gmra.mxu1 %vm275_vm0, %v5629_v30  ;;  %907 = vmatpush.bf16.msrb.mxu0 %v4331_v41 }
  0x38   :  { %4273 = vmatmul.msk.bf16.gmra.mxu2 %vm275_vm0, %v135_v31 }
  0x39   :  { %4289 = vmatmul.msk.bf16.gmra.mxu3 %vm275_vm0, %v135_v31 }
  0x46   :  { %4194 = vmatmul.msk.bf16.gmra.mxu0 %vm275_vm0, %v5649_v36 }
  0x47   :  { %4210 = vmatmul.msk.bf16.gmra.mxu1 %vm275_vm0, %v5649_v36 }
  0x48   :  { %4274 = vmatmul.msk.bf16.gmra.mxu2 %vm275_vm0, %v136_v37 }
  0x49   :  { %4290 = vmatmul.msk.bf16.gmra.mxu3 %vm275_vm0, %v136_v37 }
  0x56   :  { %4195 = vmatmul.msk.bf16.gmra.mxu0 %vm275_vm0, %v5669_v42 }
  0x57   :  { %4211 = vmatmul.msk.bf16.gmra.mxu1 %vm275_vm0, %v5669_v42 }
  0x58   :  { %4275 = vmatmul.msk.bf16.gmra.mxu2 %vm275_vm0, %v137_v43 }
  0x59   :  { %4291 = vmatmul.msk.bf16.gmra.mxu3 %vm275_vm0, %v137_v43  ;;  %v4332_v43 = vld [vmem:[#allocation4 + $0xd8] sm:$0xf0] }
  0x5a   :  { %v4335_v44 = vor.u32 %v5290_v40, %v4332_v43 }
  0x5c   :  { %996 = vmatpush.bf16.msrb.mxu1 %v4335_v44 }
  0x66   :  { %4196 = vmatmul.msk.bf16.gmra.mxu0 %vm275_vm0, %v5689_v54 }
  0x67   :  { %4212 = vmatmul.msk.bf16.gmra.mxu1 %vm275_vm0, %v5689_v54 }
  0x68   :  { %4276 = vmatmul.msk.bf16.gmra.mxu2 %vm275_vm0, %v138_v55 }
  0x69   :  { %4292 = vmatmul.msk.bf16.gmra.mxu3 %vm275_vm0, %v138_v55 }
  0x76   :  { %4197 = vmatmul.msk.bf16.gmra.mxu0 %vm275_vm0, %v5709_v60 }
  0x77   :  { %4213 = vmatmul.msk.bf16.gmra.mxu1 %vm275_vm0, %v5709_v60 }
  0x78   :  { %4277 = vmatmul.msk.bf16.gmra.mxu2 %vm275_vm0, %v139_v61 }
  0x79   :  { %4293 = vmatmul.msk.bf16.gmra.mxu3 %vm275_vm0, %v139_v61 }
  0x86   :  { %4198 = vmatmul.msk.bf16.gmra.mxu0 %vm275_vm0, %v5729_v2 }
  0x87   :  { %4214 = vmatmul.msk.bf16.gmra.mxu1 %vm275_vm0, %v5729_v2 }
  0x88   :  { %4278 = vmatmul.msk.bf16.gmra.mxu2 %vm275_vm0, %v140_v3 }
  0x89   :  { %4294 = vmatmul.msk.bf16.gmra.mxu3 %vm275_vm0, %v140_v3 }
  0x96   :  { %4199 = vmatmul.msk.bf16.gmra.mxu0 %vm275_vm0, %v5749_v14 }
  0x97   :  { %4215 = vmatmul.msk.bf16.gmra.mxu1 %vm275_vm0, %v5749_v14 }
  0x98   :  { %4279 = vmatmul.msk.bf16.gmra.mxu2 %vm275_vm0, %v141_v15 }
  0x99   :  { %4295 = vmatmul.msk.bf16.gmra.mxu3 %vm275_vm0, %v141_v15 }
  0xa3   :  { %v333_v20 = vpop.f32.mrf.mxu0 }
  0xa4   :  { %v422_v21 = vpop.f32.mrf.mxu1 }
  0xa6   :  { %4200 = vmatmul.msk.bf16.gmra.mxu0 %vm275_vm0, %v5763_v19 }
  0xa7   :  { %4216 = vmatmul.msk.bf16.gmra.mxu1 %vm275_vm0, %v5763_v19 }
  0xa8   :  { %4280 = vmatmul.msk.bf16.gmra.mxu2 %vm275_vm0, %v5609_v17 }
  0xa9   :  { %4296 = vmatmul.msk.bf16.gmra.mxu3 %vm275_vm0, %v5609_v17 }
  0xab   :  { %v595_v22 = vpop.f32.mrf.mxu2  ;;  %v335_v25 = vpop.f32.mrf.mxu0 }
  0xac   :  { %v5773_v23 = vadd.f32 %v595_v22, %v333_v20  ;;  %v684_v24 = vpop.f32.mrf.mxu3  ;;  %v424_v27 = vpop.f32.mrf.mxu1  ;;  %v5289_v22 = vld [vmem:[#allocation4 + $0xc4] sm:$0xf0] }
  0xad   :  { %v5775_v26 = vadd.f32 %v684_v24, %v422_v21  ;;  %v4322_v21 = vld [vmem:[#allocation4 + $0xc0] sm:$0xf]  ;;  %v5288_v24 = vld [vmem:[#allocation4 + $0xc4] sm:$0xf] }
  0xb3   :  { %v597_v31 = vpop.f32.mrf.mxu2  ;;  %v338_v34 = vpop.f32.mrf.mxu0 }
  0xb4   :  { %v5785_v17 = vadd.f32 %v597_v31, %v335_v25  ;;  %v686_v33 = vpop.f32.mrf.mxu3  ;;  %v427_v37 = vpop.f32.mrf.mxu1  ;;  %v4323_v25 = vor.u32 %v5289_v22, %v4322_v21  ;;  %v5307_v21 = vld [vmem:[#allocation4 + $0x154] sm:$0xf0]  ;;  %v5306_v22 = vld [vmem:[#allocation4 + $0x154] sm:$0xf] }
  0xb5   :  { %v5787_v35 = vadd.f32 %v686_v33, %v424_v27  ;;  %v4324_v27 = vld [vmem:[#allocation4 + $0xc8] sm:$0xf0] }
  0xb6   :  { %4201 = vmatmul.msk.bf16.gmra.mxu0 %vm275_vm0, %v5783_v32  ;;  %v4327_v28 = vor.u32 %v5288_v24, %v4324_v27 }
  0xb7   :  { %4217 = vmatmul.msk.bf16.gmra.mxu1 %vm275_vm0, %v5783_v32  ;;  %908 = vmatpush.bf16.msrb.mxu0 %v4323_v25  ;;  %v4444_v25 = vld [vmem:[#allocation4 + $0x158] sm:$0xf0] }
  0xb8   :  { %4281 = vmatmul.msk.bf16.gmra.mxu2 %vm275_vm0, %v5629_v30  ;;  %997 = vmatpush.bf16.msrb.mxu1 %v4327_v28  ;;  %v4447_v27 = vor.u32 %v5306_v22, %v4444_v25  ;;  %v5323_v25 = vld [vmem:[#allocation4 + $0x1d4] sm:$0xf0] }
  0xb9   :  { %4297 = vmatmul.msk.bf16.gmra.mxu3 %vm275_vm0, %v5629_v30  ;;  %v5807_v30 = vpack.c.bf16 %v4133_v52, %v4132_v51  ;;  %v5311_v51 = vld [vmem:[#allocation4 + $0x174] sm:$0xf0]  ;;  %v5310_v52 = vld [vmem:[#allocation4 + $0x174] sm:$0xf] }
  0xbb   :  { %v600_v45 = vpop.f32.mrf.mxu2  ;;  %v340_v48 = vpop.f32.mrf.mxu0 }
  0xbc   :  { %v5797_v46 = vadd.f32 %v600_v45, %v338_v34  ;;  %v689_v47 = vpop.f32.mrf.mxu3  ;;  %v429_v50 = vpop.f32.mrf.mxu1 }
  0xbd   :  { %v5799_v49 = vadd.f32 %v689_v47, %v427_v37 }
  0xc3   :  { %v602_v53 = vpop.f32.mrf.mxu2  ;;  %v343_v57 = vpop.f32.mrf.mxu0 }
  0xc4   :  { %v5809_v55 = vadd.f32 %v602_v53, %v340_v48  ;;  %v691_v56 = vpop.f32.mrf.mxu3  ;;  %v432_v59 = vpop.f32.mrf.mxu1 }
  0xc5   :  { %v5811_v58 = vadd.f32 %v691_v56, %v429_v50  ;;  %v4458_v50 = vld [vmem:[#allocation4 + $0x170] sm:$0xf]  ;;  %v4460_v56 = vld [vmem:[#allocation4 + $0x178] sm:$0xf0] }
  0xc6   :  { %4202 = vmatmul.msk.bf16.gmra.mxu0 %vm275_vm0, %v5807_v30  ;;  %v4459_v53 = vor.u32 %v5311_v51, %v4458_v50  ;;  %v4426_v51 = vld [vmem:[#allocation4 + $0x130] sm:$0xf] }
  0xc7   :  { %4218 = vmatmul.msk.bf16.gmra.mxu1 %vm275_vm0, %v5807_v30 }
  0xc8   :  { %4282 = vmatmul.msk.bf16.gmra.mxu2 %vm275_vm0, %v5649_v36 }
  0xc9   :  { %4298 = vmatmul.msk.bf16.gmra.mxu3 %vm275_vm0, %v5649_v36  ;;  %1282 = vmatpush.bf16.msrb.mxu2 %v4459_v53 }
  0xcb   :  { %v605_v61 = vpop.f32.mrf.mxu2  ;;  %v345_v0 = vpop.f32.mrf.mxu0 }
  0xcc   :  { %v5821_v62 = vadd.f32 %v605_v61, %v343_v57  ;;  %v694_v63 = vpop.f32.mrf.mxu3  ;;  %v434_v3 = vpop.f32.mrf.mxu1  ;;  %v4463_v57 = vor.u32 %v5310_v52, %v4460_v56  ;;  %v5303_v52 = vld [vmem:[#allocation4 + $0x134] sm:$0xf0]  ;;  %v4428_v56 = vld [vmem:[#allocation4 + $0x138] sm:$0xf0] }
  0xcd   :  { %v5823_v1 = vadd.f32 %v694_v63, %v432_v59  ;;  %v4138_v59 = vld [vmem:[%s7931_s0 + $0xca] ss:$2 sm:$0xff]  ;;  %v4427_v53 = vor.u32 %v5303_v52, %v4426_v51 }
  0xce   :  { %1371 = vmatpush.bf16.msrb.mxu3 %v4463_v57 }
  0xd3   :  { %v607_v6 = vpop.f32.mrf.mxu2  ;;  %v348_v9 = vpop.f32.mrf.mxu0 }
  0xd4   :  { %v5833_v36 = vadd.f32 %v607_v6, %v345_v0  ;;  %v696_v8 = vpop.f32.mrf.mxu3  ;;  %v437_v11 = vpop.f32.mrf.mxu1  ;;  %v4450_v0 = vld [vmem:[#allocation4 + $0x160] sm:$0xf] }
  0xd5   :  { %v5835_v10 = vadd.f32 %v696_v8, %v434_v3  ;;  %v5309_v3 = vld [vmem:[#allocation4 + $0x164] sm:$0xf0] }
  0xd6   :  { %4203 = vmatmul.msk.bf16.gmra.mxu0 %vm275_vm0, %v5831_v7 }
  0xd7   :  { %4219 = vmatmul.msk.bf16.gmra.mxu1 %vm275_vm0, %v5831_v7 }
  0xd8   :  { %4283 = vmatmul.msk.bf16.gmra.mxu2 %vm275_vm0, %v5669_v42 }
  0xd9   :  { %4299 = vmatmul.msk.bf16.gmra.mxu3 %vm275_vm0, %v5669_v42  ;;  %v4137_v42 = vld [vmem:[%s7931_s0 + $0xb2] ss:$2 sm:$0xff] }
  0xda   :  { %v5855_v33 = vpack.c.bf16 %v4137_v42, %v4136_v29  ;;  %v4434_v29 = vld [vmem:[#allocation4 + $0x140] sm:$0xf]  ;;  %v5305_v42 = vld [vmem:[#allocation4 + $0x144] sm:$0xf0] }
  0xdb   :  { %v610_v12 = vpop.f32.mrf.mxu2  ;;  %v350_v16 = vpop.f32.mrf.mxu0 }
  0xdc   :  { %v5845_v13 = vadd.f32 %v610_v12, %v348_v9  ;;  %v699_v15 = vpop.f32.mrf.mxu3  ;;  %v439_v20 = vpop.f32.mrf.mxu1  ;;  %v4451_v9 = vor.u32 %v5309_v3, %v4450_v0  ;;  %v4418_v3 = vld [vmem:[#allocation4 + $0x120] sm:$0xf] }
  0xdd   :  { %v5847_v18 = vadd.f32 %v699_v15, %v437_v11  ;;  %v4452_v11 = vld [vmem:[#allocation4 + $0x168] sm:$0xf0] }
  0xde   :  { %1283 = vmatpush.bf16.msrb.mxu2 %v4451_v9 }
  0xe3   :  { %v612_v31 = vpop.f32.mrf.mxu2  ;;  %v353_v38 = vpop.f32.mrf.mxu0 }
  0xe4   :  { %v5857_v34 = vadd.f32 %v612_v31, %v350_v16  ;;  %v701_v37 = vpop.f32.mrf.mxu3  ;;  %v442_v40 = vpop.f32.mrf.mxu1  ;;  %v4455_v16 = vor.u32 %v5308_v4, %v4452_v11  ;;  %v5304_v31 = vld [vmem:[#allocation4 + $0x144] sm:$0xf]  ;;  %v5301_v4 = vld [vmem:[#allocation4 + $0x124] sm:$0xf0] }
  0xe5   :  { %v5859_v39 = vadd.f32 %v701_v37, %v439_v20  ;;  %v4442_v20 = vld [vmem:[#allocation4 + $0x150] sm:$0xf] }
  0xe6   :  { %4204 = vmatmul.msk.bf16.gmra.mxu0 %vm275_vm0, %v5855_v33  ;;  %1372 = vmatpush.bf16.msrb.mxu3 %v4455_v16  ;;  %v4443_v24 = vor.u32 %v5307_v21, %v4442_v20  ;;  %v4420_v16 = vld [vmem:[#allocation4 + $0x128] sm:$0xf0] }
  0xe7   :  { %4220 = vmatmul.msk.bf16.gmra.mxu1 %vm275_vm0, %v5855_v33 }
  0xe8   :  { %4284 = vmatmul.msk.bf16.gmra.mxu2 %vm275_vm0, %v5689_v54 }
  0xe9   :  { %4300 = vmatmul.msk.bf16.gmra.mxu3 %vm275_vm0, %v5689_v54  ;;  %v4139_v54 = vld [vmem:[%s7931_s0 + $0xda] ss:$2 sm:$0xff]  ;;  %1284 = vmatpush.bf16.msrb.mxu2 %v4443_v24  ;;  %v4554_v24 = vld [vmem:[#allocation4 + $0x1d0] sm:$0xf] }
  0xea   :  { %v5879_v63 = vpack.c.bf16 %v4139_v54, %v4138_v59  ;;  %1373 = vmatpush.bf16.msrb.mxu3 %v4447_v27  ;;  %v4140_v59 = vld [vmem:[%s7931_s0 + $0xf2] ss:$2 sm:$0xff]  ;;  %v4141_v54 = vld [vmem:[%s7931_s0 + $0x102] ss:$2 sm:$0xff] }
  0xeb   :  { %v615_v41 = vpop.f32.mrf.mxu2  ;;  %v355_v45 = vpop.f32.mrf.mxu0  ;;  %v5903_v0 = vpack.c.bf16 %v4141_v54, %v4140_v59  ;;  %v5322_v27 = vld [vmem:[#allocation4 + $0x1d4] sm:$0xf] }
  0xec   :  { %v5869_v43 = vadd.f32 %v615_v41, %v353_v38  ;;  %v704_v44 = vpop.f32.mrf.mxu3  ;;  %v444_v48 = vpop.f32.mrf.mxu1  ;;  %v4435_v41 = vor.u32 %v5305_v42, %v4434_v29  ;;  %v4556_v29 = vld [vmem:[#allocation4 + $0x1d8] sm:$0xf0] }
  0xed   :  { %v5871_v47 = vadd.f32 %v704_v44, %v442_v40  ;;  %v4436_v44 = vld [vmem:[#allocation4 + $0x148] sm:$0xf0] }
  0xee   :  { %v4439_v50 = vor.u32 %v5304_v31, %v4436_v44  ;;  %1285 = vmatpush.bf16.msrb.mxu2 %v4435_v41  ;;  %v4559_v31 = vor.u32 %v5322_v27, %v4556_v29 }
  0xf0   :  { %1374 = vmatpush.bf16.msrb.mxu3 %v4439_v50  ;;  %1750 = vmatpush.bf16.msra.mxu1 %v4559_v31  ;;  %v4143_v50 = vld [vmem:[%s7931_s0 + $0x12a] ss:$2 sm:$0xff] }
  0xf2   :  { %1286 = vmatpush.bf16.msrb.mxu2 %v4427_v53 }
  0xf3   :  { %v617_v61 = vpop.f32.mrf.mxu2  ;;  %v358_v8 = vpop.f32.mrf.mxu0 }
  0xf4   :  { %v5881_v5 = vadd.f32 %v617_v61, %v355_v45  ;;  %v706_v6 = vpop.f32.mrf.mxu3  ;;  %v447_v15 = vpop.f32.mrf.mxu1 }
  0xf5   :  { %v5883_v12 = vadd.f32 %v706_v6, %v444_v48  ;;  %v5300_v6 = vld [vmem:[#allocation4 + $0x124] sm:$0xf] }
  0xf6   :  { %4205 = vmatmul.msk.bf16.gmra.mxu0 %vm275_vm0, %v5879_v63  ;;  %v4423_v22 = vor.u32 %v5300_v6, %v4420_v16 }
  0xf7   :  { %4221 = vmatmul.msk.bf16.gmra.mxu1 %vm275_vm0, %v5879_v63 }
  0xf8   :  { %4285 = vmatmul.msk.bf16.gmra.mxu2 %vm275_vm0, %v5709_v60 }
  0xf9   :  { %4301 = vmatmul.msk.bf16.gmra.mxu3 %vm275_vm0, %v5709_v60  ;;  %v5302_v60 = vld [vmem:[#allocation4 + $0x134] sm:$0xf] }
  0xfa   :  { %v4431_v57 = vor.u32 %v5302_v60, %v4428_v56 }
  0xfb   :  { %v620_v28 = vpop.f32.mrf.mxu2  ;;  %v360_v40 = vpop.f32.mrf.mxu0 }
  0xfc   :  { %v5893_v37 = vadd.f32 %v620_v28, %v358_v8  ;;  %v709_v38 = vpop.f32.mrf.mxu3  ;;  %v449_v48 = vpop.f32.mrf.mxu1  ;;  %1375 = vmatpush.bf16.msrb.mxu3 %v4431_v57  ;;  %v4555_v28 = vor.u32 %v5323_v25, %v4554_v24 }
  0xfd   :  { %v5895_v45 = vadd.f32 %v709_v38, %v447_v15  ;;  %v4419_v15 = vor.u32 %v5301_v4, %v4418_v3 }
  0xfe   :  { %1661 = vmatpush.bf16.msra.mxu0 %v4555_v28 }
  0xff   :  { %1287 = vmatpush.bf16.msrb.mxu2 %v4419_v15  ;;  %v4305_v15 = vld [vmem:[%s7931_s0 + $0x13] ss:$2 sm:$0xff] }
 0x100   :  { %1376 = vmatpush.bf16.msrb.mxu3 %v4423_v22 }
 0x103   :  { %v622_v61 = vpop.f32.mrf.mxu2  ;;  %v363_v11 = vpop.f32.mrf.mxu0 }
 0x104   :  { %v5905_v8 = vadd.f32 %v622_v61, %v360_v40  ;;  %v711_v9 = vpop.f32.mrf.mxu3  ;;  %v452_v21 = vpop.f32.mrf.mxu1 }
 0x105   :  { %v5907_v20 = vadd.f32 %v711_v9, %v449_v48 }
 0x106   :  { %4206 = vmatmul.msk.bf16.gmra.mxu0 %vm275_vm0, %v5903_v0 }
 0x107   :  { %4222 = vmatmul.msk.bf16.gmra.mxu1 %vm275_vm0, %v5903_v0 }
 0x108   :  { %4286 = vmatmul.msk.bf16.gmra.mxu2 %vm275_vm0, %v5729_v2 }
 0x109   :  { %4302 = vmatmul.msk.bf16.gmra.mxu3 %vm275_vm0, %v5729_v2  ;;  %v4142_v2 = vld [vmem:[%s7931_s0 + $0x11a] ss:$2 sm:$0xff] }
 0x10a   :  { %v5927_v52 = vpack.c.bf16 %v4143_v50, %v4142_v2 }
 0x10b   :  { %v625_v42 = vpop.f32.mrf.mxu2  ;;  %v365_v41 = vpop.f32.mrf.mxu0 }
 0x10c   :  { %v5917_v38 = vadd.f32 %v625_v42, %v363_v11  ;;  %v714_v40 = vpop.f32.mrf.mxu3  ;;  %v454_v48 = vpop.f32.mrf.mxu1  ;;  %v4304_v11 = vld [vmem:[%s7931_s0 + $0x3] ss:$2 sm:$0xff] }
 0x10d   :  { %v5919_v44 = vadd.f32 %v714_v40, %v452_v21  ;;  %v5953_v24 = vpack.c.bf16 %v4305_v15, %v4304_v11  ;;  %v4548_v15 = vld [vmem:[#allocation4 + $0x1c8] sm:$0xf0] }
 0x113   :  { %v627_v51 = vpop.f32.mrf.mxu2  ;;  %v368_v56 = vpop.f32.mrf.mxu0 }
 0x114   :  { %v5929_v60 = vadd.f32 %v627_v51, %v365_v41  ;;  %v716_v53 = vpop.f32.mrf.mxu3  ;;  %v457_v59 = vpop.f32.mrf.mxu1 }
 0x115   :  { %v5931_v57 = vadd.f32 %v716_v53, %v454_v48  ;;  %v4306_v48 = vld [vmem:[%s7931_s0 + $0x2b] ss:$2 sm:$0xff] }
 0x116   :  { %4207 = vmatmul.msk.bf16.gmra.mxu0 %vm275_vm0, %v5927_v52 }
 0x117   :  { %4223 = vmatmul.msk.bf16.gmra.mxu1 %vm275_vm0, %v5927_v52 }
 0x118   :  { %4287 = vmatmul.msk.bf16.gmra.mxu2 %vm275_vm0, %v5749_v14 }
 0x119   :  { %4303 = vmatmul.msk.bf16.gmra.mxu3 %vm275_vm0, %v5749_v14 }
 0x11b   :  { %v630_v54 = vpop.f32.mrf.mxu2  ;;  %v370_v4 = vpop.f32.mrf.mxu0 }
 0x11c   :  { %v5941_v61 = vadd.f32 %v630_v54, %v368_v56  ;;  %v719_v3 = vpop.f32.mrf.mxu3  ;;  %v459_v9 = vpop.f32.mrf.mxu1 }
 0x11d   :  { %v5943_v6 = vadd.f32 %v719_v3, %v457_v59  ;;  %v4546_v3 = vld [vmem:[#allocation4 + $0x1c0] sm:$0xf] }
 0x123   :  { %v632_v16 = vpop.f32.mrf.mxu2  ;;  %v373_v22 = vpop.f32.mrf.mxu0 }
 0x124   :  { %v5951_v21 = vadd.f32 %v632_v16, %v370_v4  ;;  %v721_v14 = vpop.f32.mrf.mxu3  ;;  %v462_v27 = vpop.f32.mrf.mxu1  ;;  %v5321_v4 = vld [vmem:[#allocation4 + $0x1c4] sm:$0xf0] }
 0x125   :  { %v5955_v25 = vadd.f32 %v721_v14, %v459_v9  ;;  %v5320_v9 = vld [vmem:[#allocation4 + $0x1c4] sm:$0xf]  ;;  %v4547_v11 = vor.u32 %v5321_v4, %v4546_v3 }
 0x126   :  { %4368 = vmatmul.msk.bf16.vlgmr.msrb.gmra.mxu0 %vm275_vm0, %v5763_v19  ;;  %v4551_v16 = vor.u32 %v5320_v9, %v4548_v15 }
 0x127   :  { %4384 = vmatmul.msk.bf16.vlgmr.msrb.gmra.mxu1 %vm275_vm0, %v5763_v19  ;;  %v4307_v19 = vld [vmem:[%s7931_s0 + $0x3b] ss:$2 sm:$0xff]  ;;  %1662 = vmatpush.bf16.msra.mxu0 %v4547_v11 }
 0x128   :  { %4464 = vmatmul.msk.bf16.vlgmr.msrb.gmra.mxu2 %vm275_vm0, %v5953_v24  ;;  %v5977_v56 = vpack.c.bf16 %v4307_v19, %v4306_v48  ;;  %1751 = vmatpush.bf16.msra.mxu1 %v4551_v16 }
 0x129   :  { %4480 = vmatmul.msk.bf16.vlgmr.msrb.gmra.mxu3 %vm275_vm0, %v5953_v24 }
 0x12b   :  { %v635_v28 = vpop.f32.mrf.mxu2  ;;  %v375_v31 = vpop.f32.mrf.mxu0 }
 0x12c   :  { %v5965_v29 = vadd.f32 %v635_v28, %v373_v22  ;;  %v724_v42 = vpop.f32.mrf.mxu3  ;;  %v464_v41 = vpop.f32.mrf.mxu1 }
 0x12d   :  { %v5967_v40 = vadd.f32 %v724_v42, %v462_v27 }
 0x133   :  { %v637_v2 = vpop.f32.mrf.mxu2  ;;  %v378_v53 = vpop.f32.mrf.mxu0 }
 0x134   :  { %v5975_v50 = vadd.f32 %v637_v2, %v375_v31  ;;  %v726_v51 = vpop.f32.mrf.mxu3  ;;  %v467_v54 = vpop.f32.mrf.mxu1 }
 0x135   :  { %v5979_v59 = vadd.f32 %v726_v51, %v464_v41  ;;  %v4309_v41 = vld [vmem:[%s7931_s0 + $0x63] ss:$2 sm:$0xff] }
 0x136   :  { %4369 = vmatmul.msk.bf16.gmra.mxu0 %vm275_vm0, %v5783_v32 }
 0x137   :  { %4385 = vmatmul.msk.bf16.gmra.mxu1 %vm275_vm0, %v5783_v32  ;;  %v4308_v32 = vld [vmem:[%s7931_s0 + $0x53] ss:$2 sm:$0xff] }
 0x138   :  { %4465 = vmatmul.msk.bf16.gmra.mxu2 %vm275_vm0, %v5977_v56 }
 0x139   :  { %4481 = vmatmul.msk.bf16.gmra.mxu3 %vm275_vm0, %v5977_v56 }
 0x13b   :  { %v640_v14 = vpop.f32.mrf.mxu2  ;;  %v380_v28 = vpop.f32.mrf.mxu0 }
 0x13c   :  { %v5989_v22 = vadd.f32 %v640_v14, %v378_v53  ;;  %v729_v27 = vpop.f32.mrf.mxu3  ;;  %v469_v31 = vpop.f32.mrf.mxu1  ;;  %v6001_v53 = vpack.c.bf16 %v4309_v41, %v4308_v32 }
 0x13d   :  { %v5991_v42 = vadd.f32 %v729_v27, %v467_v54  ;;  %v4310_v27 = vld [vmem:[%s7931_s0 + $0x7b] ss:$2 sm:$0xff] }
 0x143   :  { %v642_v48 = vpop.f32.mrf.mxu2  ;;  %v383_v51 = vpop.f32.mrf.mxu0 }
 0x144   :  { %v5999_v19 = vadd.f32 %v642_v48, %v380_v28  ;;  %v731_v2 = vpop.f32.mrf.mxu3  ;;  %v472_v54 = vpop.f32.mrf.mxu1 }
 0x145   :  { %v6003_v3 = vadd.f32 %v731_v2, %v469_v31 }
 0x146   :  { %4370 = vmatmul.msk.bf16.gmra.mxu0 %vm275_vm0, %v5807_v30 }
 0x147   :  { %4386 = vmatmul.msk.bf16.gmra.mxu1 %vm275_vm0, %v5807_v30  ;;  %v4311_v30 = vld [vmem:[%s7931_s0 + $0x8b] ss:$2 sm:$0xff] }
 0x148   :  { %4466 = vmatmul.msk.bf16.gmra.mxu2 %vm275_vm0, %v6001_v53  ;;  %v6025_v48 = vpack.c.bf16 %v4311_v30, %v4310_v27  ;;  %v4538_v30 = vld [vmem:[#allocation4 + $0x1b0] sm:$0xf] }
 0x149   :  { %4482 = vmatmul.msk.bf16.gmra.mxu3 %vm275_vm0, %v6001_v53 }
 0x14b   :  { %v645_v4 = vpop.f32.mrf.mxu2  ;;  %v385_v15 = vpop.f32.mrf.mxu0 }
 0x14c   :  { %v6013_v9 = vadd.f32 %v645_v4, %v383_v51  ;;  %v734_v11 = vpop.f32.mrf.mxu3  ;;  %v474_v14 = vpop.f32.mrf.mxu1 }
 0x14d   :  { %v6015_v16 = vadd.f32 %v734_v11, %v472_v54 }
 0x14e   :  { %7943 = vst [vmem:[#allocation10_spill] sm:$0xff] %v6013_v9 }
 0x14f   :  { %7944 = vst [vmem:[#allocation11_spill] sm:$0xff] %v6015_v16  ;;  %v4312_v16 = vld [vmem:[%s7931_s0 + $0xa3] ss:$2 sm:$0xff] }
 0x153   :  { %v647_v28 = vpop.f32.mrf.mxu2  ;;  %v388_v41 = vpop.f32.mrf.mxu0 }
 0x154   :  { %v6023_v31 = vadd.f32 %v647_v28, %v385_v15  ;;  %v736_v32 = vpop.f32.mrf.mxu3  ;;  %v477_v51 = vpop.f32.mrf.mxu1  ;;  %v5319_v28 = vld [vmem:[#allocation4 + $0x1b4] sm:$0xf0] }
 0x155   :  { %v6027_v2 = vadd.f32 %v736_v32, %v474_v14  ;;  %v5318_v32 = vld [vmem:[#allocation4 + $0x1b4] sm:$0xf] }
 0x156   :  { %7945 = vst [vmem:[#allocation12_spill] sm:$0xff] %v6023_v31  ;;  %4371 = vmatmul.msk.bf16.gmra.mxu0 %vm275_vm0, %v5831_v7  ;;  %v4540_v31 = vld [vmem:[#allocation4 + $0x1b8] sm:$0xf0] }
 0x157   :  { %7946 = vst [vmem:[#allocation13_spill] sm:$0xff] %v6027_v2  ;;  %4387 = vmatmul.msk.bf16.gmra.mxu1 %vm275_vm0, %v5831_v7  ;;  %v4539_v2 = vor.u32 %v5319_v28, %v4538_v30  ;;  %v4543_v7 = vor.u32 %v5318_v32, %v4540_v31 }
 0x158   :  { %4467 = vmatmul.msk.bf16.gmra.mxu2 %vm275_vm0, %v6025_v48 }
 0x159   :  { %4483 = vmatmul.msk.bf16.gmra.mxu3 %vm275_vm0, %v6025_v48  ;;  %1663 = vmatpush.bf16.msra.mxu0 %v4539_v2 }
 0x15a   :  { %1752 = vmatpush.bf16.msra.mxu1 %v4543_v7  ;;  %v4314_v7 = vld [vmem:[%s7931_s0 + $0xcb] ss:$2 sm:$0xff] }
 0x15b   :  { %v650_v54 = vpop.f32.mrf.mxu2  ;;  %v390_v15 = vpop.f32.mrf.mxu0 }
 0x15c   :  { %v6037_v4 = vadd.f32 %v650_v54, %v388_v41  ;;  %v739_v11 = vpop.f32.mrf.mxu3  ;;  %v479_v27 = vpop.f32.mrf.mxu1  ;;  %v4313_v41 = vld [vmem:[%s7931_s0 + $0xb3] ss:$2 sm:$0xff] }
 0x15d   :  { %v6039_v14 = vadd.f32 %v739_v11, %v477_v51 }
 0x15e   :  { %7947 = vst [vmem:[#allocation14_spill] sm:$0xff] %v6037_v4  ;;  %v6049_v4 = vpack.c.bf16 %v4313_v41, %v4312_v16 }
 0x15f   :  { %7948 = vst [vmem:[#allocation15_spill] sm:$0xff] %v6039_v14 }
 0x163   :  { %v652_v54 = vpop.f32.mrf.mxu2  ;;  %v393_v14 = vpop.f32.mrf.mxu0 }
 0x164   :  { %v6047_v51 = vadd.f32 %v652_v54, %v390_v15  ;;  %v741_v11 = vpop.f32.mrf.mxu3  ;;  %v482_v31 = vpop.f32.mrf.mxu1 }
 0x165   :  { %v6051_v30 = vadd.f32 %v741_v11, %v479_v27 }
 0x166   :  { %7949 = vst [vmem:[#allocation16_spill] sm:$0xff] %v6047_v51  ;;  %4372 = vmatmul.msk.bf16.gmra.mxu0 %vm275_vm0, %v5855_v33  ;;  %v4318_v51 = vld [vmem:[%s7931_s0 + $0x11b] ss:$2 sm:$0xff] }
 0x167   :  { %7950 = vst [vmem:[#allocation17_spill] sm:$0xff] %v6051_v30  ;;  %4388 = vmatmul.msk.bf16.gmra.mxu1 %vm275_vm0, %v5855_v33  ;;  %v4315_v33 = vld [vmem:[%s7931_s0 + $0xdb] ss:$2 sm:$0xff] }
 0x168   :  { %4468 = vmatmul.msk.bf16.gmra.mxu2 %vm275_vm0, %v6049_v4 }
 0x169   :  { %4484 = vmatmul.msk.bf16.gmra.mxu3 %vm275_vm0, %v6049_v4 }
 0x16b   :  { %v655_v2 = vpop.f32.mrf.mxu2  ;;  %v395_v28 = vpop.f32.mrf.mxu0 }
 0x16c   :  { %v6061_v15 = vadd.f32 %v655_v2, %v393_v14  ;;  %v744_v16 = vpop.f32.mrf.mxu3  ;;  %v484_v32 = vpop.f32.mrf.mxu1  ;;  %v6073_v14 = vpack.c.bf16 %v4315_v33, %v4314_v7 }
 0x16d   :  { %v6063_v27 = vadd.f32 %v744_v16, %v482_v31 }
 0x16e   :  { %7951 = vst [vmem:[#allocation18_spill] sm:$0xff] %v6061_v15 }
 0x16f   :  { %7952 = vst [vmem:[#allocation19_spill] sm:$0xff] %v6063_v27 }
 0x173   :  { %v657_v41 = vpop.f32.mrf.mxu2  ;;  %v398_v30 = vpop.f32.mrf.mxu0 }
 0x174   :  { %v6071_v54 = vadd.f32 %v657_v41, %v395_v28  ;;  %v746_v11 = vpop.f32.mrf.mxu3  ;;  %v487_v31 = vpop.f32.mrf.mxu1 }
 0x175   :  { %v6075_v2 = vadd.f32 %v746_v11, %v484_v32  ;;  %v4316_v11 = vld [vmem:[%s7931_s0 + $0xf3] ss:$2 sm:$0xff] }
 0x176   :  { %7953 = vst [vmem:[#allocation20_spill] sm:$0xff] %v6071_v54  ;;  %4373 = vmatmul.msk.bf16.gmra.mxu0 %vm275_vm0, %v5879_v63 }
 0x177   :  { %7954 = vst [vmem:[#allocation21_spill] sm:$0xff] %v6075_v2  ;;  %4389 = vmatmul.msk.bf16.gmra.mxu1 %vm275_vm0, %v5879_v63  ;;  %v4317_v63 = vld [vmem:[%s7931_s0 + $0x103] ss:$2 sm:$0xff] }
 0x178   :  { %4469 = vmatmul.msk.bf16.gmra.mxu2 %vm275_vm0, %v6073_v14 }
 0x179   :  { %4485 = vmatmul.msk.bf16.gmra.mxu3 %vm275_vm0, %v6073_v14 }
 0x17b   :  { %v660_v16 = vpop.f32.mrf.mxu2  ;;  %v400_v33 = vpop.f32.mrf.mxu0 }
 0x17c   :  { %v6085_v28 = vadd.f32 %v660_v16, %v398_v30  ;;  %v749_v7 = vpop.f32.mrf.mxu3  ;;  %v489_v41 = vpop.f32.mrf.mxu1  ;;  %v6097_v30 = vpack.c.bf16 %v4317_v63, %v4316_v11  ;;  %v4532_v63 = vld [vmem:[#allocation4 + $0x1a8] sm:$0xf0] }
 0x17d   :  { %v6087_v32 = vadd.f32 %v749_v7, %v487_v31  ;;  %v5317_v7 = vld [vmem:[#allocation4 + $0x1a4] sm:$0xf0] }
 0x17e   :  { %7955 = vst [vmem:[#allocation22_spill] sm:$0xff] %v6085_v28 }
 0x17f   :  { %7956 = vst [vmem:[#allocation23_spill] sm:$0xff] %v6087_v32 }
 0x183   :  { %v662_v2 = vpop.f32.mrf.mxu2  ;;  %v403_v15 = vpop.f32.mrf.mxu0 }
 0x184   :  { %v6095_v54 = vadd.f32 %v662_v2, %v400_v33  ;;  %v751_v27 = vpop.f32.mrf.mxu3  ;;  %v492_v31 = vpop.f32.mrf.mxu1  ;;  %v4530_v2 = vld [vmem:[#allocation4 + $0x1a0] sm:$0xf]  ;;  %v5316_v33 = vld [vmem:[#allocation4 + $0x1a4] sm:$0xf] }
 0x185   :  { %v6099_v16 = vadd.f32 %v751_v27, %v489_v41  ;;  %v4531_v11 = vor.u32 %v5317_v7, %v4530_v2  ;;  %v4535_v41 = vor.u32 %v5316_v33, %v4532_v63  ;;  %v4319_v2 = vld [vmem:[%s7931_s0 + $0x12b] ss:$2 sm:$0xff] }
 0x186   :  { %7957 = vst [vmem:[#allocation24_spill] sm:$0xff] %v6095_v54  ;;  %4374 = vmatmul.msk.bf16.gmra.mxu0 %vm275_vm0, %v5903_v0  ;;  %v6121_v63 = vpack.c.bf16 %v4319_v2, %v4318_v51  ;;  %v4400_v2 = vld [vmem:[%s7931_s0 + $0x4] ss:$2 sm:$0xff] }
 0x187   :  { %7958 = vst [vmem:[#allocation25_spill] sm:$0xff] %v6099_v16  ;;  %4390 = vmatmul.msk.bf16.gmra.mxu1 %vm275_vm0, %v5903_v0  ;;  %1664 = vmatpush.bf16.msra.mxu0 %v4531_v11 }
 0x188   :  { %4470 = vmatmul.msk.bf16.gmra.mxu2 %vm275_vm0, %v6097_v30  ;;  %1753 = vmatpush.bf16.msra.mxu1 %v4535_v41 }
 0x189   :  { %4486 = vmatmul.msk.bf16.gmra.mxu3 %vm275_vm0, %v6097_v30 }
 0x18b   :  { %v665_v27 = vpop.f32.mrf.mxu2  ;;  %v405_v32 = vpop.f32.mrf.mxu0 }
 0x18c   :  { %v6109_v16 = vadd.f32 %v665_v27, %v403_v15  ;;  %v754_v54 = vpop.f32.mrf.mxu3  ;;  %v494_v0 = vpop.f32.mrf.mxu1 }
 0x18d   :  { %v6111_v28 = vadd.f32 %v754_v54, %v492_v31 }
 0x193   :  { %v667_v7 = vpop.f32.mrf.mxu2  ;;  %v408_v33 = vpop.f32.mrf.mxu0 }
 0x194   :  { %v6119_v9 = vadd.f32 %v667_v7, %v405_v32  ;;  %v756_v15 = vpop.f32.mrf.mxu3  ;;  %v497_v54 = vpop.f32.mrf.mxu1 }
 0x195   :  { %v6123_v11 = vadd.f32 %v756_v15, %v494_v0 }
 0x196   :  { %7959 = vst [vmem:[#allocation26_spill] sm:$0xff] %v6119_v9  ;;  %4375 = vmatmul.msk.bf16.gmra.mxu0 %vm275_vm0, %v5927_v52 }
 0x197   :  { %7960 = vst [vmem:[#allocation27_spill] sm:$0xff] %v6123_v11  ;;  %4391 = vmatmul.msk.bf16.gmra.mxu1 %vm275_vm0, %v5927_v52  ;;  %v4401_v52 = vld [vmem:[%s7931_s0 + $0x14] ss:$2 sm:$0xff] }
 0x198   :  { %4471 = vmatmul.msk.bf16.gmra.mxu2 %vm275_vm0, %v6121_v63 }
 0x199   :  { %4487 = vmatmul.msk.bf16.gmra.mxu3 %vm275_vm0, %v6121_v63 }
 0x19b   :  { %v670_v32 = vpop.f32.mrf.mxu2  ;;  %v410_v27 = vpop.f32.mrf.mxu0 }
 0x19c   :  { %v6133_v31 = vadd.f32 %v670_v32, %v408_v33  ;;  %v759_v51 = vpop.f32.mrf.mxu3  ;;  %v499_v0 = vpop.f32.mrf.mxu1  ;;  %v6145_v33 = vpack.c.bf16 %v4401_v52, %v4400_v2 }
 0x19d   :  { %v6135_v41 = vadd.f32 %v759_v51, %v497_v54 }
 0x19e   :  { %7961 = vst [vmem:[#allocation28_spill] sm:$0xff] %v6133_v31  ;;  %v4524_v31 = vld [vmem:[#allocation4 + $0x198] sm:$0xf0] }
 0x19f   :  { %7962 = vst [vmem:[#allocation29_spill] sm:$0xff] %v6135_v41 }
 0x1a3   :  { %v672_v7 = vpop.f32.mrf.mxu2  ;;  %v910_v9 = vpop.f32.mrf.mxu0 }
 0x1a4   :  { %v6143_v15 = vadd.f32 %v672_v7, %v410_v27  ;;  %v761_v11 = vpop.f32.mrf.mxu3  ;;  %v1079_v54 = vadd.f32 %v910_v9, %v5773_v23  ;;  %v999_v51 = vpop.f32.mrf.mxu1  ;;  %v4403_v7 = vld [vmem:[%s7931_s0 + $0x3c] ss:$2 sm:$0xff] }
 0x1a5   :  { %v6147_v32 = vadd.f32 %v761_v11, %v499_v0  ;;  %v1080_v41 = vadd.f32 %v999_v51, %v5775_v26 }
 0x1a6   :  { %7963 = vst [vmem:[#allocation30_spill] sm:$0xff] %v6143_v15  ;;  %4376 = vmatmul.msk.bf16.gmra.mxu0 %vm275_vm0, %v5953_v24 }
 0x1a7   :  { %7964 = vst [vmem:[#allocation31_spill] sm:$0xff] %v6147_v32  ;;  %4392 = vmatmul.msk.bf16.gmra.mxu1 %vm275_vm0, %v5953_v24  ;;  %v4402_v24 = vld [vmem:[%s7931_s0 + $0x2c] ss:$2 sm:$0xff] }
 0x1a8   :  { %4472 = vmatmul.msk.bf16.gmra.mxu2 %vm275_vm0, %v6145_v33 }
 0x1a9   :  { %4488 = vmatmul.msk.bf16.gmra.mxu3 %vm275_vm0, %v6145_v33 }
 0x1ab   :  { %v1289_v27 = vpop.f32.mrf.mxu2  ;;  %v912_v23 = vpop.f32.mrf.mxu0 }
 0x1ac   :  { %v6159_v11 = vadd.f32 %v1289_v27, %v1079_v54  ;;  %v1378_v0 = vpop.f32.mrf.mxu3  ;;  %v1081_v26 = vadd.f32 %v912_v23, %v5785_v17  ;;  %v1001_v2 = vpop.f32.mrf.mxu1  ;;  %v4522_v23 = vld [vmem:[#allocation4 + $0x190] sm:$0xf] }
 0x1ad   :  { %v6161_v9 = vadd.f32 %v1378_v0, %v1080_v41  ;;  %v1082_v52 = vadd.f32 %v1001_v2, %v5787_v35  ;;  %v6173_v41 = vpack.c.bf16 %v4403_v7, %v4402_v24  ;;  %v5315_v2 = vld [vmem:[#allocation4 + $0x194] sm:$0xf0] }
 0x1ae   :  { %7965 = vst [vmem:[#allocation32_spill] sm:$0xff] %v6159_v11  ;;  %v4523_v15 = vor.u32 %v5315_v2, %v4522_v23  ;;  %v4404_v7 = vld [vmem:[%s7931_s0 + $0x54] ss:$2 sm:$0xff] }
 0x1af   :  { %7966 = vst [vmem:[#allocation33_spill] sm:$0xff] %v6161_v9  ;;  %v5314_v9 = vld [vmem:[#allocation4 + $0x194] sm:$0xf] }
 0x1b0   :  { %1665 = vmatpush.bf16.msra.mxu0 %v4523_v15  ;;  %v4405_v15 = vld [vmem:[%s7931_s0 + $0x64] ss:$2 sm:$0xff] }
 0x1b3   :  { %v1291_v51 = vpop.f32.mrf.mxu2  ;;  %v915_v11 = vpop.f32.mrf.mxu0 }
 0x1b4   :  { %v6171_v54 = vadd.f32 %v1291_v51, %v1081_v26  ;;  %v1380_v27 = vpop.f32.mrf.mxu3  ;;  %v1083_v17 = vadd.f32 %v915_v11, %v5797_v46  ;;  %v1004_v35 = vpop.f32.mrf.mxu1  ;;  %v4527_v26 = vor.u32 %v5314_v9, %v4524_v31 }
 0x1b5   :  { %v6175_v0 = vadd.f32 %v1380_v27, %v1082_v52  ;;  %v1084_v32 = vadd.f32 %v1004_v35, %v5799_v49 }
 0x1b6   :  { %4377 = vmatmul.msk.bf16.gmra.mxu0 %vm275_vm0, %v5977_v56  ;;  %1754 = vmatpush.bf16.msra.mxu1 %v4527_v26 }
 0x1b7   :  { %4393 = vmatmul.msk.bf16.gmra.mxu1 %vm275_vm0, %v5977_v56 }
 0x1b8   :  { %4473 = vmatmul.msk.bf16.gmra.mxu2 %vm275_vm0, %v6173_v41 }
 0x1b9   :  { %4489 = vmatmul.msk.bf16.gmra.mxu3 %vm275_vm0, %v6173_v41 }
 0x1bb   :  { %v1294_v46 = vpop.f32.mrf.mxu2  ;;  %v917_v52 = vpop.f32.mrf.mxu0 }
 0x1bc   :  { %v6187_v11 = vadd.f32 %v1294_v46, %v1083_v17  ;;  %v1383_v49 = vpop.f32.mrf.mxu3  ;;  %v1085_v31 = vadd.f32 %v917_v52, %v5809_v55  ;;  %v1006_v9 = vpop.f32.mrf.mxu1 }
 0x1bd   :  { %v6189_v24 = vadd.f32 %v1383_v49, %v1084_v32  ;;  %v1086_v56 = vadd.f32 %v1006_v9, %v5811_v58  ;;  %v6201_v32 = vpack.c.bf16 %v4405_v15, %v4404_v7 }
 0x1c3   :  { %v1296_v51 = vpop.f32.mrf.mxu2  ;;  %v920_v35 = vpop.f32.mrf.mxu0 }
 0x1c4   :  { %v6199_v27 = vadd.f32 %v1296_v51, %v1085_v31  ;;  %v1385_v17 = vpop.f32.mrf.mxu3  ;;  %v1087_v55 = vadd.f32 %v920_v35, %v5821_v62  ;;  %v1009_v58 = vpop.f32.mrf.mxu1 }
 0x1c5   :  { %v6203_v23 = vadd.f32 %v1385_v17, %v1086_v56  ;;  %v1088_v2 = vadd.f32 %v1009_v58, %v5823_v1  ;;  %v4407_v56 = vld [vmem:[%s7931_s0 + $0x8c] ss:$2 sm:$0xff] }
 0x1c6   :  { %4378 = vmatmul.msk.bf16.gmra.mxu0 %vm275_vm0, %v6001_v53 }
 0x1c7   :  { %4394 = vmatmul.msk.bf16.gmra.mxu1 %vm275_vm0, %v6001_v53  ;;  %v4406_v53 = vld [vmem:[%s7931_s0 + $0x7c] ss:$2 sm:$0xff] }
 0x1c8   :  { %4474 = vmatmul.msk.bf16.gmra.mxu2 %vm275_vm0, %v6201_v32  ;;  %v6229_v35 = vpack.c.bf16 %v4407_v56, %v4406_v53  ;;  %v5312_v53 = vld [vmem:[#allocation4 + $0x184] sm:$0xf] }
 0x1c9   :  { %4490 = vmatmul.msk.bf16.gmra.mxu3 %vm275_vm0, %v6201_v32 }
 0x1cb   :  { %v1299_v26 = vpop.f32.mrf.mxu2  ;;  %v922_v62 = vpop.f32.mrf.mxu0 }
 0x1cc   :  { %v6215_v46 = vadd.f32 %v1299_v26, %v1087_v55  ;;  %v1388_v49 = vpop.f32.mrf.mxu3  ;;  %v1089_v1 = vadd.f32 %v922_v62, %v5833_v36  ;;  %v1011_v31 = vpop.f32.mrf.mxu1 }
 0x1cd   :  { %v6217_v52 = vadd.f32 %v1388_v49, %v1088_v2  ;;  %v1090_v9 = vadd.f32 %v1011_v31, %v5835_v10 }
 0x1d3   :  { %v1301_v7 = vpop.f32.mrf.mxu2  ;;  %v925_v17 = vpop.f32.mrf.mxu0 }
 0x1d4   :  { %v6227_v15 = vadd.f32 %v1301_v7, %v1089_v1  ;;  %v1390_v51 = vpop.f32.mrf.mxu3  ;;  %v1091_v36 = vadd.f32 %v925_v17, %v5845_v13  ;;  %v1014_v10 = vpop.f32.mrf.mxu1  ;;  %v4516_v7 = vld [vmem:[#allocation4 + $0x188] sm:$0xf0] }
 0x1d5   :  { %v6231_v55 = vadd.f32 %v1390_v51, %v1090_v9  ;;  %v1092_v58 = vadd.f32 %v1014_v10, %v5847_v18  ;;  %v4514_v9 = vld [vmem:[#allocation4 + $0x180] sm:$0xf]  ;;  %v4519_v51 = vor.u32 %v5312_v53, %v4516_v7  ;;  %v4408_v17 = vld [vmem:[%s7931_s0 + $0xa4] ss:$2 sm:$0xff] }
 0x1d6   :  { %4379 = vmatmul.msk.bf16.gmra.mxu0 %vm275_vm0, %v6025_v48 }
 0x1d7   :  { %4395 = vmatmul.msk.bf16.gmra.mxu1 %vm275_vm0, %v6025_v48  ;;  %v5313_v48 = vld [vmem:[#allocation4 + $0x184] sm:$0xf0] }
 0x1d8   :  { %4475 = vmatmul.msk.bf16.gmra.mxu2 %vm275_vm0, %v6229_v35  ;;  %v4515_v56 = vor.u32 %v5313_v48, %v4514_v9  ;;  %1755 = vmatpush.bf16.msra.mxu1 %v4519_v51  ;;  %v4411_v51 = vld [vmem:[%s7931_s0 + $0xdc] ss:$2 sm:$0xff] }
 0x1d9   :  { %4491 = vmatmul.msk.bf16.gmra.mxu3 %vm275_vm0, %v6229_v35 }
 0x1da   :  { %1666 = vmatpush.bf16.msra.mxu0 %v4515_v56 }
 0x1db   :  { %v1304_v2 = vpop.f32.mrf.mxu2  ;;  %v927_v13 = vpop.f32.mrf.mxu0 }
 0x1dc   :  { %v6243_v26 = vadd.f32 %v1304_v2, %v1091_v36  ;;  %v1393_v49 = vpop.f32.mrf.mxu3  ;;  %v1093_v18 = vadd.f32 %v927_v13, %v5857_v34  ;;  %v1016_v1 = vpop.f32.mrf.mxu1  ;;  %v4409_v36 = vld [vmem:[%s7931_s0 + $0xb4] ss:$2 sm:$0xff] }
 0x1dd   :  { %v6245_v62 = vadd.f32 %v1393_v49, %v1092_v58  ;;  %v1094_v31 = vadd.f32 %v1016_v1, %v5859_v39  ;;  %v6257_v2 = vpack.c.bf16 %v4409_v36, %v4408_v17 }
 0x1e3   :  { %v1306_v34 = vpop.f32.mrf.mxu2  ;;  %v930_v58 = vpop.f32.mrf.mxu0 }
 0x1e4   :  { %v6255_v10 = vadd.f32 %v1306_v34, %v1093_v18  ;;  %v1395_v39 = vpop.f32.mrf.mxu3  ;;  %v1095_v13 = vadd.f32 %v930_v58, %v5869_v43  ;;  %v1019_v1 = vpop.f32.mrf.mxu1 }
 0x1e5   :  { %v6259_v49 = vadd.f32 %v1395_v39, %v1094_v31  ;;  %v1096_v9 = vadd.f32 %v1019_v1, %v5871_v47 }
 0x1e6   :  { %4380 = vmatmul.msk.bf16.gmra.mxu0 %vm275_vm0, %v6049_v4 }
 0x1e7   :  { %4396 = vmatmul.msk.bf16.gmra.mxu1 %vm275_vm0, %v6049_v4  ;;  %v4410_v4 = vld [vmem:[%s7931_s0 + $0xcc] ss:$2 sm:$0xff] }
 0x1e8   :  { %4476 = vmatmul.msk.bf16.gmra.mxu2 %vm275_vm0, %v6257_v2  ;;  %v6291_v39 = vpack.c.bf16 %v4411_v51, %v4410_v4 }
 0x1e9   :  { %4492 = vmatmul.msk.bf16.gmra.mxu3 %vm275_vm0, %v6257_v2 }
 0x1eb   :  { %v1309_v18 = vpop.f32.mrf.mxu2  ;;  %v932_v43 = vpop.f32.mrf.mxu0 }
 0x1ec   :  { %v6271_v31 = vadd.f32 %v1309_v18, %v1095_v13  ;;  %v1398_v48 = vpop.f32.mrf.mxu3  ;;  %v6276_v47 = vadd.f32 %v932_v43, %v5881_v5  ;;  %v1021_v56 = vpop.f32.mrf.mxu1 }
 0x1ed   :  { %v6273_v53 = vadd.f32 %v1398_v48, %v1096_v9  ;;  %v6279_v7 = vadd.f32 %v1021_v56, %v5883_v12  ;;  %v4413_v56 = vld [vmem:[%s7931_s0 + $0x104] ss:$2 sm:$0xff] }
 0x1f3   :  { %v6287_v17 = vpop.f32.mrf.mxu2  ;;  %v935_v34 = vpop.f32.mrf.mxu0 }
 0x1f4   :  { %v6289_v36 = vpop.f32.mrf.mxu3  ;;  %v1099_v5 = vadd.f32 %v935_v34, %v5893_v37  ;;  %v1024_v58 = vpop.f32.mrf.mxu1 }
 0x1f5   :  { %v1100_v12 = vadd.f32 %v1024_v58, %v5895_v45 }
 0x1f6   :  { %4381 = vmatmul.msk.bf16.gmra.mxu0 %vm275_vm0, %v6073_v14 }
 0x1f7   :  { %4397 = vmatmul.msk.bf16.gmra.mxu1 %vm275_vm0, %v6073_v14  ;;  %v4412_v14 = vld [vmem:[%s7931_s0 + $0xf4] ss:$2 sm:$0xff] }
 0x1f8   :  { %4477 = vmatmul.msk.bf16.gmra.mxu2 %vm275_vm0, %v6291_v39 }
 0x1f9   :  { %4493 = vmatmul.msk.bf16.gmra.mxu3 %vm275_vm0, %v6291_v39 }
 0x1fb   :  { %v1314_v13 = vpop.f32.mrf.mxu2  ;;  %v937_v37 = vpop.f32.mrf.mxu0 }
 0x1fc   :  { %v6303_v1 = vadd.f32 %v1314_v13, %v1099_v5  ;;  %v1403_v9 = vpop.f32.mrf.mxu3  ;;  %v6308_v45 = vadd.f32 %v937_v37, %v5905_v8  ;;  %v1026_v48 = vpop.f32.mrf.mxu1  ;;  %v6323_v5 = vpack.c.bf16 %v4413_v56, %v4412_v14  ;;  %v4415_v56 = vld [vmem:[%s7931_s0 + $0x12c] ss:$2 sm:$0xff] }
 0x1fd   :  { %v6305_v18 = vadd.f32 %v1403_v9, %v1100_v12  ;;  %v6311_v43 = vadd.f32 %v1026_v48, %v5907_v20 }
 0x1fe   :  { %7967 = vst [vmem:[#allocation34_spill] sm:$0xff] %v6308_v45 }
 0x1ff   :  { %7968 = vst [vmem:[#allocation35_spill] sm:$0xff] %v6311_v43 }
 0x203   :  { %v6319_v4 = vpop.f32.mrf.mxu2  ;;  %v940_v34 = vpop.f32.mrf.mxu0 }
 0x204   :  { %7969 = vst [vmem:[#allocation36_spill] sm:$0xff] %v6319_v4  ;;  %v6321_v51 = vpop.f32.mrf.mxu3  ;;  %v1103_v8 = vadd.f32 %v940_v34, %v5917_v38  ;;  %v1029_v58 = vpop.f32.mrf.mxu1 }
 0x205   :  { %7970 = vst [vmem:[#allocation37_spill] sm:$0xff] %v6321_v51  ;;  %v1104_v20 = vadd.f32 %v1029_v58, %v5919_v44 }
 0x206   :  { %4382 = vmatmul.msk.bf16.gmra.mxu0 %vm275_vm0, %v6097_v30 }
 0x207   :  { %4398 = vmatmul.msk.bf16.gmra.mxu1 %vm275_vm0, %v6097_v30  ;;  %v4414_v30 = vld [vmem:[%s7931_s0 + $0x11c] ss:$2 sm:$0xff] }
 0x208   :  { %4478 = vmatmul.msk.bf16.gmra.mxu2 %vm275_vm0, %v6323_v5 }
 0x209   :  { %4494 = vmatmul.msk.bf16.gmra.mxu3 %vm275_vm0, %v6323_v5 }
 0x20b   :  { %v1319_v12 = vpop.f32.mrf.mxu2  ;;  %v942_v38 = vpop.f32.mrf.mxu0 }
 0x20c   :  { %v6335_v13 = vadd.f32 %v1319_v12, %v1103_v8  ;;  %v1408_v9 = vpop.f32.mrf.mxu3  ;;  %v6340_v44 = vadd.f32 %v942_v38, %v5929_v60  ;;  %v1031_v48 = vpop.f32.mrf.mxu1 }
 0x20d   :  { %v6337_v37 = vadd.f32 %v1408_v9, %v1104_v20  ;;  %v6343_v14 = vadd.f32 %v1031_v48, %v5931_v57  ;;  %v6355_v20 = vpack.c.bf16 %v4415_v56, %v4414_v30 }
 0x20e   :  { %7971 = vst [vmem:[#allocation38_spill] sm:$0xff] %v6340_v44 }
 0x20f   :  { %7972 = vst [vmem:[#allocation39_spill] sm:$0xff] %v6343_v14 }
 0x213   :  { %v6351_v34 = vpop.f32.mrf.mxu2  ;;  %v945_v58 = vpop.f32.mrf.mxu0 }
 0x214   :  { %7973 = vst [vmem:[#allocation40_spill] sm:$0xff] %v6351_v34  ;;  %v6353_v8 = vpop.f32.mrf.mxu3  ;;  %v1107_v60 = vadd.f32 %v945_v58, %v5941_v61  ;;  %v1034_v12 = vpop.f32.mrf.mxu1  ;;  %v7986_v34 = vld [vmem:[#allocation19_spill] sm:$0xff] }
 0x215   :  { %7974 = vst [vmem:[#allocation41_spill] sm:$0xff] %v6353_v8  ;;  %v1108_v57 = vadd.f32 %v1034_v12, %v5943_v6 }
 0x216   :  { %4383 = vmatmul.msk.bf16.gmra.mxu0 %vm275_vm0, %v6121_v63 }
 0x217   :  { %4399 = vmatmul.msk.bf16.gmra.mxu1 %vm275_vm0, %v6121_v63 }
 0x218   :  { %4479 = vmatmul.msk.bf16.gmra.mxu2 %vm275_vm0, %v6355_v20 }
 0x219   :  { %4495 = vmatmul.msk.bf16.gmra.mxu3 %vm275_vm0, %v6355_v20 }
 0x21b   :  { %v1324_v9 = vpop.f32.mrf.mxu2  ;;  %v947_v61 = vpop.f32.mrf.mxu0 }
 0x21c   :  { %v6367_v38 = vadd.f32 %v1324_v9, %v1107_v60  ;;  %v1413_v48 = vpop.f32.mrf.mxu3  ;;  %v6372_v6 = vadd.f32 %v947_v61, %v5951_v21  ;;  %v1036_v56 = vpop.f32.mrf.mxu1  ;;  %v7977_v61 = vld [vmem:[#allocation10_spill] sm:$0xff] }
 0x21d   :  { %v6369_v30 = vadd.f32 %v1413_v48, %v1108_v57  ;;  %v6375_v58 = vadd.f32 %v1036_v56, %v5955_v25 }
 0x21e   :  { %7975 = vst [vmem:[#allocation42_spill] sm:$0xff] %v6372_v6 }
 0x21f   :  { %7976 = vst [vmem:[#allocation43_spill] sm:$0xff] %v6375_v58 }
 0x223   :  { %v950_v63 = vpop.f32.mrf.mxu0 }
 0x224   :  { %v6378_v12 = vadd.f32 %v950_v63, %v5965_v29  ;;  %v1039_v8 = vpop.f32.mrf.mxu1  ;;  %v7978_v63 = vld [vmem:[#allocation11_spill] sm:$0xff] }
 0x225   :  { %v6381_v14 = vadd.f32 %v1039_v8, %v5967_v40 }
 0x226   :  { %4560 = vmatmul.msk.bf16.vlgmr.msra.gmra.mxu0 %vm275_vm0, %v6145_v33 }
 0x227   :  { %4576 = vmatmul.msk.bf16.vlgmr.msra.gmra.mxu1 %vm275_vm0, %v6145_v33 }
 0x22b   :  { %v952_v21 = vpop.f32.mrf.mxu0 }
 0x22c   :  { %v6388_v60 = vadd.f32 %v952_v21, %v5975_v50  ;;  %v1041_v25 = vpop.f32.mrf.mxu1 }
 0x22d   :  { %v6391_v57 = vadd.f32 %v1041_v25, %v5979_v59 }
 0x233   :  { %v955_v29 = vpop.f32.mrf.mxu0 }
 0x234   :  { %v6394_v9 = vadd.f32 %v955_v29, %v5989_v22  ;;  %v1044_v40 = vpop.f32.mrf.mxu1  ;;  %v7980_v29 = vld [vmem:[#allocation13_spill] sm:$0xff] }
 0x235   :  { %v6397_v8 = vadd.f32 %v1044_v40, %v5991_v42 }
 0x236   :  { %4561 = vmatmul.msk.bf16.gmra.mxu0 %vm275_vm0, %v6173_v41 }
 0x237   :  { %4577 = vmatmul.msk.bf16.gmra.mxu1 %vm275_vm0, %v6173_v41  ;;  %v7979_v41 = vld [vmem:[#allocation12_spill] sm:$0xff] }
 0x23b   :  { %v957_v50 = vpop.f32.mrf.mxu0 }
 0x23c   :  { %v6404_v33 = vadd.f32 %v957_v50, %v5999_v19  ;;  %v1046_v59 = vpop.f32.mrf.mxu1 }
 0x23d   :  { %v6407_v48 = vadd.f32 %v1046_v59, %v6003_v3  ;;  %v7981_v59 = vld [vmem:[#allocation14_spill] sm:$0xff] }
 0x243   :  { %v960_v22 = vpop.f32.mrf.mxu0 }
 0x244   :  { %v6410_v56 = vadd.f32 %v960_v22, %v7977_v61  ;;  %v1049_v42 = vpop.f32.mrf.mxu1 }
 0x245   :  { %v6413_v21 = vadd.f32 %v1049_v42, %v7978_v63  ;;  %v7982_v42 = vld [vmem:[#allocation15_spill] sm:$0xff] }
 0x246   :  { %4562 = vmatmul.msk.bf16.gmra.mxu0 %vm275_vm0, %v6201_v32 }
 0x247   :  { %4578 = vmatmul.msk.bf16.gmra.mxu1 %vm275_vm0, %v6201_v32 }
 0x24b   :  { %v962_v19 = vpop.f32.mrf.mxu0 }
 0x24c   :  { %v6420_v25 = vadd.f32 %v962_v19, %v7979_v41  ;;  %v1051_v3 = vpop.f32.mrf.mxu1  ;;  %v7983_v19 = vld [vmem:[#allocation16_spill] sm:$0xff] }
 0x24d   :  { %v6423_v40 = vadd.f32 %v1051_v3, %v7980_v29  ;;  %v7984_v29 = vld [vmem:[#allocation17_spill] sm:$0xff] }
 0x253   :  { %v965_v50 = vpop.f32.mrf.mxu0 }
 0x254   :  { %v6426_v22 = vadd.f32 %v965_v50, %v7981_v59  ;;  %v1054_v61 = vpop.f32.mrf.mxu1  ;;  %v4666_v50 = vld [vmem:[%s7934_s3 + $0xf0] sm:$0xf]  ;;  %v5355_v59 = vld [vmem:[%s7934_s3 + $0xf4] sm:$0xf0] }
 0x255   :  { %v6429_v63 = vadd.f32 %v1054_v61, %v7982_v42  ;;  %v4667_v61 = vor.u32 %v5355_v59, %v4666_v50  ;;  %v4668_v42 = vld [vmem:[%s7934_s3 + $0xf8] sm:$0xf0]  ;;  %v7987_v59 = vld [vmem:[#allocation20_spill] sm:$0xff] }
 0x256   :  { %4563 = vmatmul.msk.bf16.gmra.mxu0 %vm275_vm0, %v6229_v35 }
 0x257   :  { %4579 = vmatmul.msk.bf16.gmra.mxu1 %vm275_vm0, %v6229_v35  ;;  %v5354_v35 = vld [vmem:[%s7934_s3 + $0xf4] sm:$0xf]  ;;  %2204 = vmatpush.bf16.msra.mxu2 %v4667_v61  ;;  %v7988_v61 = vld [vmem:[#allocation21_spill] sm:$0xff] }
 0x25b   :  { %v967_v32 = vpop.f32.mrf.mxu0 }
 0x25c   :  { %v6436_v41 = vadd.f32 %v967_v32, %v7983_v19  ;;  %v1056_v3 = vpop.f32.mrf.mxu1  ;;  %v4671_v32 = vor.u32 %v5354_v35, %v4668_v42 }
 0x25d   :  { %v6439_v58 = vadd.f32 %v1056_v3, %v7984_v29  ;;  %v7985_v3 = vld [vmem:[#allocation18_spill] sm:$0xff] }
 0x25e   :  { %2253 = vmatpush.bf16.msra.mxu3 %v4671_v32 }
 0x263   :  { %v970_v19 = vpop.f32.mrf.mxu0 }
 0x264   :  { %v6454_v29 = vadd.f32 %v970_v19, %v7985_v3  ;;  %v1059_v6 = vpop.f32.mrf.mxu1  ;;  %v7989_v19 = vld [vmem:[#allocation22_spill] sm:$0xff] }
 0x265   :  { %v6457_v44 = vadd.f32 %v1059_v6, %v7986_v34  ;;  %v7991_v6 = vld [vmem:[#allocation23_spill] sm:$0xff] }
 0x266   :  { %4564 = vmatmul.msk.bf16.gmra.mxu0 %vm275_vm0, %v6257_v2 }
 0x267   :  { %4580 = vmatmul.msk.bf16.gmra.mxu1 %vm275_vm0, %v6257_v2 }
 0x26b   :  { %v972_v50 = vpop.f32.mrf.mxu0 }
 0x26c   :  { %v6464_v51 = vadd.f32 %v972_v50, %v7987_v59  ;;  %v1061_v35 = vpop.f32.mrf.mxu1  ;;  %v7993_v50 = vld [vmem:[#allocation24_spill] sm:$0xff] }
 0x26d   :  { %v6467_v42 = vadd.f32 %v1061_v35, %v7988_v61  ;;  %v7995_v61 = vld [vmem:[#allocation25_spill] sm:$0xff] }
 0x273   :  { %v975_v32 = vpop.f32.mrf.mxu0 }
 0x274   :  { %v6470_v3 = vadd.f32 %v975_v32, %v7989_v19  ;;  %v1064_v34 = vpop.f32.mrf.mxu1  ;;  %v4658_v32 = vld [vmem:[%s7934_s3 + $0xe0] sm:$0xf]  ;;  %v5353_v19 = vld [vmem:[%s7934_s3 + $0xe4] sm:$0xf0] }
 0x275   :  { %v6473_v43 = vadd.f32 %v1064_v34, %v7991_v6  ;;  %v4659_v34 = vor.u32 %v5353_v19, %v4658_v32  ;;  %v4660_v6 = vld [vmem:[%s7934_s3 + $0xe8] sm:$0xf0]  ;;  %v7999_v19 = vld [vmem:[#allocation26_spill] sm:$0xff] }
 0x276   :  { %7990 = vst [vmem:[#allocation10_spill] sm:$0xff] %v6470_v3  ;;  %4565 = vmatmul.msk.bf16.gmra.mxu0 %vm275_vm0, %v6291_v39 }
 0x277   :  { %7992 = vst [vmem:[#allocation11_spill] sm:$0xff] %v6473_v43  ;;  %4581 = vmatmul.msk.bf16.gmra.mxu1 %vm275_vm0, %v6291_v39  ;;  %v5352_v39 = vld [vmem:[%s7934_s3 + $0xe4] sm:$0xf]  ;;  %2205 = vmatpush.bf16.msra.mxu2 %v4659_v34  ;;  %v8001_v34 = vld [vmem:[#allocation27_spill] sm:$0xff] }
 0x27b   :  { %v977_v2 = vpop.f32.mrf.mxu0 }
 0x27c   :  { %v6480_v59 = vadd.f32 %v977_v2, %v7993_v50  ;;  %v1066_v35 = vpop.f32.mrf.mxu1  ;;  %v4663_v2 = vor.u32 %v5352_v39, %v4660_v6 }
 0x27d   :  { %v6483_v4 = vadd.f32 %v1066_v35, %v7995_v61 }
 0x27e   :  { %7994 = vst [vmem:[#allocation12_spill] sm:$0xff] %v6480_v59  ;;  %2254 = vmatpush.bf16.msra.mxu3 %v4663_v2  ;;  %v8003_v2 = vld [vmem:[#allocation28_spill] sm:$0xff] }
 0x27f   :  { %7996 = vst [vmem:[#allocation13_spill] sm:$0xff] %v6483_v4 }
 0x283   :  { %v980_v50 = vpop.f32.mrf.mxu0 }
 0x284   :  { %v6498_v35 = vadd.f32 %v980_v50, %v6109_v16  ;;  %v1069_v61 = vpop.f32.mrf.mxu1 }
 0x285   :  { %v6501_v4 = vadd.f32 %v1069_v61, %v6111_v28  ;;  %v8005_v61 = vld [vmem:[#allocation29_spill] sm:$0xff] }
 0x286   :  { %7997 = vst [vmem:[#allocation14_spill] sm:$0xff] %v6498_v35  ;;  %4566 = vmatmul.msk.bf16.gmra.mxu0 %vm275_vm0, %v6323_v5 }
 0x287   :  { %7998 = vst [vmem:[#allocation15_spill] sm:$0xff] %v6501_v4  ;;  %4582 = vmatmul.msk.bf16.gmra.mxu1 %vm275_vm0, %v6323_v5 }
 0x28b   :  { %v982_v32 = vpop.f32.mrf.mxu0 }
 0x28c   :  { %v6508_v59 = vadd.f32 %v982_v32, %v7999_v19  ;;  %v1071_v39 = vpop.f32.mrf.mxu1  ;;  %v8007_v32 = vld [vmem:[#allocation30_spill] sm:$0xff] }
 0x28d   :  { %v6511_v6 = vadd.f32 %v1071_v39, %v8001_v34  ;;  %v8009_v34 = vld [vmem:[#allocation31_spill] sm:$0xff] }
 0x28e   :  { %8000 = vst [vmem:[#allocation16_spill] sm:$0xff] %v6508_v59 }
 0x28f   :  { %8002 = vst [vmem:[#allocation17_spill] sm:$0xff] %v6511_v6 }
 0x293   :  { %v985_v16 = vpop.f32.mrf.mxu0 }
 0x294   :  { %v6514_v50 = vadd.f32 %v985_v16, %v8003_v2  ;;  %v1074_v28 = vpop.f32.mrf.mxu1  ;;  %v4650_v16 = vld [vmem:[%s7934_s3 + $0xd0] sm:$0xf]  ;;  %v5351_v2 = vld [vmem:[%s7934_s3 + $0xd4] sm:$0xf0] }
 0x295   :  { %v6517_v4 = vadd.f32 %v1074_v28, %v8005_v61  ;;  %v4651_v28 = vor.u32 %v5351_v2, %v4650_v16  ;;  %v4652_v61 = vld [vmem:[%s7934_s3 + $0xd8] sm:$0xf0] }
 0x296   :  { %8004 = vst [vmem:[#allocation18_spill] sm:$0xff] %v6514_v50  ;;  %4567 = vmatmul.msk.bf16.gmra.mxu0 %vm275_vm0, %v6355_v20  ;;  %v8012_v2 = vld [vmem:[#allocation33_spill] sm:$0xff] }
 0x297   :  { %8006 = vst [vmem:[#allocation19_spill] sm:$0xff] %v6517_v4  ;;  %4583 = vmatmul.msk.bf16.gmra.mxu1 %vm275_vm0, %v6355_v20  ;;  %v5350_v20 = vld [vmem:[%s7934_s3 + $0xd4] sm:$0xf]  ;;  %2206 = vmatpush.bf16.msra.mxu2 %v4651_v28 }
 0x29b   :  { %v987_v5 = vpop.f32.mrf.mxu0 }
 0x29c   :  { %v6524_v19 = vadd.f32 %v987_v5, %v8007_v32  ;;  %v1076_v39 = vpop.f32.mrf.mxu1  ;;  %v4496_v5 = vld [vmem:[%s7931_s0 + $0x5] ss:$2 sm:$0xff]  ;;  %v4497_v32 = vld [vmem:[%s7931_s0 + $0x15] ss:$2 sm:$0xff] }
 0x29d   :  { %v6527_v6 = vadd.f32 %v1076_v39, %v8009_v34  ;;  %v4655_v39 = vor.u32 %v5350_v20, %v4652_v61  ;;  %v1554_v34 = vpack.c.bf16 %v4497_v32, %v4496_v5 }
 0x29e   :  { %8008 = vst [vmem:[#allocation20_spill] sm:$0xff] %v6524_v19  ;;  %v8011_v19 = vld [vmem:[#allocation32_spill] sm:$0xff] }
 0x29f   :  { %8010 = vst [vmem:[#allocation21_spill] sm:$0xff] %v6527_v6  ;;  %2255 = vmatpush.bf16.msra.mxu3 %v4655_v39 }
 0x2a3   :  { %v1668_v6 = vpop.f32.mrf.mxu0 }
 0x2a4   :  { %v6548_v4 = vadd.f32 %v1668_v6, %v8011_v19  ;;  %v1757_v16 = vpop.f32.mrf.mxu1  ;;  %v4498_v6 = vld [vmem:[%s7931_s0 + $0x2d] ss:$2 sm:$0xff]  ;;  %v4499_v19 = vld [vmem:[%s7931_s0 + $0x3d] ss:$2 sm:$0xff] }
 0x2a5   :  { %v6551_v50 = vadd.f32 %v1757_v16, %v8012_v2  ;;  %v1555_v61 = vpack.c.bf16 %v4499_v19, %v4498_v6  ;;  %v5348_v2 = vld [vmem:[%s7934_s3 + $0xc4] sm:$0xf] }
 0x2a6   :  { %4568 = vmatmul.msk.bf16.gmra.mxu0 %vm275_vm0, %v1554_v34  ;;  %v4501_v6 = vld [vmem:[%s7931_s0 + $0x65] ss:$2 sm:$0xff] }
 0x2a7   :  { %4584 = vmatmul.msk.bf16.gmra.mxu1 %vm275_vm0, %v1554_v34 }
 0x2ab   :  { %v1670_v59 = vpop.f32.mrf.mxu0 }
 0x2ac   :  { %v6556_v35 = vadd.f32 %v1670_v59, %v6171_v54  ;;  %v1759_v20 = vpop.f32.mrf.mxu1 }
 0x2ad   :  { %v6559_v28 = vadd.f32 %v1759_v20, %v6175_v0 }
 0x2b3   :  { %v1673_v5 = vpop.f32.mrf.mxu0 }
 0x2b4   :  { %v6568_v32 = vadd.f32 %v1673_v5, %v6187_v11  ;;  %v1762_v39 = vpop.f32.mrf.mxu1  ;;  %v4642_v11 = vld [vmem:[%s7934_s3 + $0xc0] sm:$0xf] }
 0x2b5   :  { %v6571_v54 = vadd.f32 %v1762_v39, %v6189_v24  ;;  %v5349_v24 = vld [vmem:[%s7934_s3 + $0xc4] sm:$0xf0] }
 0x2b6   :  { %4569 = vmatmul.msk.bf16.gmra.mxu0 %vm275_vm0, %v1555_v61  ;;  %v4643_v20 = vor.u32 %v5349_v24, %v4642_v11 }
 0x2b7   :  { %4585 = vmatmul.msk.bf16.gmra.mxu1 %vm275_vm0, %v1555_v61 }
 0x2b8   :  { %2207 = vmatpush.bf16.msra.mxu2 %v4643_v20 }
 0x2bb   :  { %v1675_v0 = vpop.f32.mrf.mxu0 }
 0x2bc   :  { %v6576_v59 = vadd.f32 %v1675_v0, %v6199_v27  ;;  %v1764_v34 = vpop.f32.mrf.mxu1  ;;  %v4644_v27 = vld [vmem:[%s7934_s3 + $0xc8] sm:$0xf0] }
 0x2bd   :  { %v6579_v16 = vadd.f32 %v1764_v34, %v6203_v23  ;;  %v4500_v23 = vld [vmem:[%s7931_s0 + $0x55] ss:$2 sm:$0xff]  ;;  %v4647_v19 = vor.u32 %v5348_v2, %v4644_v27 }
 0x2be   :  { %v1556_v61 = vpack.c.bf16 %v4501_v6, %v4500_v23 }
 0x2bf   :  { %2256 = vmatpush.bf16.msra.mxu3 %v4647_v19 }
 0x2c3   :  { %v1678_v5 = vpop.f32.mrf.mxu0 }
 0x2c4   :  { %v6600_v39 = vadd.f32 %v1678_v5, %v6215_v46  ;;  %v1767_v0 = vpop.f32.mrf.mxu1  ;;  %v4502_v46 = vld [vmem:[%s7931_s0 + $0x7d] ss:$2 sm:$0xff] }
 0x2c5   :  { %v6603_v34 = vadd.f32 %v1767_v0, %v6217_v52  ;;  %v4503_v52 = vld [vmem:[%s7931_s0 + $0x8d] ss:$2 sm:$0xff] }
 0x2c6   :  { %4570 = vmatmul.msk.bf16.gmra.mxu0 %vm275_vm0, %v1556_v61  ;;  %v1557_v27 = vpack.c.bf16 %v4503_v52, %v4502_v46  ;;  %v4505_v46 = vld [vmem:[%s7931_s0 + $0xb5] ss:$2 sm:$0xff] }
 0x2c7   :  { %4586 = vmatmul.msk.bf16.gmra.mxu1 %vm275_vm0, %v1556_v61 }
 0x2cb   :  { %v1680_v11 = vpop.f32.mrf.mxu0 }
 0x2cc   :  { %v6608_v24 = vadd.f32 %v1680_v11, %v6227_v15  ;;  %v1769_v2 = vpop.f32.mrf.mxu1  ;;  %v5346_v11 = vld [vmem:[%s7934_s3 + $0xb4] sm:$0xf] }
 0x2cd   :  { %v6611_v20 = vadd.f32 %v1769_v2, %v6231_v55 }
 0x2d3   :  { %v1683_v23 = vpop.f32.mrf.mxu0 }
 0x2d4   :  { %v6620_v6 = vadd.f32 %v1683_v23, %v6243_v26  ;;  %v1772_v19 = vpop.f32.mrf.mxu1  ;;  %v4634_v26 = vld [vmem:[%s7934_s3 + $0xb0] sm:$0xf] }
 0x2d5   :  { %v6623_v15 = vadd.f32 %v1772_v19, %v6245_v62  ;;  %v5347_v62 = vld [vmem:[%s7934_s3 + $0xb4] sm:$0xf0] }
 0x2d6   :  { %4571 = vmatmul.msk.bf16.gmra.mxu0 %vm275_vm0, %v1557_v27  ;;  %v4635_v2 = vor.u32 %v5347_v62, %v4634_v26  ;;  %v4810_v26 = vld [vmem:[%s7934_s3 + $0x170] sm:$0xf]  ;;  %v5371_v62 = vld [vmem:[%s7934_s3 + $0x174] sm:$0xf0] }
 0x2d7   :  { %4587 = vmatmul.msk.bf16.gmra.mxu1 %vm275_vm0, %v1557_v27 }
 0x2d8   :  { %2208 = vmatpush.bf16.msra.mxu2 %v4635_v2 }
 0x2db   :  { %v1685_v55 = vpop.f32.mrf.mxu0 }
 0x2dc   :  { %v6628_v61 = vadd.f32 %v1685_v55, %v6255_v10  ;;  %v1774_v5 = vpop.f32.mrf.mxu1  ;;  %v4636_v10 = vld [vmem:[%s7934_s3 + $0xb8] sm:$0xf0] }
 0x2dd   :  { %v6631_v0 = vadd.f32 %v1774_v5, %v6259_v49  ;;  %v4504_v49 = vld [vmem:[%s7931_s0 + $0xa5] ss:$2 sm:$0xff]  ;;  %v4639_v52 = vor.u32 %v5346_v11, %v4636_v10  ;;  %v4811_v11 = vor.u32 %v5371_v62, %v4810_v26 }
 0x2de   :  { %v1558_v27 = vpack.c.bf16 %v4505_v46, %v4504_v49  ;;  %v4506_v46 = vld [vmem:[%s7931_s0 + $0xcd] ss:$2 sm:$0xff] }
 0x2df   :  { %2257 = vmatpush.bf16.msra.mxu3 %v4639_v52  ;;  %2597 = vmatpush.bf16.msrb.mxu0 %v4811_v11  ;;  %v4507_v52 = vld [vmem:[%s7931_s0 + $0xdd] ss:$2 sm:$0xff]  ;;  %v6691_v11 = vpop.f32.mrf.mxu3 }
 0x2e0   :  { %8016 = vst [vmem:[#allocation25_spill] sm:$0xff] %v6691_v11 }
 0x2e3   :  { %v1688_v23 = vpop.f32.mrf.mxu0 }
 0x2e4   :  { %v6652_v19 = vadd.f32 %v1688_v23, %v6271_v31  ;;  %v1777_v55 = vpop.f32.mrf.mxu1  ;;  %v5370_v31 = vld [vmem:[%s7934_s3 + $0x174] sm:$0xf] }
 0x2e5   :  { %v6655_v5 = vadd.f32 %v1777_v55, %v6273_v53  ;;  %v4812_v53 = vld [vmem:[%s7934_s3 + $0x178] sm:$0xf0] }
 0x2e6   :  { %4572 = vmatmul.msk.bf16.gmra.mxu0 %vm275_vm0, %v1558_v27  ;;  %v4815_v2 = vor.u32 %v5370_v31, %v4812_v53  ;;  %v6688_v31 = vpop.f32.mrf.mxu2 }
 0x2e7   :  { %4588 = vmatmul.msk.bf16.gmra.mxu1 %vm275_vm0, %v1558_v27  ;;  %v1559_v27 = vpack.c.bf16 %v4507_v52, %v4506_v46  ;;  %8015 = vst [vmem:[#allocation24_spill] sm:$0xff] %v6688_v31  ;;  %v5344_v46 = vld [vmem:[%s7934_s3 + $0xa4] sm:$0xf] }
 0x2e8   :  { %2646 = vmatpush.bf16.msrb.mxu1 %v4815_v2 }
 0x2eb   :  { %v6671_v10 = vpop.f32.mrf.mxu0 }
 0x2ec   :  { %v6673_v49 = vpop.f32.mrf.mxu1 }
 0x2ee   :  { %v6715_v31 = vpop.f32.mrf.mxu2 }
 0x2f3   :  { %v1693_v23 = vpop.f32.mrf.mxu0 }
 0x2f4   :  { %v6682_v55 = vadd.f32 %v1693_v23, %v6303_v1  ;;  %v1782_v26 = vpop.f32.mrf.mxu1  ;;  %v4626_v1 = vld [vmem:[%s7934_s3 + $0xa0] sm:$0xf] }
 0x2f5   :  { %v6685_v62 = vadd.f32 %v1782_v26, %v6305_v18  ;;  %v5345_v18 = vld [vmem:[%s7934_s3 + $0xa4] sm:$0xf0]  ;;  %v4508_v23 = vld [vmem:[%s7931_s0 + $0xf5] ss:$2 sm:$0xff] }
 0x2f6   :  { %8013 = vst [vmem:[#allocation22_spill] sm:$0xff] %v6682_v55  ;;  %4573 = vmatmul.msk.bf16.gmra.mxu0 %vm275_vm0, %v1559_v27  ;;  %v4627_v52 = vor.u32 %v5345_v18, %v4626_v1  ;;  %v4509_v26 = vld [vmem:[%s7931_s0 + $0x105] ss:$2 sm:$0xff] }
 0x2f7   :  { %8014 = vst [vmem:[#allocation23_spill] sm:$0xff] %v6685_v62  ;;  %4589 = vmatmul.msk.bf16.gmra.mxu1 %vm275_vm0, %v1559_v27  ;;  %v4628_v27 = vld [vmem:[%s7934_s3 + $0xa8] sm:$0xf0]  ;;  %v1560_v1 = vpack.c.bf16 %v4509_v26, %v4508_v23  ;;  %v4802_v23 = vld [vmem:[%s7934_s3 + $0x160] sm:$0xf] }
 0x2f8   :  { %v4631_v11 = vor.u32 %v5344_v46, %v4628_v27  ;;  %2209 = vmatpush.bf16.msra.mxu2 %v4627_v52  ;;  %v6727_v46 = vpop.f32.mrf.mxu2  ;;  %v5369_v26 = vld [vmem:[%s7934_s3 + $0x164] sm:$0xf0] }
 0x2fa   :  { %2258 = vmatpush.bf16.msra.mxu3 %v4631_v11 }
 0x2fb   :  { %v6693_v53 = vpop.f32.mrf.mxu0 }
 0x2fc   :  { %8017 = vst [vmem:[#allocation26_spill] sm:$0xff] %v6693_v53  ;;  %v6695_v2 = vpop.f32.mrf.mxu1 }
 0x2fd   :  { %8018 = vst [vmem:[#allocation27_spill] sm:$0xff] %v6695_v2  ;;  %v6717_v2 = vpop.f32.mrf.mxu3 }
 0x303   :  { %v1698_v18 = vpop.f32.mrf.mxu0 }
 0x304   :  { %v6720_v53 = vadd.f32 %v1698_v18, %v6335_v13  ;;  %v1787_v45 = vpop.f32.mrf.mxu1  ;;  %v4510_v13 = vld [vmem:[%s7931_s0 + $0x11d] ss:$2 sm:$0xff] }
 0x305   :  { %v6723_v62 = vadd.f32 %v1787_v45, %v6337_v37  ;;  %v6731_v11 = vpop.f32.mrf.mxu3  ;;  %v4511_v45 = vld [vmem:[%s7931_s0 + $0x12d] ss:$2 sm:$0xff]  ;;  %v5530_v37 = vmov 0.0   ;;  %v5368_v18 = vld [vmem:[%s7934_s3 + $0x164] sm:$0xf] }
 0x306   :  { %8019 = vst [vmem:[#allocation28_spill] sm:$0xff] %v6720_v53  ;;  %4574 = vmatmul.msk.bf16.gmra.mxu0 %vm275_vm0, %v1560_v1 }
 0x307   :  { %8020 = vst [vmem:[#allocation29_spill] sm:$0xff] %v6723_v62  ;;  %4590 = vmatmul.msk.bf16.gmra.mxu1 %vm275_vm0, %v1560_v1  ;;  %v4803_v1 = vor.u32 %v5369_v26, %v4802_v23  ;;  %v1561_v62 = vpack.c.bf16 %v4511_v45, %v4510_v13  ;;  %v6756_v26 = vpop.f32.mrf.mxu2 }
 0x308   :  { %1987 = vst [vmem:[#allocation2 + $0x10] sm:$0xff] %v5530_v37 }
 0x309   :  { %1990 = vst [vmem:[#allocation2 + $0x28] sm:$0xff] %v5530_v37  ;;  %2598 = vmatpush.bf16.msrb.mxu0 %v4803_v1  ;;  %v5365_v1 = vld [vmem:[%s7934_s3 + $0x144] sm:$0xf0] }
 0x30a   :  { %1993 = vst [vmem:[#allocation2 + $0x40] sm:$0xff] %v5530_v37 }
 0x30b   :  { %v6729_v52 = vpop.f32.mrf.mxu0  ;;  %1996 = vst [vmem:[#allocation2 + $0x58] sm:$0xff] %v5530_v37 }
 0x30c   :  { %8021 = vst [vmem:[#allocation30_spill] sm:$0xff] %v6729_v52  ;;  %v6733_v27 = vpop.f32.mrf.mxu1 }
 0x30d   :  { %8022 = vst [vmem:[#allocation31_spill] sm:$0xff] %v6733_v27  ;;  %v4804_v27 = vld [vmem:[%s7934_s3 + $0x168] sm:$0xf0]  ;;  %v6761_v3 = vpop.f32.mrf.mxu3 }
 0x30e   :  { %v4807_v52 = vor.u32 %v5368_v18, %v4804_v27  ;;  %1999 = vst [vmem:[#allocation2 + $0x70] sm:$0xff] %v5530_v37  ;;  %v4796_v27 = vld [vmem:[%s7934_s3 + $0x158] sm:$0xf0]  ;;  %v5364_v18 = vld [vmem:[%s7934_s3 + $0x144] sm:$0xf] }
 0x30f   :  { %2002 = vst [vmem:[#allocation2 + $0x88] sm:$0xff] %v5530_v37 }
 0x310   :  { %2647 = vmatpush.bf16.msrb.mxu1 %v4807_v52  ;;  %2005 = vst [vmem:[#allocation2 + $0xa0] sm:$0xff] %v5530_v37  ;;  %v4794_v52 = vld [vmem:[%s7934_s3 + $0x150] sm:$0xf] }
 0x311   :  { %2008 = vst [vmem:[#allocation2 + $0xb8] sm:$0xff] %v5530_v37  ;;  %v4786_v37 = vld [vmem:[%s7934_s3 + $0x140] sm:$0xf] }
 0x313   :  { %v1703_v53 = vpop.f32.mrf.mxu0 }
 0x314   :  { %v6754_v55 = vadd.f32 %v1703_v53, %v6367_v38  ;;  %v1792_v23 = vpop.f32.mrf.mxu1  ;;  %v5367_v38 = vld [vmem:[%s7934_s3 + $0x154] sm:$0xf0] }
 0x315   :  { %v6759_v43 = vadd.f32 %v1792_v23, %v6369_v30  ;;  %v5366_v30 = vld [vmem:[%s7934_s3 + $0x154] sm:$0xf]  ;;  %v4795_v53 = vor.u32 %v5367_v38, %v4794_v52  ;;  %v4787_v23 = vor.u32 %v5365_v1, %v4786_v37  ;;  %v4788_v52 = vld [vmem:[%s7934_s3 + $0x148] sm:$0xf0] }
 0x316   :  { %8023 = vst [vmem:[#allocation32_spill] sm:$0xff] %v6754_v55  ;;  %4575 = vmatmul.msk.bf16.gmra.mxu0 %vm275_vm0, %v1561_v62  ;;  %v4799_v13 = vor.u32 %v5366_v30, %v4796_v27  ;;  %v4791_v38 = vor.u32 %v5364_v18, %v4788_v52  ;;  %v6793_v30 = vpop.f32.mrf.mxu2  ;;  %v4778_v27 = vld [vmem:[%s7934_s3 + $0x130] sm:$0xf]  ;;  %v5362_v37 = vld [vmem:[%s7934_s3 + $0x134] sm:$0xf]  ;;  %v1493_v55 = vadd.f32 %v6731_v11, %v6391_v57 }
 0x317   :  { %8024 = vst [vmem:[#allocation33_spill] sm:$0xff] %v6759_v43  ;;  %4591 = vmatmul.msk.bf16.gmra.mxu1 %vm275_vm0, %v1561_v62  ;;  %2599 = vmatpush.bf16.msrb.mxu0 %v4795_v53  ;;  %v6795_v53 = vpop.f32.mrf.mxu3  ;;  %v4780_v18 = vld [vmem:[%s7934_s3 + $0x138] sm:$0xf0]  ;;  %v5340_v57 = vld [vmem:[%s7934_s3 + $0x84] sm:$0xf] }
 0x318   :  { %2648 = vmatpush.bf16.msrb.mxu1 %v4799_v13  ;;  %v5363_v13 = vld [vmem:[%s7934_s3 + $0x134] sm:$0xf0]  ;;  %v4783_v52 = vor.u32 %v5362_v37, %v4780_v18 }
 0x319   :  { %v4779_v1 = vor.u32 %v5363_v13, %v4778_v27  ;;  %v4770_v27 = vld [vmem:[%s7934_s3 + $0x120] sm:$0xf]  ;;  %v5361_v13 = vld [vmem:[%s7934_s3 + $0x124] sm:$0xf0] }
 0x31a   :  { %v4771_v37 = vor.u32 %v5361_v13, %v4770_v27 }
 0x31b   :  { %v6777_v45 = vpop.f32.mrf.mxu0  ;;  %2600 = vmatpush.bf16.msrb.mxu0 %v4787_v23  ;;  %v1490_v23 = vadd.f32 %v6715_v31, %v6378_v12  ;;  %v5360_v12 = vld [vmem:[%s7934_s3 + $0x124] sm:$0xf] }
 0x31c   :  { %8025 = vst [vmem:[#allocation44_spill] sm:$0xff] %v6777_v45  ;;  %v6779_v62 = vpop.f32.mrf.mxu1  ;;  %2649 = vmatpush.bf16.msrb.mxu1 %v4791_v38  ;;  %v1491_v38 = vadd.f32 %v6717_v2, %v6381_v14  ;;  %v4772_v14 = vld [vmem:[%s7934_s3 + $0x128] sm:$0xf0] }
 0x31d   :  { %8026 = vst [vmem:[#allocation45_spill] sm:$0xff] %v6779_v62 }
 0x31e   :  { %v6850_v27 = vpop.f32.mrf.mxu2 }
 0x31f   :  { %2601 = vmatpush.bf16.msrb.mxu0 %v4779_v1  ;;  %v4775_v1 = vor.u32 %v5360_v12, %v4772_v14  ;;  %v4764_v14 = vld [vmem:[%s7934_s3 + $0x118] sm:$0xf0] }
 0x320   :  { %2650 = vmatpush.bf16.msrb.mxu1 %v4783_v52  ;;  %v4620_v52 = vld [vmem:[%s7934_s3 + $0x98] sm:$0xf0] }
 0x323   :  { %v1708_v62 = vpop.f32.mrf.mxu0  ;;  %2602 = vmatpush.bf16.msrb.mxu0 %v4771_v37  ;;  %v5358_v37 = vld [vmem:[%s7934_s3 + $0x114] sm:$0xf] }
 0x324   :  { %v1869_v45 = vadd.f32 %v1708_v62, %v1490_v23  ;;  %v1797_v43 = vpop.f32.mrf.mxu1  ;;  %v6829_v62 = vld [vmem:[%s7933_s2] ss:$0 sm:$0xff]  ;;  %v4618_v23 = vld [vmem:[%s7934_s3 + $0x90] sm:$0xf]  ;;  %2651 = vmatpush.bf16.msrb.mxu1 %v4775_v1  ;;  %v1492_v1 = vadd.f32 %v6727_v46, %v6388_v60  ;;  %v5341_v60 = vld [vmem:[%s7934_s3 + $0x84] sm:$0xf0] }
 0x325   :  { %v1870_v31 = vadd.f32 %v1797_v43, %v1491_v38  ;;  %v5343_v43 = vld [vmem:[%s7934_s3 + $0x94] sm:$0xf0] }
 0x326   :  { %v1901_v2 = vmax.f32 %v6548_v4, %v1869_v45  ;;  %v5342_v4 = vld [vmem:[%s7934_s3 + $0x94] sm:$0xf]  ;;  %v4619_v45 = vor.u32 %v5343_v43, %v4618_v23  ;;  %v5359_v38 = vld [vmem:[%s7934_s3 + $0x114] sm:$0xf0]  ;;  %v1428_v23 = vpop.f32.mrf.mxu3  ;;  %v4767_v43 = vor.u32 %v5358_v37, %v4764_v14  ;;  %v5357_v37 = vld [vmem:[%s7934_s3 + $0x104] sm:$0xf0] }
 0x327   :  { %v1902_v18 = vmax.f32 %v6551_v50, %v1870_v31  ;;  %v4762_v50 = vld [vmem:[%s7934_s3 + $0x110] sm:$0xf]  ;;  %v4623_v12 = vor.u32 %v5342_v4, %v4620_v52  ;;  %v4756_v14 = vld [vmem:[%s7934_s3 + $0x108] sm:$0xf0] }
 0x328   :  { %v4763_v31 = vor.u32 %v5359_v38, %v4762_v50  ;;  %2210 = vmatpush.bf16.msra.mxu2 %v4619_v45  ;;  %2652 = vmatpush.bf16.msrb.mxu1 %v4767_v43  ;;  %v4610_v50 = vld [vmem:[%s7934_s3 + $0x80] sm:$0xf]  ;;  %v4612_v38 = vld [vmem:[%s7934_s3 + $0x88] sm:$0xf0] }
 0x329   :  { %v1933_v13 = vmax.f32 %v1901_v2, %v1902_v18  ;;  %2259 = vmatpush.bf16.msra.mxu3 %v4623_v12  ;;  %v4611_v45 = vor.u32 %v5341_v60, %v4610_v50 }
 0x32a   :  { %2603 = vmatpush.bf16.msrb.mxu0 %v4763_v31  ;;  %v4615_v31 = vor.u32 %v5340_v57, %v4612_v38 }
 0x32b   :  { %v1953_v2 = vadd.f32 %v6829_v62, %v1933_v13  ;;  %v1710_v18 = vpop.f32.mrf.mxu0  ;;  %v4754_v13 = vld [vmem:[%s7934_s3 + $0x100] sm:$0xf] }
 0x32c   :  { %v1871_v4 = vadd.f32 %v1710_v18, %v1492_v1  ;;  %v1799_v52 = vpop.f32.mrf.mxu1  ;;  %2211 = vmatpush.bf16.msra.mxu2 %v4611_v45  ;;  %v4755_v43 = vor.u32 %v5357_v37, %v4754_v13  ;;  %v1494_v18 = vadd.f32 %v6756_v26, %v6394_v9  ;;  %v1496_v9 = vadd.f32 %v6793_v30, %v6404_v33 }
 0x32d   :  { %v1969_v46 = vmax.f32 %v1953_v2, 0.0  ;;  %v1872_v11 = vadd.f32 %v1799_v52, %v1493_v55  ;;  %v5356_v55 = vld [vmem:[%s7934_s3 + $0x104] sm:$0xf]  ;;  %2260 = vmatpush.bf16.msra.mxu3 %v4615_v31  ;;  %v1341_v52 = vpop.f32.mrf.mxu2  ;;  %v1498_v33 = vadd.f32 %v6850_v27, %v6410_v56 }
 0x32e   :  { %v1903_v12 = vmax.f32 %v6556_v35, %v1871_v4  ;;  %v4759_v2 = vor.u32 %v5356_v55, %v4756_v14  ;;  %2604 = vmatpush.bf16.msrb.mxu0 %v4755_v43  ;;  %v1495_v4 = vadd.f32 %v6761_v3, %v6397_v8  ;;  %v1430_v57 = vpop.f32.mrf.mxu3  ;;  %v1497_v8 = vadd.f32 %v6795_v53, %v6407_v48 }
 0x32f   :  { %2009 = vst [vmem:[#allocation2] sm:$0xff] %v1969_v46  ;;  %v1904_v1 = vmax.f32 %v6559_v28, %v1872_v11  ;;  %v1499_v48 = vadd.f32 %v1428_v23, %v6413_v21  ;;  %v1501_v56 = vadd.f32 %v1430_v57, %v6423_v40 }
 0x330   :  { %2653 = vmatpush.bf16.msrb.mxu1 %v4759_v2 }
 0x331   :  { %v1934_v35 = vmax.f32 %v1903_v12, %v1904_v1 }
 0x333   :  { %v1954_v50 = vadd.f32 %v6829_v62, %v1934_v35  ;;  %v1713_v60 = vpop.f32.mrf.mxu0 }
 0x334   :  { %v1873_v46 = vadd.f32 %v1713_v60, %v1494_v18  ;;  %v1802_v28 = vpop.f32.mrf.mxu1 }
 0x335   :  { %v1970_v11 = vmax.f32 %v1954_v50, 0.0  ;;  %v1874_v45 = vadd.f32 %v1802_v28, %v1495_v4  ;;  %v1344_v55 = vpop.f32.mrf.mxu2 }
 0x336   :  { %v1905_v38 = vmax.f32 %v6568_v32, %v1873_v46  ;;  %v1433_v43 = vpop.f32.mrf.mxu3  ;;  %v1502_v57 = vadd.f32 %v1344_v55, %v6426_v22 }
 0x337   :  { %2010 = vst [vmem:[#allocation2 + $0x8] sm:$0xff] %v1970_v11  ;;  %v1906_v13 = vmax.f32 %v6571_v54, %v1874_v45  ;;  %v1500_v11 = vadd.f32 %v1341_v52, %v6420_v25 }
 0x339   :  { %v1935_v12 = vmax.f32 %v1905_v38, %v1906_v13 }
 0x33b   :  { %v1955_v3 = vadd.f32 %v6829_v62, %v1935_v12  ;;  %v1715_v26 = vpop.f32.mrf.mxu0 }
 0x33c   :  { %v1875_v31 = vadd.f32 %v1715_v26, %v1496_v9  ;;  %v1804_v37 = vpop.f32.mrf.mxu1 }
 0x33d   :  { %v1971_v14 = vmax.f32 %v1955_v3, 0.0  ;;  %v1876_v1 = vadd.f32 %v1804_v37, %v1497_v8  ;;  %v1346_v46 = vpop.f32.mrf.mxu2 }
 0x33e   :  { %v1907_v32 = vmax.f32 %v6576_v59, %v1875_v31  ;;  %v2048_v12 = vld [vmem:[#allocation2 + $0x1] ss:$2 sm:$0xff]  ;;  %v2088_v8 = vld [vmem:[#allocation2 + $0x2] ss:$2 sm:$0xff]  ;;  %v1504_v55 = vadd.f32 %v1346_v46, %v6436_v41 }
 0x33f   :  { %2012 = vst [vmem:[#allocation2 + $0x18] sm:$0xff] %v1971_v14  ;;  %v1908_v54 = vmax.f32 %v6579_v16, %v1876_v1  ;;  %v1435_v16 = vpop.f32.mrf.mxu3 }
 0x341   :  { %v1936_v2 = vmax.f32 %v1907_v32, %v1908_v54 }
 0x343   :  { %v1956_v30 = vadd.f32 %v6829_v62, %v1936_v2  ;;  %v1718_v53 = vpop.f32.mrf.mxu0 }
 0x344   :  { %v1877_v35 = vadd.f32 %v1718_v53, %v1498_v33  ;;  %v1807_v18 = vpop.f32.mrf.mxu1 }
 0x345   :  { %v1972_v4 = vmax.f32 %v1956_v30, 0.0  ;;  %v1878_v50 = vadd.f32 %v1807_v18, %v1499_v48  ;;  %v1349_v40 = vpop.f32.mrf.mxu2  ;;  %v1505_v48 = vadd.f32 %v1435_v16, %v6439_v58 }
 0x346   :  { %v1909_v60 = vmax.f32 %v6600_v39, %v1877_v35 }
 0x347   :  { %2013 = vst [vmem:[#allocation2 + $0x20] sm:$0xff] %v1972_v4  ;;  %v1910_v59 = vmax.f32 %v6603_v34, %v1878_v50  ;;  %v1438_v31 = vpop.f32.mrf.mxu3 }
 0x348   :  { %v1507_v41 = vadd.f32 %v1438_v31, %v6457_v44  ;;  %v5339_v44 = vld [vmem:[%s7934_s3 + $0x74] sm:$0xf0] }
 0x349   :  { %v1937_v28 = vmax.f32 %v1909_v60, %v1910_v59  ;;  %v1506_v59 = vadd.f32 %v1349_v40, %v6454_v29  ;;  %v4730_v29 = vld [vmem:[%s7934_s3 + $0x70] sm:$0xf] }
 0x34b   :  { %v1957_v21 = vadd.f32 %v6829_v62, %v1937_v28  ;;  %v1720_v27 = vpop.f32.mrf.mxu0 }
 0x34c   :  { %v1879_v23 = vadd.f32 %v1720_v27, %v1500_v11  ;;  %v1809_v45 = vpop.f32.mrf.mxu1 }
 0x34d   :  { %v1973_v38 = vmax.f32 %v1957_v21, 0.0  ;;  %v1880_v13 = vadd.f32 %v1809_v45, %v1501_v56  ;;  %v1351_v30 = vpop.f32.mrf.mxu2  ;;  %v5338_v45 = vld [vmem:[%s7934_s3 + $0x74] sm:$0xf] }
 0x34e   :  { %v1911_v39 = vmax.f32 %v6608_v24, %v1879_v23  ;;  %v2050_v9 = vld [vmem:[#allocation2 + $0x19] ss:$2 sm:$0xff]  ;;  %v2090_v3 = vld [vmem:[#allocation2 + $0x1a] ss:$2 sm:$0xff]  ;;  %v1503_v24 = vadd.f32 %v1433_v43, %v6429_v63 }
 0x34f   :  { %2015 = vst [vmem:[#allocation2 + $0x30] sm:$0xff] %v1973_v38  ;;  %v1912_v34 = vmax.f32 %v6611_v20, %v1880_v13  ;;  %v6914_v26 = vpack.c.bf16 %v2050_v9, %v2048_v12  ;;  %v6916_v25 = vpack.c.bf16 %v2090_v3, %v2088_v8  ;;  %v1440_v53 = vpop.f32.mrf.mxu3  ;;  %v1508_v12 = vadd.f32 %v1351_v30, %v6464_v51 }
 0x350   :  { %v1509_v9 = vadd.f32 %v1440_v53, %v6467_v42 }
 0x351   :  { %v1938_v52 = vmax.f32 %v1911_v39, %v1912_v34  ;;  %2212 = vmatmul.bf16.vlgmr.msra.gmra.mxu2 %v6914_v26  ;;  %2261 = vmatmul.bf16.vlgmr.msra.gmra.mxu3 %v6914_v26  ;;  %v1477_v39 = vadd.f32 %v6289_v36, %v6279_v7 }
 0x352   :  { %2605 = vmatmul.bf16.vlgmr.msrb.gmra.mxu0 %v6916_v25  ;;  %2654 = vmatmul.bf16.vlgmr.msrb.gmra.mxu1 %v6916_v25 }
 0x353   :  { %v1958_v20 = vadd.f32 %v6829_v62, %v1938_v52  ;;  %v1723_v37 = vpop.f32.mrf.mxu0 }
 0x354   :  { %v1881_v14 = vadd.f32 %v1723_v37, %v1502_v57  ;;  %v1812_v1 = vpop.f32.mrf.mxu1  ;;  %v1856_v57 = vadd.f32 %v6673_v49, %v1477_v39  ;;  %v8027_v49 = vld [vmem:[#allocation10_spill] sm:$0xff] }
 0x355   :  { %v1974_v32 = vmax.f32 %v1958_v20, 0.0  ;;  %v1882_v54 = vadd.f32 %v1812_v1, %v1503_v24  ;;  %v1354_v11 = vpop.f32.mrf.mxu2 }
 0x356   :  { %v1913_v2 = vmax.f32 %v6620_v6, %v1881_v14 }
 0x357   :  { %2016 = vst [vmem:[#allocation2 + $0x38] sm:$0xff] %v1974_v32  ;;  %v1914_v33 = vmax.f32 %v6623_v15, %v1882_v54  ;;  %v1443_v27 = vpop.f32.mrf.mxu3  ;;  %v1510_v32 = vadd.f32 %v1354_v11, %v8027_v49  ;;  %v8028_v54 = vld [vmem:[#allocation11_spill] sm:$0xff]  ;;  %v8033_v11 = vld [vmem:[#allocation12_spill] sm:$0xff] }
 0x359   :  { %v1939_v22 = vmax.f32 %v1913_v2, %v1914_v33  ;;  %v1511_v2 = vadd.f32 %v1443_v27, %v8028_v54  ;;  %v8034_v27 = vld [vmem:[#allocation35_spill] sm:$0xff] }
 0x35b   :  { %v1959_v63 = vadd.f32 %v6829_v62, %v1939_v22  ;;  %v1725_v43 = vpop.f32.mrf.mxu0 }
 0x35c   :  { %v1883_v35 = vadd.f32 %v1725_v43, %v1504_v55  ;;  %v1814_v18 = vpop.f32.mrf.mxu1  ;;  %v8029_v43 = vld [vmem:[#allocation22_spill] sm:$0xff] }
 0x35d   :  { %v1975_v4 = vmax.f32 %v1959_v63, 0.0  ;;  %v1884_v50 = vadd.f32 %v1814_v18, %v1505_v48  ;;  %v1356_v7 = vpop.f32.mrf.mxu2 }
 0x35e   :  { %v1915_v60 = vmax.f32 %v6628_v61, %v1883_v35  ;;  %v2092_v20 = vld [vmem:[#allocation2 + $0x32] ss:$2 sm:$0xff]  ;;  %v8030_v35 = vld [vmem:[#allocation23_spill] sm:$0xff] }
 0x35f   :  { %2018 = vst [vmem:[#allocation2 + $0x48] sm:$0xff] %v1975_v4  ;;  %v1916_v6 = vmax.f32 %v6631_v0, %v1884_v50  ;;  %v4731_v0 = vor.u32 %v5339_v44, %v4730_v29  ;;  %v1445_v1 = vpop.f32.mrf.mxu3  ;;  %v4722_v4 = vld [vmem:[%s7934_s3 + $0x60] sm:$0xf]  ;;  %v5337_v50 = vld [vmem:[%s7934_s3 + $0x64] sm:$0xf0]  ;;  %v8036_v29 = vld [vmem:[#allocation13_spill] sm:$0xff] }
 0x360   :  { %v1513_v44 = vadd.f32 %v1445_v1, %v8036_v29 }
 0x361   :  { %v1940_v15 = vmax.f32 %v1915_v60, %v1916_v6  ;;  %2382 = vmatpush.bf16.msrb.mxu2 %v4731_v0  ;;  %v4723_v60 = vor.u32 %v5337_v50, %v4722_v4  ;;  %v5336_v6 = vld [vmem:[%s7934_s3 + $0x64] sm:$0xf]  ;;  %v8046_v50 = vld [vmem:[#allocation39_spill] sm:$0xff] }
 0x363   :  { %v1960_v58 = vadd.f32 %v6829_v62, %v1940_v15  ;;  %v1728_v46 = vpop.f32.mrf.mxu0  ;;  %v4724_v15 = vld [vmem:[%s7934_s3 + $0x68] sm:$0xf0] }
 0x364   :  { %v1885_v16 = vadd.f32 %v1728_v46, %v1506_v59  ;;  %v1817_v28 = vpop.f32.mrf.mxu1  ;;  %v8031_v46 = vld [vmem:[#allocation34_spill] sm:$0xff] }
 0x365   :  { %v1976_v56 = vmax.f32 %v1960_v58, 0.0  ;;  %v1886_v21 = vadd.f32 %v1817_v28, %v1507_v41  ;;  %v1359_v59 = vpop.f32.mrf.mxu2  ;;  %v4727_v58 = vor.u32 %v5336_v6, %v4724_v15  ;;  %2383 = vmatpush.bf16.msrb.mxu2 %v4723_v60  ;;  %v8047_v60 = vld [vmem:[#allocation41_spill] sm:$0xff] }
 0x366   :  { %v1917_v23 = vmax.f32 %v6652_v19, %v1885_v16  ;;  %v4732_v19 = vld [vmem:[%s7934_s3 + $0x78] sm:$0xf0]  ;;  %v8032_v16 = vld [vmem:[#allocation36_spill] sm:$0xff]  ;;  %v1485_v6 = vadd.f32 %v8047_v60, %v8046_v50 }
 0x367   :  { %2019 = vst [vmem:[#allocation2 + $0x50] sm:$0xff] %v1976_v56  ;;  %v1918_v61 = vmax.f32 %v6655_v5, %v1886_v21  ;;  %v4735_v13 = vor.u32 %v5338_v45, %v4732_v19  ;;  %v1476_v5 = vadd.f32 %v6287_v17, %v6276_v47  ;;  %v2052_v17 = vld [vmem:[#allocation2 + $0x31] ss:$2 sm:$0xff]  ;;  %v1480_v28 = vadd.f32 %v8032_v16, %v8031_v46  ;;  %v1448_v21 = vpop.f32.mrf.mxu3  ;;  %v8037_v19 = vld [vmem:[#allocation26_spill] sm:$0xff] }
 0x368   :  { %v1512_v56 = vadd.f32 %v1356_v7, %v8033_v11  ;;  %v8048_v15 = vld [vmem:[#allocation17_spill] sm:$0xff]  ;;  %v8049_v46 = vld [vmem:[#allocation30_spill] sm:$0xff] }
 0x369   :  { %v1941_v38 = vmax.f32 %v1917_v23, %v1918_v61  ;;  %2431 = vmatpush.bf16.msrb.mxu3 %v4735_v13  ;;  %v1855_v34 = vadd.f32 %v6671_v10, %v1476_v5  ;;  %v8035_v23 = vld [vmem:[#allocation37_spill] sm:$0xff] }
 0x36a   :  { %v1481_v61 = vadd.f32 %v8035_v23, %v8034_v27 }
 0x36b   :  { %v1961_v8 = vadd.f32 %v6829_v62, %v1941_v38  ;;  %v1730_v3 = vpop.f32.mrf.mxu0  ;;  %v1859_v38 = vadd.f32 %v8037_v19, %v1480_v28 }
 0x36c   :  { %v1887_v40 = vadd.f32 %v1730_v3, %v1508_v12  ;;  %v1819_v52 = vpop.f32.mrf.mxu1  ;;  %v8038_v12 = vld [vmem:[#allocation27_spill] sm:$0xff] }
 0x36d   :  { %v1977_v31 = vmax.f32 %v1961_v8, 0.0  ;;  %v1888_v47 = vadd.f32 %v1819_v52, %v1509_v9  ;;  %2432 = vmatpush.bf16.msrb.mxu3 %v4727_v58  ;;  %v1860_v39 = vadd.f32 %v8038_v12, %v1481_v61  ;;  %v8039_v52 = vld [vmem:[#allocation14_spill] sm:$0xff] }
 0x36e   :  { %v1919_v51 = vmax.f32 %v1855_v34, %v1887_v40  ;;  %v2054_v24 = vld [vmem:[#allocation2 + $0x49] ss:$2 sm:$0xff]  ;;  %v2094_v37 = vld [vmem:[#allocation2 + $0x4a] ss:$2 sm:$0xff] }
 0x36f   :  { %2021 = vst [vmem:[#allocation2 + $0x60] sm:$0xff] %v1977_v31  ;;  %v1920_v36 = vmax.f32 %v1856_v57, %v1888_v47  ;;  %v6958_v42 = vpack.c.bf16 %v2054_v24, %v2052_v17  ;;  %v6960_v14 = vpack.c.bf16 %v2094_v37, %v2092_v20  ;;  %v1514_v57 = vadd.f32 %v1359_v59, %v8039_v52  ;;  %v8040_v31 = vld [vmem:[#allocation15_spill] sm:$0xff]  ;;  %v1361_v17 = vpop.f32.mrf.mxu2  ;;  %v1450_v20 = vpop.f32.mrf.mxu3 }
 0x370   :  { %v1515_v47 = vadd.f32 %v1448_v21, %v8040_v31  ;;  %v1517_v59 = vadd.f32 %v1450_v20, %v8048_v15  ;;  %v8050_v21 = vld [vmem:[#allocation31_spill] sm:$0xff] }
 0x371   :  { %v1942_v10 = vmax.f32 %v1919_v51, %v1920_v36  ;;  %2217 = vmatmul.bf16.gmra.mxu2 %v6958_v42  ;;  %2266 = vmatmul.bf16.gmra.mxu3 %v6958_v42  ;;  %v1864_v27 = vadd.f32 %v8050_v21, %v1485_v6  ;;  %v8052_v31 = vld [vmem:[#allocation19_spill] sm:$0xff]  ;;  %v8061_v6 = vld [vmem:[#allocation44_spill] sm:$0xff] }
 0x372   :  { %2610 = vmatmul.bf16.gmra.mxu0 %v6960_v14  ;;  %2659 = vmatmul.bf16.gmra.mxu1 %v6960_v14 }
 0x373   :  { %v1962_v33 = vadd.f32 %v6829_v62, %v1942_v10  ;;  %v1733_v22 = vpop.f32.mrf.mxu0  ;;  %v8041_v10 = vld [vmem:[#allocation28_spill] sm:$0xff] }
 0x374   :  { %v1889_v55 = vadd.f32 %v1733_v22, %v1510_v32  ;;  %v1822_v48 = vpop.f32.mrf.mxu1  ;;  %v8042_v32 = vld [vmem:[#allocation29_spill] sm:$0xff] }
 0x375   :  { %v1978_v30 = vmax.f32 %v1962_v33, 0.0  ;;  %v1890_v63 = vadd.f32 %v1822_v48, %v1511_v2  ;;  %v4714_v2 = vld [vmem:[%s7934_s3 + $0x50] sm:$0xf]  ;;  %v5335_v33 = vld [vmem:[%s7934_s3 + $0x54] sm:$0xf0] }
 0x376   :  { %v1921_v53 = vmax.f32 %v8029_v43, %v1889_v55  ;;  %v4715_v22 = vor.u32 %v5335_v33, %v4714_v2  ;;  %v5334_v55 = vld [vmem:[%s7934_s3 + $0x54] sm:$0xf]  ;;  %v4716_v48 = vld [vmem:[%s7934_s3 + $0x58] sm:$0xf0]  ;;  %v8043_v43 = vld [vmem:[#allocation38_spill] sm:$0xff] }
 0x377   :  { %2022 = vst [vmem:[#allocation2 + $0x68] sm:$0xff] %v1978_v30  ;;  %v1922_v18 = vmax.f32 %v8030_v35, %v1890_v63  ;;  %v4719_v63 = vor.u32 %v5334_v55, %v4716_v48  ;;  %v8056_v55 = vld [vmem:[#allocation24_spill] sm:$0xff] }
 0x378   :  { %2384 = vmatpush.bf16.msrb.mxu2 %v4715_v22  ;;  %v8055_v22 = vld [vmem:[#allocation42_spill] sm:$0xff] }
 0x379   :  { %v1943_v41 = vmax.f32 %v1921_v53, %v1922_v18  ;;  %v8044_v53 = vld [vmem:[#allocation40_spill] sm:$0xff]  ;;  %2433 = vmatpush.bf16.msrb.mxu3 %v4719_v63  ;;  %v1488_v48 = vadd.f32 %v8056_v55, %v8055_v22  ;;  %v5401_v22 = vld [vmem:[%s7934_s3 + $0x264] sm:$0xf0]  ;;  %v5400_v55 = vld [vmem:[%s7934_s3 + $0x264] sm:$0xf] }
 0x37a   :  { %v1484_v35 = vadd.f32 %v8044_v53, %v8043_v43  ;;  %v8045_v18 = vld [vmem:[#allocation16_spill] sm:$0xff]  ;;  %v8058_v43 = vld [vmem:[#allocation43_spill] sm:$0xff]  ;;  %v8059_v53 = vld [vmem:[#allocation25_spill] sm:$0xff] }
 0x37b   :  { %v1963_v0 = vadd.f32 %v6829_v62, %v1943_v41  ;;  %v1735_v45 = vpop.f32.mrf.mxu0  ;;  %v1516_v4 = vadd.f32 %v1361_v17, %v8045_v18  ;;  %v8060_v18 = vld [vmem:[#allocation21_spill] sm:$0xff]  ;;  %v1867_v15 = vadd.f32 %v8061_v6, %v1488_v48  ;;  %v4964_v48 = vld [vmem:[%s7934_s3 + $0x268] sm:$0xf0]  ;;  %v5397_v6 = vld [vmem:[%s7934_s3 + $0x244] sm:$0xf0] }
 0x37c   :  { %v1891_v13 = vadd.f32 %v1735_v45, %v1512_v56  ;;  %v1824_v5 = vpop.f32.mrf.mxu1  ;;  %v1863_v16 = vadd.f32 %v8049_v46, %v1484_v35  ;;  %v1364_v56 = vpop.f32.mrf.mxu2  ;;  %v1489_v35 = vadd.f32 %v8059_v53, %v8058_v43  ;;  %v5399_v43 = vld [vmem:[%s7934_s3 + $0x254] sm:$0xf0]  ;;  %v4967_v53 = vor.u32 %v5400_v55, %v4964_v48 }
 0x37d   :  { %v1979_v9 = vmax.f32 %v1963_v0, 0.0  ;;  %v1892_v8 = vadd.f32 %v1824_v5, %v1513_v44  ;;  %v1453_v44 = vpop.f32.mrf.mxu3 }
 0x37e   :  { %v1923_v3 = vmax.f32 %v1859_v38, %v1891_v13  ;;  %v2056_v29 = vld [vmem:[#allocation2 + $0x61] ss:$2 sm:$0xff]  ;;  %v2096_v19 = vld [vmem:[#allocation2 + $0x62] ss:$2 sm:$0xff] }
 0x37f   :  { %2024 = vst [vmem:[#allocation2 + $0x78] sm:$0xff] %v1979_v9  ;;  %v1924_v34 = vmax.f32 %v1860_v39, %v1892_v8  ;;  %v4706_v9 = vld [vmem:[%s7934_s3 + $0x40] sm:$0xf]  ;;  %v5333_v8 = vld [vmem:[%s7934_s3 + $0x44] sm:$0xf0] }
 0x380   :  { %v4707_v52 = vor.u32 %v5333_v8, %v4706_v9 }
 0x381   :  { %v1944_v40 = vmax.f32 %v1923_v3, %v1924_v34  ;;  %v5332_v3 = vld [vmem:[%s7934_s3 + $0x44] sm:$0xf] }
 0x382   :  { %v8051_v34 = vld [vmem:[#allocation18_spill] sm:$0xff]  ;;  %2385 = vmatpush.bf16.msrb.mxu2 %v4707_v52 }
 0x383   :  { %v1964_v51 = vadd.f32 %v6829_v62, %v1944_v40  ;;  %v1738_v24 = vpop.f32.mrf.mxu0  ;;  %v1518_v40 = vadd.f32 %v1364_v56, %v8051_v34  ;;  %v5329_v34 = vld [vmem:[%s7934_s3 + $0x24] sm:$0xf0] }
 0x384   :  { %v1893_v37 = vadd.f32 %v1738_v24, %v1514_v57  ;;  %v1827_v7 = vpop.f32.mrf.mxu1  ;;  %v4708_v57 = vld [vmem:[%s7934_s3 + $0x48] sm:$0xf0] }
 0x385   :  { %v1980_v36 = vmax.f32 %v1964_v51, 0.0  ;;  %v1894_v1 = vadd.f32 %v1827_v7, %v1515_v47  ;;  %v1519_v47 = vadd.f32 %v1453_v44, %v8052_v31  ;;  %v4711_v24 = vor.u32 %v5332_v3, %v4708_v57  ;;  %v1455_v2 = vpop.f32.mrf.mxu3  ;;  %v4700_v44 = vld [vmem:[%s7934_s3 + $0x38] sm:$0xf0]  ;;  %v4692_v57 = vld [vmem:[%s7934_s3 + $0x28] sm:$0xf0] }
 0x386   :  { %v1925_v49 = vmax.f32 %v8041_v10, %v1893_v37 }
 0x387   :  { %2025 = vst [vmem:[#allocation2 + $0x80] sm:$0xff] %v1980_v36  ;;  %v1926_v54 = vmax.f32 %v8042_v32, %v1894_v1  ;;  %2434 = vmatpush.bf16.msrb.mxu3 %v4711_v24  ;;  %v8053_v1 = vld [vmem:[#allocation32_spill] sm:$0xff]  ;;  %v8054_v32 = vld [vmem:[#allocation33_spill] sm:$0xff] }
 0x388   :  { %v4970_v24 = vld [vmem:[%s7934_s3 + $0x270] sm:$0xf] }
 0x389   :  { %v1945_v30 = vmax.f32 %v1925_v49, %v1926_v54  ;;  %v1366_v49 = vpop.f32.mrf.mxu2 }
 0x38b   :  { %v1965_v41 = vadd.f32 %v6829_v62, %v1945_v30  ;;  %v1740_v58 = vpop.f32.mrf.mxu0  ;;  %v8057_v30 = vld [vmem:[#allocation20_spill] sm:$0xff] }
 0x38c   :  { %v1895_v28 = vadd.f32 %v1740_v58, %v1516_v4  ;;  %v1829_v11 = vpop.f32.mrf.mxu1  ;;  %v1520_v63 = vadd.f32 %v1366_v49, %v8057_v30  ;;  %v1521_v4 = vadd.f32 %v1455_v2, %v8060_v18  ;;  %v8062_v58 = vld [vmem:[#allocation45_spill] sm:$0xff] }
 0x38d   :  { %v1981_v23 = vmax.f32 %v1965_v41, 0.0  ;;  %v1896_v61 = vadd.f32 %v1829_v11, %v1517_v59  ;;  %v1868_v46 = vadd.f32 %v8062_v58, %v1489_v35  ;;  %v5398_v35 = vld [vmem:[%s7934_s3 + $0x254] sm:$0xf]  ;;  %v4956_v18 = vld [vmem:[%s7934_s3 + $0x258] sm:$0xf0] }
 0x38e   :  { %v1927_v0 = vmax.f32 %v1863_v16, %v1895_v28  ;;  %v2058_v45 = vld [vmem:[#allocation2 + $0x79] ss:$2 sm:$0xff]  ;;  %v2098_v38 = vld [vmem:[#allocation2 + $0x7a] ss:$2 sm:$0xff]  ;;  %v4948_v58 = vld [vmem:[%s7934_s3 + $0x248] sm:$0xf0] }
 0x38f   :  { %2027 = vst [vmem:[#allocation2 + $0x90] sm:$0xff] %v1981_v23  ;;  %v1928_v13 = vmax.f32 %v1864_v27, %v1896_v61  ;;  %v7018_v5 = vpack.c.bf16 %v2058_v45, %v2056_v29  ;;  %v7020_v12 = vpack.c.bf16 %v2098_v38, %v2096_v19  ;;  %v4698_v27 = vld [vmem:[%s7934_s3 + $0x30] sm:$0xf]  ;;  %v5331_v23 = vld [vmem:[%s7934_s3 + $0x34] sm:$0xf0] }
 0x390   :  { %v5330_v61 = vld [vmem:[%s7934_s3 + $0x34] sm:$0xf]  ;;  %v4699_v29 = vor.u32 %v5331_v23, %v4698_v27  ;;  %v4674_v27 = vld [vmem:[%s7934_s3] sm:$0xf]  ;;  %v5325_v23 = vld [vmem:[%s7934_s3 + $0x4] sm:$0xf0] }
 0x391   :  { %v1946_v39 = vmax.f32 %v1927_v0, %v1928_v13  ;;  %2222 = vmatmul.bf16.gmra.mxu2 %v7018_v5  ;;  %2271 = vmatmul.bf16.gmra.mxu3 %v7018_v5  ;;  %v4703_v45 = vor.u32 %v5330_v61, %v4700_v44  ;;  %v5324_v61 = vld [vmem:[%s7934_s3 + $0x4] sm:$0xf]  ;;  %v4675_v44 = vor.u32 %v5325_v23, %v4674_v27 }
 0x392   :  { %2615 = vmatmul.bf16.gmra.mxu0 %v7020_v12  ;;  %2664 = vmatmul.bf16.gmra.mxu1 %v7020_v12 }
 0x393   :  { %v1966_v17 = vadd.f32 %v6829_v62, %v1946_v39  ;;  %v1743_v51 = vpop.f32.mrf.mxu0  ;;  %2386 = vmatpush.bf16.msrb.mxu2 %v4699_v29  ;;  %2435 = vmatpush.bf16.msrb.mxu3 %v4703_v45 }
 0x394   :  { %v1897_v20 = vadd.f32 %v1743_v51, %v1518_v40  ;;  %v1832_v37 = vpop.f32.mrf.mxu1  ;;  %v5328_v40 = vld [vmem:[%s7934_s3 + $0x24] sm:$0xf] }
 0x395   :  { %v1982_v7 = vmax.f32 %v1966_v17, 0.0  ;;  %v1898_v36 = vadd.f32 %v1832_v37, %v1519_v47  ;;  %v4695_v31 = vor.u32 %v5328_v40, %v4692_v57  ;;  %v2483_v47 = vld [vmem:[#allocation2 + $0x1b] ss:$2 sm:$0xff]  ;;  %v5402_v37 = vld [vmem:[%s7934_s3 + $0x274] sm:$0xf] }
 0x396   :  { %v1929_v10 = vmax.f32 %v8053_v1, %v1897_v20  ;;  %v2481_v17 = vld [vmem:[#allocation2 + $0x3] ss:$2 sm:$0xff]  ;;  %v5403_v20 = vld [vmem:[%s7934_s3 + $0x274] sm:$0xf0]  ;;  %v5326_v1 = vld [vmem:[%s7934_s3 + $0x14] sm:$0xf] }
 0x397   :  { %2028 = vst [vmem:[#allocation2 + $0x98] sm:$0xff] %v1982_v7  ;;  %v1930_v54 = vmax.f32 %v8054_v32, %v1898_v36  ;;  %2436 = vmatpush.bf16.msrb.mxu3 %v4695_v31  ;;  %v7085_v51 = vpack.c.bf16 %v2483_v47, %v2481_v17  ;;  %v4682_v7 = vld [vmem:[%s7934_s3 + $0x10] sm:$0xf]  ;;  %v5327_v36 = vld [vmem:[%s7934_s3 + $0x14] sm:$0xf0] }
 0x398   :  { %v4683_v49 = vor.u32 %v5327_v36, %v4682_v7  ;;  %v4972_v32 = vld [vmem:[%s7934_s3 + $0x278] sm:$0xf0]  ;;  %v4922_v40 = vld [vmem:[%s7934_s3 + $0x210] sm:$0xf]  ;;  %v5390_v31 = vld [vmem:[%s7934_s3 + $0x214] sm:$0xf] }
 0x399   :  { %v1947_v33 = vmax.f32 %v1929_v10, %v1930_v54  ;;  %v4971_v10 = vor.u32 %v5403_v20, %v4970_v24  ;;  %v4962_v54 = vld [vmem:[%s7934_s3 + $0x260] sm:$0xf]  ;;  %v4924_v47 = vld [vmem:[%s7934_s3 + $0x218] sm:$0xf0]  ;;  %v5389_v20 = vld [vmem:[%s7934_s3 + $0x204] sm:$0xf0] }
 0x39a   :  { %v4963_v30 = vor.u32 %v5401_v22, %v4962_v54  ;;  %v4927_v17 = vor.u32 %v5390_v31, %v4924_v47  ;;  %v4914_v24 = vld [vmem:[%s7934_s3 + $0x200] sm:$0xf]  ;;  %v5387_v54 = vld [vmem:[%s7934_s3 + $0x1f4] sm:$0xf0] }
 0x39b   :  { %v1967_v50 = vadd.f32 %v6829_v62, %v1947_v33  ;;  %v1745_v60 = vpop.f32.mrf.mxu0  ;;  %3091 = vmatpush.bf16.msra.mxu0 %v4971_v10  ;;  %v4975_v33 = vor.u32 %v5402_v37, %v4972_v32  ;;  %v5388_v37 = vld [vmem:[%s7934_s3 + $0x204] sm:$0xf]  ;;  %v4915_v36 = vor.u32 %v5389_v20, %v4914_v24  ;;  %v4890_v32 = vld [vmem:[%s7934_s3 + $0x1f0] sm:$0xf] }
 0x39c   :  { %v1899_v59 = vadd.f32 %v1745_v60, %v1520_v63  ;;  %v1834_v41 = vpop.f32.mrf.mxu1  ;;  %v4954_v63 = vld [vmem:[%s7934_s3 + $0x250] sm:$0xf]  ;;  %v4946_v60 = vld [vmem:[%s7934_s3 + $0x240] sm:$0xf] }
 0x39d   :  { %v1983_v16 = vmax.f32 %v1967_v50, 0.0  ;;  %v1900_v28 = vadd.f32 %v1834_v41, %v1521_v4  ;;  %3140 = vmatpush.bf16.msra.mxu1 %v4975_v33  ;;  %v4955_v4 = vor.u32 %v5399_v43, %v4954_v63  ;;  %v4959_v50 = vor.u32 %v5398_v35, %v4956_v18  ;;  %v2491_v7 = vld [vmem:[#allocation2 + $0x7b] ss:$2 sm:$0xff]  ;;  %v2042_v47 = vld [vmem:[#allocation2 + $0x78] ss:$2 sm:$0xff] }
 0x39e   :  { %v1931_v11 = vmax.f32 %v1867_v15, %v1899_v59  ;;  %v2060_v38 = vld [vmem:[#allocation2 + $0x91] ss:$2 sm:$0xff]  ;;  %v2100_v39 = vld [vmem:[#allocation2 + $0x92] ss:$2 sm:$0xff]  ;;  %v5396_v15 = vld [vmem:[%s7934_s3 + $0x244] sm:$0xf]  ;;  %v4947_v41 = vor.u32 %v5397_v6, %v4946_v60  ;;  %v4891_v33 = vor.u32 %v5387_v54, %v4890_v32 }
 0x39f   :  { %2030 = vst [vmem:[#allocation2 + $0xa8] sm:$0xff] %v1983_v16  ;;  %v1932_v56 = vmax.f32 %v1868_v46, %v1900_v28  ;;  %3092 = vmatpush.bf16.msra.mxu0 %v4963_v30  ;;  %v2487_v59 = vld [vmem:[#allocation2 + $0x4b] ss:$2 sm:$0xff]  ;;  %v4951_v16 = vor.u32 %v5396_v15, %v4948_v58  ;;  %v4882_v63 = vld [vmem:[%s7934_s3 + $0x1e0] sm:$0xf] }
 0x3a0   :  { %v2485_v46 = vld [vmem:[#allocation2 + $0x33] ss:$2 sm:$0xff]  ;;  %v2489_v10 = vld [vmem:[#allocation2 + $0x63] ss:$2 sm:$0xff]  ;;  %v2032_v15 = vld [vmem:[#allocation2] ss:$2 sm:$0xff] }
 0x3a1   :  { %v1948_v21 = vmax.f32 %v1931_v11, %v1932_v56  ;;  %3141 = vmatpush.bf16.msra.mxu1 %v4967_v53  ;;  %v7151_v28 = vpack.c.bf16 %v2487_v59, %v2485_v46  ;;  %v4938_v11 = vld [vmem:[%s7934_s3 + $0x230] sm:$0xf]  ;;  %v5395_v56 = vld [vmem:[%s7934_s3 + $0x234] sm:$0xf0]  ;;  %v5385_v43 = vld [vmem:[%s7934_s3 + $0x1e4] sm:$0xf0] }
 0x3a2   :  { %v4939_v29 = vor.u32 %v5395_v56, %v4938_v11  ;;  %v2493_v48 = vld [vmem:[#allocation2 + $0x93] ss:$2 sm:$0xff]  ;;  %v5384_v53 = vld [vmem:[%s7934_s3 + $0x1e4] sm:$0xf]  ;;  %v4883_v35 = vor.u32 %v5385_v43, %v4882_v63  ;;  %v2044_v63 = vld [vmem:[#allocation2 + $0x90] ss:$2 sm:$0xff] }
 0x3a3   :  { %v1968_v0 = vadd.f32 %v6829_v62, %v1948_v21  ;;  %v4690_v62 = vld [vmem:[%s7934_s3 + $0x20] sm:$0xf]  ;;  %3093 = vmatpush.bf16.msra.mxu0 %v4955_v4  ;;  %v5394_v21 = vld [vmem:[%s7934_s3 + $0x234] sm:$0xf]  ;;  %v4874_v46 = vld [vmem:[%s7934_s3 + $0x1d0] sm:$0xf] }
 0x3a4   :  { %v4691_v52 = vor.u32 %v5329_v34, %v4690_v62  ;;  %v4932_v62 = vld [vmem:[%s7934_s3 + $0x228] sm:$0xf0]  ;;  %v2034_v4 = vld [vmem:[#allocation2 + $0x18] ss:$2 sm:$0xff]  ;;  %v5382_v11 = vld [vmem:[%s7934_s3 + $0x1d4] sm:$0xf] }
 0x3a5   :  { %v1984_v19 = vmax.f32 %v1968_v0, 0.0  ;;  %3142 = vmatpush.bf16.msra.mxu1 %v4959_v50  ;;  %v4940_v0 = vld [vmem:[%s7934_s3 + $0x238] sm:$0xf0]  ;;  %v2063_v59 = vpack.c.bf16 %v2034_v4, %v2032_v15  ;;  %v2040_v24 = vld [vmem:[#allocation2 + $0x60] ss:$2 sm:$0xff] }
 0x3a6   :  { %2387 = vmatpush.bf16.msrb.mxu2 %v4691_v52  ;;  %v5391_v52 = vld [vmem:[%s7934_s3 + $0x214] sm:$0xf0]  ;;  %v2730_v50 = vld [vmem:[#allocation2 + $0x1c] ss:$2 sm:$0xff]  ;;  %v2065_v20 = vpack.c.bf16 %v2042_v47, %v2040_v24 }
 0x3a7   :  { %2031 = vst [vmem:[#allocation2 + $0xb0] sm:$0xff] %v1984_v19  ;;  %3094 = vmatpush.bf16.msra.mxu0 %v4947_v41  ;;  %v4943_v19 = vor.u32 %v5394_v21, %v4940_v0  ;;  %v4923_v57 = vor.u32 %v5391_v52, %v4922_v40  ;;  %v2728_v41 = vld [vmem:[#allocation2 + $0x4] ss:$2 sm:$0xff]  ;;  %v4876_v21 = vld [vmem:[%s7934_s3 + $0x1d8] sm:$0xf0] }
 0x3a8   :  { %v7257_v58 = vpack.c.bf16 %v2730_v50, %v2728_v41  ;;  %v4879_v27 = vor.u32 %v5382_v11, %v4876_v21  ;;  %v4868_v40 = vld [vmem:[%s7934_s3 + $0x1c8] sm:$0xf0]  ;;  %v4850_v4 = vld [vmem:[%s7934_s3 + $0x1a0] sm:$0xf]  ;;  %v5377_v50 = vld [vmem:[%s7934_s3 + $0x1a4] sm:$0xf0] }
 0x3a9   :  { %3143 = vmatpush.bf16.msra.mxu1 %v4951_v16  ;;  %v5383_v16 = vld [vmem:[%s7934_s3 + $0x1d4] sm:$0xf0]  ;;  %v5376_v15 = vld [vmem:[%s7934_s3 + $0x1a4] sm:$0xf]  ;;  %v4852_v41 = vld [vmem:[%s7934_s3 + $0x1a8] sm:$0xf0] }
 0x3aa   :  { %2388 = vmatpush.bf16.msrb.mxu2 %v4683_v49  ;;  %v4875_v56 = vor.u32 %v5383_v16, %v4874_v46  ;;  %v4855_v46 = vor.u32 %v5376_v15, %v4852_v41  ;;  %v2985_v41 = vld [vmem:[#allocation2 + $0x7d] ss:$2 sm:$0xff] }
 0x3ab   :  { %3095 = vmatpush.bf16.msra.mxu0 %v4939_v29  ;;  %v2038_v29 = vld [vmem:[#allocation2 + $0x48] ss:$2 sm:$0xff] }
 0x3ad   :  { %3144 = vmatpush.bf16.msra.mxu1 %v4943_v19 }
 0x3ae   :  { %v2062_v13 = vld [vmem:[#allocation2 + $0xa9] ss:$2 sm:$0xff]  ;;  %v2102_v9 = vld [vmem:[#allocation2 + $0xaa] ss:$2 sm:$0xff]  ;;  %2389 = vmatpush.bf16.msrb.mxu2 %v4675_v44 }
 0x3af   :  { %v7065_v8 = vpack.c.bf16 %v2062_v13, %v2060_v38  ;;  %v7067_v3 = vpack.c.bf16 %v2102_v9, %v2100_v39  ;;  %v4930_v38 = vld [vmem:[%s7934_s3 + $0x220] sm:$0xf]  ;;  %v5393_v13 = vld [vmem:[%s7934_s3 + $0x224] sm:$0xf0]  ;;  %v5392_v39 = vld [vmem:[%s7934_s3 + $0x224] sm:$0xf] }
 0x3b0   :  { %v4931_v9 = vor.u32 %v5393_v13, %v4930_v38  ;;  %v4935_v34 = vor.u32 %v5392_v39, %v4932_v62  ;;  %v2495_v55 = vld [vmem:[#allocation2 + $0xab] ss:$2 sm:$0xff]  ;;  %v2734_v44 = vld [vmem:[#allocation2 + $0x4c] ss:$2 sm:$0xff]  ;;  %v4866_v39 = vld [vmem:[%s7934_s3 + $0x1c0] sm:$0xf] }
 0x3b1   :  { %2227 = vmatmul.bf16.gmra.mxu2 %v7065_v8  ;;  %2276 = vmatmul.bf16.gmra.mxu3 %v7065_v8  ;;  %v7235_v30 = vpack.c.bf16 %v2495_v55, %v2493_v48  ;;  %v5380_v62 = vld [vmem:[%s7934_s3 + $0x1c4] sm:$0xf]  ;;  %v2046_v55 = vld [vmem:[#allocation2 + $0xa8] ss:$2 sm:$0xff] }
 0x3b2   :  { %2620 = vmatmul.bf16.gmra.mxu0 %v7067_v3  ;;  %2669 = vmatmul.bf16.gmra.mxu1 %v7067_v3  ;;  %v4871_v52 = vor.u32 %v5380_v62, %v4868_v40  ;;  %v2742_v48 = vld [vmem:[#allocation2 + $0xac] ss:$2 sm:$0xff]  ;;  %v2066_v43 = vpack.c.bf16 %v2046_v55, %v2044_v63  ;;  %v5372_v55 = vld [vmem:[%s7934_s3 + $0x184] sm:$0xf] }
 0x3b3   :  { %3096 = vmatpush.bf16.msra.mxu0 %v4931_v9  ;;  %3145 = vmatpush.bf16.msra.mxu1 %v4935_v34  ;;  %v5381_v9 = vld [vmem:[%s7934_s3 + $0x1c4] sm:$0xf0]  ;;  %v4836_v63 = vld [vmem:[%s7934_s3 + $0x188] sm:$0xf0] }
 0x3b4   :  { %2844 = vmatpush.bf16.msra.mxu2 %v4891_v33  ;;  %v4867_v34 = vor.u32 %v5381_v9, %v4866_v39  ;;  %v5375_v39 = vld [vmem:[%s7934_s3 + $0x194] sm:$0xf0]  ;;  %v5374_v9 = vld [vmem:[%s7934_s3 + $0x194] sm:$0xf] }
 0x3b7   :  { %3097 = vmatpush.bf16.msra.mxu0 %v4923_v57  ;;  %3146 = vmatpush.bf16.msra.mxu1 %v4927_v17  ;;  %v2738_v17 = vld [vmem:[#allocation2 + $0x7c] ss:$2 sm:$0xff] }
 0x3b8   :  { %2845 = vmatpush.bf16.msra.mxu2 %v4883_v35 }
 0x3bb   :  { %3098 = vmatpush.bf16.msra.mxu0 %v4915_v36  ;;  %v4858_v36 = vld [vmem:[%s7934_s3 + $0x1b0] sm:$0xf] }
 0x3bc   :  { %2846 = vmatpush.bf16.msra.mxu2 %v4875_v56 }
 0x3c0   :  { %2847 = vmatpush.bf16.msra.mxu2 %v4867_v34  ;;  %v4844_v34 = vld [vmem:[%s7934_s3 + $0x198] sm:$0xf0] }
 0x3c1   :  { %2232 = vmatmul.bf16.gmra.mxu2 %v6916_v25  ;;  %2281 = vmatmul.bf16.gmra.mxu3 %v6916_v25  ;;  %v4684_v25 = vld [vmem:[%s7934_s3 + $0x18] sm:$0xf0] }
 0x3c2   :  { %2625 = vmatmul.bf16.gmra.mxu0 %v7085_v51  ;;  %2674 = vmatmul.bf16.gmra.mxu1 %v7085_v51  ;;  %v4687_v2 = vor.u32 %v5326_v1, %v4684_v25  ;;  %v4916_v1 = vld [vmem:[%s7934_s3 + $0x208] sm:$0xf0]  ;;  %v7217_v25 = vpack.c.bf16 %v2491_v7, %v2489_v10  ;;  %v5378_v10 = vld [vmem:[%s7934_s3 + $0x1b4] sm:$0xf] }
 0x3c3   :  { %v4919_v49 = vor.u32 %v5388_v37, %v4916_v1  ;;  %v2736_v37 = vld [vmem:[#allocation2 + $0x64] ss:$2 sm:$0xff]  ;;  %v5379_v1 = vld [vmem:[%s7934_s3 + $0x1b4] sm:$0xf0] }
 0x3c4   :  { %2437 = vmatpush.bf16.msrb.mxu3 %v4687_v2  ;;  %v5386_v2 = vld [vmem:[%s7934_s3 + $0x1f4] sm:$0xf]  ;;  %v7301_v7 = vpack.c.bf16 %v2738_v17, %v2736_v37  ;;  %v4859_v54 = vor.u32 %v5379_v1, %v4858_v36 }
 0x3c5   :  { %3147 = vmatpush.bf16.msra.mxu1 %v4919_v49  ;;  %v2981_v37 = vld [vmem:[#allocation2 + $0x4d] ss:$2 sm:$0xff] }
 0x3c6   :  { %2848 = vmatpush.bf16.msra.mxu2 %v4859_v54 }
 0x3d1   :  { %2237 = vmatmul.bf16.gmra.mxu2 %v6960_v14  ;;  %2286 = vmatmul.bf16.gmra.mxu3 %v6960_v14  ;;  %v4676_v14 = vld [vmem:[%s7934_s3 + $0x8] sm:$0xf0] }
 0x3d2   :  { %2630 = vmatmul.bf16.gmra.mxu0 %v7151_v28  ;;  %2679 = vmatmul.bf16.gmra.mxu1 %v7151_v28  ;;  %v4679_v45 = vor.u32 %v5324_v61, %v4676_v14  ;;  %v2036_v14 = vld [vmem:[#allocation2 + $0x30] ss:$2 sm:$0xff] }
 0x3d3   :  { %v2064_v0 = vpack.c.bf16 %v2038_v29, %v2036_v14  ;;  %v2975_v14 = vld [vmem:[#allocation2 + $0x5] ss:$2 sm:$0xff] }
 0x3d4   :  { %2438 = vmatpush.bf16.msrb.mxu3 %v4679_v45  ;;  %v7253_v60 = vpop.f32.mrf.mxu2  ;;  %v7255_v6 = vpop.f32.mrf.mxu3  ;;  %v2732_v45 = vld [vmem:[#allocation2 + $0x34] ss:$2 sm:$0xff] }
 0x3d5   :  { %v7281_v13 = vpack.c.bf16 %v2734_v44, %v2732_v45  ;;  %v2977_v44 = vld [vmem:[#allocation2 + $0x1d] ss:$2 sm:$0xff]  ;;  %v4842_v45 = vld [vmem:[%s7934_s3 + $0x190] sm:$0xf] }
 0x3d6   :  { %v4843_v62 = vor.u32 %v5375_v39, %v4842_v45 }
 0x3dc   :  { %v7273_v23 = vpop.f32.mrf.mxu2  ;;  %v7275_v61 = vpop.f32.mrf.mxu3 }
 0x3e1   :  { %2242 = vmatmul.bf16.gmra.mxu2 %v7020_v12  ;;  %2291 = vmatmul.bf16.gmra.mxu3 %v7020_v12  ;;  %v4892_v12 = vld [vmem:[%s7934_s3 + $0x1f8] sm:$0xf0] }
 0x3e2   :  { %2635 = vmatmul.bf16.gmra.mxu0 %v7217_v25  ;;  %2684 = vmatmul.bf16.gmra.mxu1 %v7217_v25  ;;  %v4895_v22 = vor.u32 %v5386_v2, %v4892_v12  ;;  %v4860_v2 = vld [vmem:[%s7934_s3 + $0x1b8] sm:$0xf0] }
 0x3e3   :  { %v4863_v33 = vor.u32 %v5378_v10, %v4860_v2  ;;  %v2979_v10 = vld [vmem:[#allocation2 + $0x35] ss:$2 sm:$0xff] }
 0x3e4   :  { %2893 = vmatpush.bf16.msra.mxu3 %v4895_v22  ;;  %v2991_v54 = vpack.c.bf16 %v2981_v37, %v2979_v10  ;;  %v4834_v2 = vld [vmem:[%s7934_s3 + $0x180] sm:$0xf]  ;;  %v2989_v37 = vld [vmem:[#allocation2 + $0xad] ss:$2 sm:$0xff] }
 0x3e5   :  { %v2987_v10 = vld [vmem:[#allocation2 + $0x95] ss:$2 sm:$0xff] }
 0x3f1   :  { %2247 = vmatmul.bf16.gmra.mxu2 %v7067_v3  ;;  %2296 = vmatmul.bf16.gmra.mxu3 %v7067_v3  ;;  %v4884_v3 = vld [vmem:[%s7934_s3 + $0x1e8] sm:$0xf0] }
 0x3f2   :  { %2640 = vmatmul.bf16.gmra.mxu0 %v7235_v30  ;;  %2689 = vmatmul.bf16.gmra.mxu1 %v7235_v30  ;;  %v4887_v18 = vor.u32 %v5384_v53, %v4884_v3  ;;  %v2740_v53 = vld [vmem:[#allocation2 + $0x94] ss:$2 sm:$0xff]  ;;  %v7327_v3 = vpop.f32.mrf.mxu0 }
 0x3f3   :  { %v7325_v35 = vpack.c.bf16 %v2742_v48, %v2740_v53 }
 0x3f4   :  { %2894 = vmatpush.bf16.msra.mxu3 %v4887_v18  ;;  %v7277_v19 = vpop.f32.mrf.mxu2  ;;  %v7279_v38 = vpop.f32.mrf.mxu3 }
 0x3f5   :  { %v7329_v18 = vpop.f32.mrf.mxu1 }
 0x3f8   :  { %2895 = vmatpush.bf16.msra.mxu3 %v4879_v27 }
 0x3fa   :  { %v7349_v56 = vpop.f32.mrf.mxu0 }
 0x3fc   :  { %2896 = vmatpush.bf16.msra.mxu3 %v4871_v52  ;;  %v7297_v57 = vpop.f32.mrf.mxu2  ;;  %v7299_v31 = vpop.f32.mrf.mxu3  ;;  %v4847_v52 = vor.u32 %v5374_v9, %v4844_v34 }
 0x3fd   :  { %v7351_v21 = vpop.f32.mrf.mxu1 }
 0x400   :  { %2897 = vmatpush.bf16.msra.mxu3 %v4863_v33  ;;  %v5373_v33 = vld [vmem:[%s7934_s3 + $0x184] sm:$0xf0] }
 0x401   :  { %2390 = vmatmul.bf16.vlgmr.msrb.gmra.mxu2 %v2063_v59  ;;  %2439 = vmatmul.bf16.vlgmr.msrb.gmra.mxu3 %v2063_v59  ;;  %v4851_v59 = vor.u32 %v5377_v50, %v4850_v4  ;;  %v4835_v48 = vor.u32 %v5373_v33, %v4834_v2 }
 0x402   :  { %3099 = vmatmul.bf16.vlgmr.msra.gmra.mxu0 %v7257_v58  ;;  %3148 = vmatmul.bf16.vlgmr.msra.gmra.mxu1 %v7257_v58 }
 0x403   :  { %2849 = vmatpush.bf16.msra.mxu2 %v4851_v59 }
 0x404   :  { %2898 = vmatpush.bf16.msra.mxu3 %v4855_v46  ;;  %v2983_v46 = vld [vmem:[#allocation2 + $0x65] ss:$2 sm:$0xff] }
 0x405   :  { %v7373_v40 = vpop.f32.mrf.mxu1 }
 0x407   :  { %2850 = vmatpush.bf16.msra.mxu2 %v4843_v62 }
 0x408   :  { %2899 = vmatpush.bf16.msra.mxu3 %v4847_v52 }
 0x40b   :  { %2851 = vmatpush.bf16.msra.mxu2 %v4835_v48 }
 0x40d   :  { %v7385_v1 = vpop.f32.mrf.mxu1 }
 0x411   :  { %2395 = vmatmul.bf16.gmra.mxu2 %v2064_v0  ;;  %2444 = vmatmul.bf16.gmra.mxu3 %v2064_v0  ;;  %v2990_v0 = vpack.c.bf16 %v2977_v44, %v2975_v14 }
 0x412   :  { %3104 = vmatmul.bf16.gmra.mxu0 %v7281_v13  ;;  %3153 = vmatmul.bf16.gmra.mxu1 %v7281_v13 }
 0x414   :  { %v7312_v49 = vpop.f32.mrf.mxu2  ;;  %v7314_v32 = vpop.f32.mrf.mxu3 }
 0x415   :  { %v7407_v50 = vpop.f32.mrf.mxu1 }
 0x41c   :  { %v7321_v12 = vpop.f32.mrf.mxu2  ;;  %v7323_v22 = vpop.f32.mrf.mxu3 }
 0x41d   :  { %v7415_v14 = vpop.f32.mrf.mxu1 }
 0x421   :  { %2400 = vmatmul.bf16.gmra.mxu2 %v2065_v20  ;;  %2449 = vmatmul.bf16.gmra.mxu3 %v2065_v20 }
 0x422   :  { %3109 = vmatmul.bf16.gmra.mxu0 %v7301_v7  ;;  %3158 = vmatmul.bf16.gmra.mxu1 %v7301_v7 }
 0x42f   :  { %v7425_v62 = vpop.f32.mrf.mxu1 }
 0x431   :  { %2405 = vmatmul.bf16.gmra.mxu2 %v2066_v43  ;;  %2454 = vmatmul.bf16.gmra.mxu3 %v2066_v43 }
 0x432   :  { %3114 = vmatmul.bf16.gmra.mxu0 %v7325_v35  ;;  %3163 = vmatmul.bf16.gmra.mxu1 %v7325_v35 }
 0x434   :  { %v7345_v16 = vpop.f32.mrf.mxu2  ;;  %v7347_v11 = vpop.f32.mrf.mxu3 }
 0x437   :  { %v7435_v2 = vpop.f32.mrf.mxu1 }
 0x438   :  { %8076 = vst [vmem:[#allocation15_spill] sm:$0xff] %v7435_v2 }
 0x43c   :  { %v7353_v27 = vpop.f32.mrf.mxu2  ;;  %v7355_v29 = vpop.f32.mrf.mxu3 }
 0x441   :  { %2410 = vmatmul.bf16.gmra.mxu2 %v6914_v26  ;;  %2459 = vmatmul.bf16.gmra.mxu3 %v6914_v26  ;;  %v7371_v26 = vpop.f32.mrf.mxu0 }
 0x442   :  { %3119 = vmatmul.bf16.gmra.mxu0 %v2990_v0  ;;  %3168 = vmatmul.bf16.gmra.mxu1 %v2990_v0  ;;  %v2992_v0 = vpack.c.bf16 %v2985_v41, %v2983_v46 }
 0x444   :  { %v7375_v47 = vpop.f32.mrf.mxu2  ;;  %v7377_v17 = vpop.f32.mrf.mxu3 }
 0x445   :  { %8063 = vst [vmem:[#allocation10_spill] sm:$0xff] %v7375_v47 }
 0x446   :  { %8064 = vst [vmem:[#allocation11_spill] sm:$0xff] %v7377_v17 }
 0x449   :  { %v7383_v36 = vpop.f32.mrf.mxu0 }
 0x44c   :  { %v7379_v24 = vpop.f32.mrf.mxu2  ;;  %v7381_v20 = vpop.f32.mrf.mxu3 }
 0x44d   :  { %8065 = vst [vmem:[#allocation22_spill] sm:$0xff] %v7379_v24 }
 0x44e   :  { %8066 = vst [vmem:[#allocation23_spill] sm:$0xff] %v7381_v20 }
 0x451   :  { %2415 = vmatmul.bf16.gmra.mxu2 %v6958_v42  ;;  %2464 = vmatmul.bf16.gmra.mxu3 %v6958_v42  ;;  %v4839_v42 = vor.u32 %v5372_v55, %v4836_v63  ;;  %v7405_v4 = vpop.f32.mrf.mxu0 }
 0x452   :  { %3124 = vmatmul.bf16.gmra.mxu0 %v2991_v54  ;;  %3173 = vmatmul.bf16.gmra.mxu1 %v2991_v54  ;;  %v2993_v54 = vpack.c.bf16 %v2989_v37, %v2987_v10 }
 0x453   :  { %2900 = vmatpush.bf16.msra.mxu3 %v4839_v42 }
 0x454   :  { %v7401_v43 = vpop.f32.mrf.mxu2  ;;  %v7403_v53 = vpop.f32.mrf.mxu3 }
 0x455   :  { %8067 = vst [vmem:[#allocation34_spill] sm:$0xff] %v7401_v43 }
 0x456   :  { %8068 = vst [vmem:[#allocation36_spill] sm:$0xff] %v7403_v53 }
 0x459   :  { %v7413_v44 = vpop.f32.mrf.mxu0 }
 0x45c   :  { %v7409_v15 = vpop.f32.mrf.mxu2  ;;  %v7411_v59 = vpop.f32.mrf.mxu3 }
 0x45d   :  { %8069 = vst [vmem:[#allocation12_spill] sm:$0xff] %v7409_v15 }
 0x45e   :  { %8070 = vst [vmem:[#allocation35_spill] sm:$0xff] %v7411_v59 }
 0x461   :  { %2420 = vmatmul.bf16.gmra.mxu2 %v7018_v5  ;;  %2469 = vmatmul.bf16.gmra.mxu3 %v7018_v5  ;;  %v7423_v9 = vpop.f32.mrf.mxu0 }
 0x462   :  { %3129 = vmatmul.bf16.gmra.mxu0 %v2992_v0  ;;  %3178 = vmatmul.bf16.gmra.mxu1 %v2992_v0 }
 0x464   :  { %v7419_v45 = vpop.f32.mrf.mxu2  ;;  %v7421_v39 = vpop.f32.mrf.mxu3 }
 0x465   :  { %8071 = vst [vmem:[#allocation37_spill] sm:$0xff] %v7419_v45 }
 0x466   :  { %8072 = vst [vmem:[#allocation13_spill] sm:$0xff] %v7421_v39 }
 0x469   :  { %v7433_v5 = vpop.f32.mrf.mxu0 }
 0x46a   :  { %8075 = vst [vmem:[#allocation14_spill] sm:$0xff] %v7433_v5 }
 0x46c   :  { %v7427_v34 = vpop.f32.mrf.mxu2  ;;  %v7429_v52 = vpop.f32.mrf.mxu3 }
 0x46d   :  { %8073 = vst [vmem:[#allocation26_spill] sm:$0xff] %v7427_v34 }
 0x46e   :  { %8074 = vst [vmem:[#allocation27_spill] sm:$0xff] %v7429_v52 }
 0x471   :  { %2425 = vmatmul.bf16.gmra.mxu2 %v7065_v8  ;;  %2474 = vmatmul.bf16.gmra.mxu3 %v7065_v8  ;;  %v7461_v10 = vpop.f32.mrf.mxu0 }
 0x472   :  { %3134 = vmatmul.bf16.gmra.mxu0 %v2993_v54  ;;  %3183 = vmatmul.bf16.gmra.mxu1 %v2993_v54  ;;  %8081 = vst [vmem:[#allocation16_spill] sm:$0xff] %v7461_v10  ;;  %v7463_v54 = vpop.f32.mrf.mxu1 }
 0x473   :  { %8082 = vst [vmem:[#allocation39_spill] sm:$0xff] %v7463_v54 }
 0x474   :  { %v7437_v33 = vpop.f32.mrf.mxu2  ;;  %v7439_v55 = vpop.f32.mrf.mxu3 }
 0x475   :  { %8077 = vst [vmem:[#allocation28_spill] sm:$0xff] %v7437_v33 }
 0x476   :  { %8078 = vst [vmem:[#allocation29_spill] sm:$0xff] %v7439_v55 }
 0x47a   :  { %v7471_v55 = vpop.f32.mrf.mxu1 }
 0x47b   :  { %8084 = vst [vmem:[#allocation17_spill] sm:$0xff] %v7471_v55 }
 0x47c   :  { %v7441_v48 = vpop.f32.mrf.mxu2  ;;  %v7443_v63 = vpop.f32.mrf.mxu3 }
 0x47d   :  { %8079 = vst [vmem:[#allocation38_spill] sm:$0xff] %v7441_v48  ;;  %v7469_v48 = vpop.f32.mrf.mxu0 }
 0x47e   :  { %8080 = vst [vmem:[#allocation40_spill] sm:$0xff] %v7443_v63 }
 0x47f   :  { %8083 = vst [vmem:[#allocation41_spill] sm:$0xff] %v7469_v48 }
 0x481   :  { %2852 = vmatmul.bf16.vlgmr.msra.gmra.mxu2 %v7085_v51  ;;  %2901 = vmatmul.bf16.vlgmr.msra.gmra.mxu3 %v7085_v51 }
 0x482   :  { %v7481_v34 = vpop.f32.mrf.mxu1 }
 0x483   :  { %8086 = vst [vmem:[#allocation31_spill] sm:$0xff] %v7481_v34 }
 0x484   :  { %v7447_v42 = vpop.f32.mrf.mxu2  ;;  %v7449_v8 = vpop.f32.mrf.mxu3 }
 0x485   :  { %v7479_v52 = vpop.f32.mrf.mxu0 }
 0x486   :  { %8085 = vst [vmem:[#allocation30_spill] sm:$0xff] %v7479_v52 }
 0x48a   :  { %v7495_v53 = vpop.f32.mrf.mxu1 }
 0x48b   :  { %8088 = vst [vmem:[#allocation19_spill] sm:$0xff] %v7495_v53 }
 0x48c   :  { %v7451_v41 = vpop.f32.mrf.mxu2  ;;  %v7453_v46 = vpop.f32.mrf.mxu3 }
 0x491   :  { %2857 = vmatmul.bf16.gmra.mxu2 %v7151_v28  ;;  %2906 = vmatmul.bf16.gmra.mxu3 %v7151_v28 }
 0x492   :  { %v7503_v55 = vpop.f32.mrf.mxu1 }
 0x493   :  { %8090 = vst [vmem:[#allocation33_spill] sm:$0xff] %v7503_v55 }
 0x494   :  { %v7457_v0 = vpop.f32.mrf.mxu2  ;;  %v7459_v37 = vpop.f32.mrf.mxu3 }
 0x49c   :  { %v7465_v51 = vpop.f32.mrf.mxu2  ;;  %v7467_v63 = vpop.f32.mrf.mxu3 }
 0x4a1   :  { %2862 = vmatmul.bf16.gmra.mxu2 %v7217_v25  ;;  %2911 = vmatmul.bf16.gmra.mxu3 %v7217_v25  ;;  %v7493_v25 = vpop.f32.mrf.mxu0 }
 0x4a2   :  { %8087 = vst [vmem:[#allocation18_spill] sm:$0xff] %v7493_v25  ;;  %v7513_v25 = vpop.f32.mrf.mxu1 }
 0x4a3   :  { %8094 = vst [vmem:[#allocation43_spill] sm:$0xff] %v7513_v25 }
 0x4a4   :  { %v7475_v28 = vpop.f32.mrf.mxu2  ;;  %v7477_v33 = vpop.f32.mrf.mxu3 }
 0x4a9   :  { %v7501_v34 = vpop.f32.mrf.mxu0 }
 0x4aa   :  { %8089 = vst [vmem:[#allocation32_spill] sm:$0xff] %v7501_v34  ;;  %v7523_v34 = vpop.f32.mrf.mxu1 }
 0x4ab   :  { %8098 = vst [vmem:[#allocation45_spill] sm:$0xff] %v7523_v34 }
 0x4ac   :  { %v7483_v39 = vpop.f32.mrf.mxu2  ;;  %v7485_v45 = vpop.f32.mrf.mxu3 }
 0x4b1   :  { %2867 = vmatmul.bf16.gmra.mxu2 %v7235_v30  ;;  %2916 = vmatmul.bf16.gmra.mxu3 %v7235_v30  ;;  %v7511_v20 = vpop.f32.mrf.mxu0 }
 0x4b2   :  { %8093 = vst [vmem:[#allocation20_spill] sm:$0xff] %v7511_v20 }
 0x4b4   :  { %v7489_v59 = vpop.f32.mrf.mxu2  ;;  %v7491_v15 = vpop.f32.mrf.mxu3 }
 0x4b9   :  { %v7521_v55 = vpop.f32.mrf.mxu0 }
 0x4ba   :  { %8097 = vst [vmem:[#allocation44_spill] sm:$0xff] %v7521_v55 }
 0x4bc   :  { %v7497_v43 = vpop.f32.mrf.mxu2  ;;  %v7499_v52 = vpop.f32.mrf.mxu3 }
 0x4c1   :  { %2872 = vmatmul.bf16.gmra.mxu2 %v7257_v58  ;;  %2921 = vmatmul.bf16.gmra.mxu3 %v7257_v58  ;;  %v7533_v25 = vpop.f32.mrf.mxu0 }
 0x4c2   :  { %8103 = vst [vmem:[#allocation50_spill] sm:$0xff] %v7533_v25 }
 0x4c4   :  { %v7507_v30 = vpop.f32.mrf.mxu2  ;;  %v7509_v48 = vpop.f32.mrf.mxu3 }
 0x4c5   :  { %8091 = vst [vmem:[#allocation42_spill] sm:$0xff] %v7507_v30 }
 0x4c6   :  { %8092 = vst [vmem:[#allocation24_spill] sm:$0xff] %v7509_v48  ;;  %v2392_v48 = vadd.f32 %v7447_v42, %v7253_v60 }
 0x4c9   :  { %v3100_v34 = vpop.f32.mrf.mxu0 }
 0x4cc   :  { %v7515_v53 = vpop.f32.mrf.mxu2  ;;  %v7517_v24 = vpop.f32.mrf.mxu3 }
 0x4cd   :  { %8095 = vst [vmem:[#allocation25_spill] sm:$0xff] %v7515_v53  ;;  %v7535_v53 = vpop.f32.mrf.mxu1 }
 0x4ce   :  { %8096 = vst [vmem:[#allocation21_spill] sm:$0xff] %v7517_v24 }
 0x4cf   :  { %8104 = vst [vmem:[#allocation51_spill] sm:$0xff] %v7535_v53 }
 0x4d1   :  { %2877 = vmatmul.bf16.gmra.mxu2 %v7281_v13  ;;  %2926 = vmatmul.bf16.gmra.mxu3 %v7281_v13 }
 0x4d4   :  { %v7525_v58 = vpop.f32.mrf.mxu2  ;;  %v7527_v54 = vpop.f32.mrf.mxu3 }
 0x4d5   :  { %8099 = vst [vmem:[#allocation46_spill] sm:$0xff] %v7525_v58  ;;  %v3149_v58 = vpop.f32.mrf.mxu1 }
 0x4d6   :  { %8100 = vst [vmem:[#allocation47_spill] sm:$0xff] %v7527_v54 }
 0x4dc   :  { %v7529_v10 = vpop.f32.mrf.mxu2  ;;  %v7531_v20 = vpop.f32.mrf.mxu3 }
 0x4dd   :  { %8101 = vst [vmem:[#allocation48_spill] sm:$0xff] %v7529_v10  ;;  %v3102_v10 = vpop.f32.mrf.mxu0 }
 0x4de   :  { %8102 = vst [vmem:[#allocation49_spill] sm:$0xff] %v7531_v20  ;;  %v3151_v20 = vpop.f32.mrf.mxu1 }
 0x4e1   :  { %2882 = vmatmul.bf16.gmra.mxu2 %v7301_v7  ;;  %2931 = vmatmul.bf16.gmra.mxu3 %v7301_v7  ;;  %v5419_v7 = vld [vmem:[%s7936_s5 + $0x78] sm:$0xff] }
 0x4e2   :  { %3432 = vmatpush.bf16.msrb.mxu2 %v5419_v7 }
 0x4e4   :  { %v7539_v13 = vpop.f32.mrf.mxu2  ;;  %v7541_v55 = vpop.f32.mrf.mxu3 }
 0x4e5   :  { %8105 = vst [vmem:[#allocation52_spill] sm:$0xff] %v7539_v13 }
 0x4e6   :  { %8106 = vst [vmem:[#allocation53_spill] sm:$0xff] %v7541_v55  ;;  %v3105_v55 = vpop.f32.mrf.mxu0  ;;  %v3154_v13 = vpop.f32.mrf.mxu1 }
 0x4ec   :  { %v7543_v24 = vpop.f32.mrf.mxu2  ;;  %v7545_v54 = vpop.f32.mrf.mxu3 }
 0x4ed   :  { %8107 = vst [vmem:[#allocation54_spill] sm:$0xff] %v7543_v24 }
 0x4ee   :  { %8108 = vst [vmem:[#allocation55_spill] sm:$0xff] %v7545_v54  ;;  %v3107_v47 = vpop.f32.mrf.mxu0  ;;  %v3156_v7 = vpop.f32.mrf.mxu1 }
 0x4f1   :  { %2887 = vmatmul.bf16.gmra.mxu2 %v7325_v35  ;;  %2936 = vmatmul.bf16.gmra.mxu3 %v7325_v35  ;;  %v2441_v35 = vadd.f32 %v7449_v8, %v7255_v6  ;;  %v5411_v6 = vld [vmem:[%s7936_s5 + $0x38] sm:$0xff] }
 0x4f2   :  { %3525 = vmatpush.bf16.msrb.mxu3 %v5411_v6 }
 0x4f4   :  { %v7549_v53 = vpop.f32.mrf.mxu2  ;;  %v7551_v25 = vpop.f32.mrf.mxu3 }
 0x4f5   :  { %8109 = vst [vmem:[#allocation56_spill] sm:$0xff] %v7549_v53  ;;  %v2695_v53 = vadd.f32 %v7327_v3, %v2392_v48  ;;  %v5418_v3 = vld [vmem:[%s7936_s5 + $0x70] sm:$0xff] }
 0x4f6   :  { %8110 = vst [vmem:[#allocation57_spill] sm:$0xff] %v7551_v25  ;;  %v2696_v25 = vadd.f32 %v7329_v18, %v2441_v35  ;;  %3433 = vmatpush.bf16.msrb.mxu2 %v5418_v3  ;;  %v3110_v48 = vpop.f32.mrf.mxu0  ;;  %v3159_v8 = vpop.f32.mrf.mxu1  ;;  %v2451_v35 = vadd.f32 %v7477_v33, %v7314_v32  ;;  %v2453_v32 = vadd.f32 %v7485_v45, %v7323_v22 }
 0x4f7   :  { %v2456_v22 = vadd.f32 %v7491_v15, %v7347_v11 }
 0x4fc   :  { %v7556_v24 = vpop.f32.mrf.mxu2  ;;  %v7558_v54 = vpop.f32.mrf.mxu3 }
 0x4fd   :  { %8111 = vst [vmem:[#allocation58_spill] sm:$0xff] %v7556_v24  ;;  %v2394_v24 = vadd.f32 %v7451_v41, %v7273_v23 }
 0x4fe   :  { %8112 = vst [vmem:[#allocation59_spill] sm:$0xff] %v7558_v54  ;;  %v2443_v54 = vadd.f32 %v7453_v46, %v7275_v61 }
 0x4ff   :  { %v2697_v18 = vadd.f32 %v7349_v56, %v2394_v24 }
 0x500   :  { %v2698_v23 = vadd.f32 %v7351_v21, %v2443_v54 }
 0x504   :  { %v2853_v17 = vpop.f32.mrf.mxu2  ;;  %v2902_v30 = vpop.f32.mrf.mxu3 }
 0x505   :  { %v2942_v2 = vadd.f32 %v2853_v17, %v2695_v53  ;;  %v2943_v5 = vadd.f32 %v2902_v30, %v2696_v25 }
 0x507   :  { %v7570_v60 = vadd.f32 %v3100_v34, %v2942_v2  ;;  %v7572_v42 = vadd.f32 %v3149_v58, %v2943_v5  ;;  %v2397_v5 = vadd.f32 %v7457_v0, %v7277_v19  ;;  %v2446_v2 = vadd.f32 %v7459_v37, %v7279_v38 }
 0x508   :  { %v2399_v19 = vadd.f32 %v7465_v51, %v7297_v57  ;;  %v2448_v38 = vadd.f32 %v7467_v63, %v7299_v31 }
 0x509   :  { %v2699_v56 = vadd.f32 %v7371_v26, %v2397_v5  ;;  %v2700_v21 = vadd.f32 %v7373_v40, %v2446_v2  ;;  %v5410_v26 = vld [vmem:[%s7936_s5 + $0x30] sm:$0xff]  ;;  %v5417_v40 = vld [vmem:[%s7936_s5 + $0x68] sm:$0xff] }
 0x50a   :  { %3526 = vmatpush.bf16.msrb.mxu3 %v5410_v26  ;;  %3434 = vmatpush.bf16.msrb.mxu2 %v5417_v40  ;;  %v2701_v57 = vadd.f32 %v7383_v36, %v2399_v19  ;;  %v2702_v31 = vadd.f32 %v7385_v1, %v2448_v38  ;;  %v2704_v1 = vadd.f32 %v7407_v50, %v2451_v35  ;;  %v8114_v26 = vld [vmem:[#allocation15_spill] sm:$0xff] }
 0x50c   :  { %v2855_v17 = vpop.f32.mrf.mxu2  ;;  %v2904_v61 = vpop.f32.mrf.mxu3 }
 0x50d   :  { %v2944_v53 = vadd.f32 %v2855_v17, %v2697_v18  ;;  %v2945_v34 = vadd.f32 %v2904_v61, %v2698_v23 }
 0x50f   :  { %v7586_v41 = vadd.f32 %v3102_v10, %v2944_v53  ;;  %v7588_v46 = vadd.f32 %v3151_v20, %v2945_v34  ;;  %v3112_v20 = vpop.f32.mrf.mxu0  ;;  %v3161_v10 = vpop.f32.mrf.mxu1 }
 0x514   :  { %v2858_v24 = vpop.f32.mrf.mxu2  ;;  %v2907_v54 = vpop.f32.mrf.mxu3 }
 0x515   :  { %v2946_v25 = vadd.f32 %v2858_v24, %v2699_v56  ;;  %v2947_v30 = vadd.f32 %v2907_v54, %v2700_v21  ;;  %v2409_v24 = vadd.f32 %v7497_v43, %v7353_v27  ;;  %v2458_v54 = vadd.f32 %v7499_v52, %v7355_v29  ;;  %v8117_v43 = vld [vmem:[#allocation11_spill] sm:$0xff] }
 0x517   :  { %v7596_v0 = vadd.f32 %v3105_v55, %v2946_v25  ;;  %v7598_v37 = vadd.f32 %v3154_v13, %v2947_v30  ;;  %v2402_v13 = vadd.f32 %v7475_v28, %v7312_v49  ;;  %v3115_v18 = vpop.f32.mrf.mxu0  ;;  %v3164_v23 = vpop.f32.mrf.mxu1  ;;  %v2404_v49 = vadd.f32 %v7483_v39, %v7321_v12 }
 0x518   :  { %v2407_v12 = vadd.f32 %v7489_v59, %v7345_v16  ;;  %v2710_v40 = vadd.f32 %v8114_v26, %v2458_v54  ;;  %v8129_v26 = vld [vmem:[#allocation36_spill] sm:$0xff] }
 0x519   :  { %v2703_v36 = vadd.f32 %v7405_v4, %v2402_v13  ;;  %v2705_v28 = vadd.f32 %v7413_v44, %v2404_v49  ;;  %v2706_v4 = vadd.f32 %v7415_v14, %v2453_v32  ;;  %v5409_v44 = vld [vmem:[%s7936_s5 + $0x28] sm:$0xff]  ;;  %v5416_v14 = vld [vmem:[%s7936_s5 + $0x60] sm:$0xff] }
 0x51a   :  { %3527 = vmatpush.bf16.msrb.mxu3 %v5409_v44  ;;  %3435 = vmatpush.bf16.msrb.mxu2 %v5416_v14  ;;  %v7679_v44 = vld [vmem:[%s7935_s4] ss:$0 sm:$0xff] }
 0x51c   :  { %v2860_v55 = vpop.f32.mrf.mxu2  ;;  %v2909_v63 = vpop.f32.mrf.mxu3 }
 0x51d   :  { %v2948_v51 = vadd.f32 %v2860_v55, %v2701_v57  ;;  %v2949_v58 = vadd.f32 %v2909_v63, %v2702_v31  ;;  %v8115_v55 = vld [vmem:[#allocation10_spill] sm:$0xff] }
 0x51e   :  { %v8116_v63 = vld [vmem:[#allocation42_spill] sm:$0xff] }
 0x51f   :  { %v7612_v6 = vadd.f32 %v3107_v47, %v2948_v51  ;;  %v7614_v3 = vadd.f32 %v3156_v7, %v2949_v58  ;;  %v3117_v5 = vpop.f32.mrf.mxu0  ;;  %v3166_v2 = vpop.f32.mrf.mxu1  ;;  %v2412_v27 = vadd.f32 %v8116_v63, %v8115_v55  ;;  %v8118_v51 = vld [vmem:[#allocation24_spill] sm:$0xff] }
 0x520   :  { %v2461_v29 = vadd.f32 %v8118_v51, %v8117_v43  ;;  %v5414_v43 = vld [vmem:[%s7936_s5 + $0x50] sm:$0xff] }
 0x524   :  { %v2863_v17 = vpop.f32.mrf.mxu2  ;;  %v2912_v61 = vpop.f32.mrf.mxu3 }
 0x525   :  { %v2950_v53 = vadd.f32 %v2863_v17, %v2703_v36  ;;  %v2951_v34 = vadd.f32 %v2912_v61, %v2704_v1  ;;  %v8119_v36 = vld [vmem:[#allocation16_spill] sm:$0xff]  ;;  %v8120_v17 = vld [vmem:[#allocation39_spill] sm:$0xff] }
 0x526   :  { %v2711_v1 = vadd.f32 %v8119_v36, %v2412_v27  ;;  %v2712_v61 = vadd.f32 %v8120_v17, %v2461_v29  ;;  %v5407_v27 = vld [vmem:[%s7936_s5 + $0x18] sm:$0xff]  ;;  %v8131_v29 = vld [vmem:[#allocation30_spill] sm:$0xff] }
 0x527   :  { %v7622_v47 = vadd.f32 %v3110_v48, %v2950_v53  ;;  %v7624_v33 = vadd.f32 %v3159_v8, %v2951_v34  ;;  %v2707_v48 = vadd.f32 %v7423_v9, %v2407_v12  ;;  %v2708_v8 = vadd.f32 %v7425_v62, %v2456_v22  ;;  %v3120_v25 = vpop.f32.mrf.mxu0  ;;  %v3169_v30 = vpop.f32.mrf.mxu1  ;;  %v8113_v9 = vld [vmem:[#allocation14_spill] sm:$0xff] }
 0x528   :  { %v2709_v62 = vadd.f32 %v8113_v9, %v2409_v24  ;;  %v8127_v9 = vld [vmem:[#allocation34_spill] sm:$0xff] }
 0x52c   :  { %v2865_v7 = vpop.f32.mrf.mxu2  ;;  %v2914_v50 = vpop.f32.mrf.mxu3 }
 0x52d   :  { %v2952_v56 = vadd.f32 %v2865_v7, %v2705_v28  ;;  %v2953_v21 = vadd.f32 %v2914_v50, %v2706_v4  ;;  %v8121_v28 = vld [vmem:[#allocation22_spill] sm:$0xff]  ;;  %v8122_v4 = vld [vmem:[#allocation25_spill] sm:$0xff]  ;;  %v8123_v50 = vld [vmem:[#allocation23_spill] sm:$0xff] }
 0x52e   :  { %v2414_v7 = vadd.f32 %v8122_v4, %v8121_v28  ;;  %v8136_v28 = vld [vmem:[#allocation49_spill] sm:$0xff] }
 0x52f   :  { %v7632_v45 = vadd.f32 %v3112_v20, %v2952_v56  ;;  %v7634_v39 = vadd.f32 %v3161_v10, %v2953_v21  ;;  %v3122_v13 = vpop.f32.mrf.mxu0  ;;  %v3171_v35 = vpop.f32.mrf.mxu1 }
 0x534   :  { %v2868_v16 = vpop.f32.mrf.mxu2  ;;  %v2917_v11 = vpop.f32.mrf.mxu3 }
 0x535   :  { %v2954_v15 = vadd.f32 %v2868_v16, %v2707_v48  ;;  %v2955_v59 = vadd.f32 %v2917_v11, %v2708_v8  ;;  %v8125_v16 = vld [vmem:[#allocation41_spill] sm:$0xff] }
 0x536   :  { %v2713_v11 = vadd.f32 %v8125_v16, %v2414_v7  ;;  %v8138_v16 = vld [vmem:[#allocation19_spill] sm:$0xff] }
 0x537   :  { %v7648_v19 = vadd.f32 %v3115_v18, %v2954_v15  ;;  %v7650_v38 = vadd.f32 %v3164_v23, %v2955_v59  ;;  %v5408_v18 = vld [vmem:[%s7936_s5 + $0x20] sm:$0xff]  ;;  %v5415_v23 = vld [vmem:[%s7936_s5 + $0x58] sm:$0xff]  ;;  %v3125_v14 = vpop.f32.mrf.mxu0  ;;  %v3174_v48 = vpop.f32.mrf.mxu1 }
 0x538   :  { %3528 = vmatpush.bf16.msrb.mxu3 %v5408_v18  ;;  %3436 = vmatpush.bf16.msrb.mxu2 %v5415_v23  ;;  %v8126_v15 = vld [vmem:[#allocation17_spill] sm:$0xff]  ;;  %v8132_v23 = vld [vmem:[#allocation31_spill] sm:$0xff] }
 0x53c   :  { %v2870_v20 = vpop.f32.mrf.mxu2  ;;  %v2919_v10 = vpop.f32.mrf.mxu3  ;;  %3529 = vmatpush.bf16.msrb.mxu3 %v5407_v27  ;;  %3437 = vmatpush.bf16.msrb.mxu2 %v5414_v43  ;;  %v8143_v43 = vld [vmem:[#allocation32_spill] sm:$0xff] }
 0x53d   :  { %v2956_v57 = vadd.f32 %v2870_v20, %v2709_v62  ;;  %v2957_v31 = vadd.f32 %v2919_v10, %v2710_v40  ;;  %v8130_v40 = vld [vmem:[#allocation47_spill] sm:$0xff] }
 0x53e   :  { %v2466_v20 = vadd.f32 %v8130_v40, %v8129_v26 }
 0x53f   :  { %v7658_v52 = vadd.f32 %v3117_v5, %v2956_v57  ;;  %v7660_v58 = vadd.f32 %v3166_v2, %v2957_v31  ;;  %v8124_v5 = vld [vmem:[#allocation21_spill] sm:$0xff] }
 0x540   :  { %v2463_v2 = vadd.f32 %v8124_v5, %v8123_v50  ;;  %v2716_v36 = vadd.f32 %v8132_v23, %v2466_v20 }
 0x542   :  { %v2714_v59 = vadd.f32 %v8126_v15, %v2463_v2 }
 0x544   :  { %v2873_v53 = vpop.f32.mrf.mxu2  ;;  %v2922_v34 = vpop.f32.mrf.mxu3 }
 0x545   :  { %v2958_v49 = vadd.f32 %v2873_v53, %v2711_v1  ;;  %v2959_v32 = vadd.f32 %v2922_v34, %v2712_v61  ;;  %v3176_v1 = vpop.f32.mrf.mxu1  ;;  %v8133_v53 = vld [vmem:[#allocation12_spill] sm:$0xff] }
 0x546   :  { %v8134_v34 = vld [vmem:[#allocation48_spill] sm:$0xff] }
 0x547   :  { %v3205_v56 = vadd.f32 %v3120_v25, %v2958_v49  ;;  %v3206_v21 = vadd.f32 %v3169_v30, %v2959_v32  ;;  %v2419_v49 = vadd.f32 %v8134_v34, %v8133_v53  ;;  %v8135_v32 = vld [vmem:[#allocation35_spill] sm:$0xff] }
 0x548   :  { %v2468_v4 = vadd.f32 %v8136_v28, %v8135_v32  ;;  %v8148_v53 = vld [vmem:[#allocation55_spill] sm:$0xff] }
 0x549   :  { %v3221_v12 = vmax.f32 %v7570_v60, %v3205_v56  ;;  %v3222_v22 = vmax.f32 %v7572_v42, %v3206_v21  ;;  %v8128_v42 = vld [vmem:[#allocation46_spill] sm:$0xff]  ;;  %v5413_v21 = vld [vmem:[%s7936_s5 + $0x48] sm:$0xff] }
 0x54a   :  { %v2417_v62 = vadd.f32 %v8128_v42, %v8127_v9  ;;  %3438 = vmatpush.bf16.msrb.mxu2 %v5413_v21  ;;  %v8141_v42 = vld [vmem:[#allocation13_spill] sm:$0xff] }
 0x54b   :  { %v3237_v8 = vmax.f32 %v3221_v12, %v3222_v22  ;;  %v8137_v22 = vld [vmem:[#allocation18_spill] sm:$0xff]  ;;  %v5435_v21 = vld [vmem:[%s7936_s5 + $0xf8] sm:$0xff] }
 0x54c   :  { %v2875_v24 = vpop.f32.mrf.mxu2  ;;  %v2924_v54 = vpop.f32.mrf.mxu3  ;;  %v2715_v18 = vadd.f32 %v8131_v29, %v2417_v62  ;;  %v8142_v62 = vld [vmem:[#allocation53_spill] sm:$0xff] }
 0x54d   :  { %v3249_v25 = vadd.f32 %v7679_v44, %v3237_v8  ;;  %v2960_v30 = vadd.f32 %v2875_v24, %v2713_v11  ;;  %v2961_v60 = vadd.f32 %v2924_v54, %v2714_v59  ;;  %v2717_v8 = vadd.f32 %v8137_v22, %v2419_v49  ;;  %v8140_v54 = vld [vmem:[#allocation52_spill] sm:$0xff]  ;;  %v3179_v9 = vpop.f32.mrf.mxu1  ;;  %v8144_v29 = vld [vmem:[#allocation33_spill] sm:$0xff] }
 0x54e   :  { %v2718_v11 = vadd.f32 %v8138_v16, %v2468_v4  ;;  %v2471_v26 = vadd.f32 %v8142_v62, %v8141_v42  ;;  %v8149_v22 = vld [vmem:[#allocation20_spill] sm:$0xff]  ;;  %v8150_v16 = vld [vmem:[#allocation43_spill] sm:$0xff] }
 0x54f   :  { %v3257_v10 = vmax.f32 %v3249_v25, 0.0  ;;  %v3207_v57 = vadd.f32 %v3122_v13, %v2960_v30  ;;  %v3208_v31 = vadd.f32 %v3171_v35, %v2961_v60  ;;  %v5427_v30 = vld [vmem:[%s7936_s5 + $0xb8] sm:$0xff] }
 0x551   :  { %3265 = vst [vmem:[#allocation3] sm:$0xff] %v3257_v10  ;;  %v3223_v55 = vmax.f32 %v7586_v41, %v3207_v57  ;;  %v3224_v63 = vmax.f32 %v7588_v46, %v3208_v31  ;;  %v3127_v41 = vpop.f32.mrf.mxu0 }
 0x553   :  { %v3238_v51 = vmax.f32 %v3223_v55, %v3224_v63  ;;  %v5406_v55 = vld [vmem:[%s7936_s5 + $0x10] sm:$0xff] }
 0x554   :  { %v2878_v13 = vpop.f32.mrf.mxu2  ;;  %v2927_v35 = vpop.f32.mrf.mxu3  ;;  %v5426_v63 = vld [vmem:[%s7936_s5 + $0xb0] sm:$0xff]  ;;  %3530 = vmatpush.bf16.msrb.mxu3 %v5406_v55 }
 0x555   :  { %v3250_v46 = vadd.f32 %v7679_v44, %v3238_v51  ;;  %v2962_v17 = vadd.f32 %v2878_v13, %v2715_v18  ;;  %v2963_v61 = vadd.f32 %v2927_v35, %v2716_v36  ;;  %v2720_v18 = vadd.f32 %v8144_v29, %v2471_v26  ;;  %v8145_v35 = vld [vmem:[#allocation26_spill] sm:$0xff]  ;;  %v5422_v26 = vld [vmem:[%s7936_s5 + $0x90] sm:$0xff] }
 0x557   :  { %v3258_v7 = vmax.f32 %v3250_v46, 0.0  ;;  %v3209_v50 = vadd.f32 %v3125_v14, %v2962_v17  ;;  %v3210_v5 = vadd.f32 %v3174_v48, %v2963_v61  ;;  %v5405_v46 = vld [vmem:[%s7936_s5 + $0x8] sm:$0xff] }
 0x558   :  { %v5425_v17 = vld [vmem:[%s7936_s5 + $0xa8] sm:$0xff]  ;;  %3531 = vmatpush.bf16.msrb.mxu3 %v5405_v46 }
 0x559   :  { %3267 = vst [vmem:[#allocation3 + $0x8] sm:$0xff] %v3258_v7  ;;  %v3225_v2 = vmax.f32 %v7596_v0, %v3209_v50  ;;  %v3226_v56 = vmax.f32 %v7598_v37, %v3210_v5  ;;  %v5412_v0 = vld [vmem:[%s7936_s5 + $0x40] sm:$0xff]  ;;  %v8139_v37 = vld [vmem:[#allocation37_spill] sm:$0xff]  ;;  %v3130_v60 = vpop.f32.mrf.mxu0  ;;  %v8147_v61 = vld [vmem:[#allocation27_spill] sm:$0xff]  ;;  %v3181_v7 = vpop.f32.mrf.mxu1 }
 0x55a   :  { %v2422_v25 = vadd.f32 %v8140_v54, %v8139_v37  ;;  %3439 = vmatpush.bf16.msrb.mxu2 %v5412_v0  ;;  %v2473_v34 = vadd.f32 %v8148_v53, %v8147_v61  ;;  %v8151_v0 = vld [vmem:[#allocation28_spill] sm:$0xff] }
 0x55b   :  { %v3239_v12 = vmax.f32 %v3225_v2, %v3226_v56  ;;  %v5404_v2 = vld [vmem:[%s7936_s5] sm:$0xff]  ;;  %v8152_v37 = vld [vmem:[#allocation56_spill] sm:$0xff] }
 0x55c   :  { %v2880_v15 = vpop.f32.mrf.mxu2  ;;  %v2929_v59 = vpop.f32.mrf.mxu3  ;;  %v2719_v51 = vadd.f32 %v8143_v43, %v2422_v25  ;;  %v5424_v56 = vld [vmem:[%s7936_s5 + $0xa0] sm:$0xff]  ;;  %3532 = vmatpush.bf16.msrb.mxu3 %v5404_v2  ;;  %v2427_v54 = vadd.f32 %v8152_v37, %v8151_v0  ;;  %v8153_v25 = vld [vmem:[#allocation29_spill] sm:$0xff] }
 0x55d   :  { %v3251_v14 = vadd.f32 %v7679_v44, %v3239_v12  ;;  %v2964_v48 = vadd.f32 %v2880_v15, %v2717_v8  ;;  %v2965_v24 = vadd.f32 %v2929_v59, %v2718_v11  ;;  %v2722_v11 = vadd.f32 %v8150_v16, %v2473_v34  ;;  %v8156_v43 = vld [vmem:[#allocation45_spill] sm:$0xff] }
 0x55e   :  { %3651 = vmatpush.bf16.msra.mxu2 %v5427_v30  ;;  %v8154_v30 = vld [vmem:[#allocation57_spill] sm:$0xff] }
 0x55f   :  { %v3259_v40 = vmax.f32 %v3251_v14, 0.0  ;;  %v3211_v20 = vadd.f32 %v3127_v41, %v2964_v48  ;;  %v3212_v10 = vadd.f32 %v3176_v1, %v2965_v24  ;;  %v8146_v41 = vld [vmem:[#allocation54_spill] sm:$0xff]  ;;  %v5434_v24 = vld [vmem:[%s7936_s5 + $0xf0] sm:$0xff] }
 0x560   :  { %v2424_v1 = vadd.f32 %v8146_v41, %v8145_v35  ;;  %3778 = vmatpush.bf16.msra.mxu3 %v5435_v21  ;;  %v8159_v41 = vld [vmem:[#allocation40_spill] sm:$0xff]  ;;  %v3313_v16 = vld [vmem:[#allocation3 + $0x9] sm:$0x1] }
 0x561   :  { %3269 = vst [vmem:[#allocation3 + $0x10] sm:$0xff] %v3259_v40  ;;  %v3227_v57 = vmax.f32 %v7612_v6, %v3211_v20  ;;  %v3228_v31 = vmax.f32 %v7614_v3, %v3212_v10  ;;  %v3132_v4 = vpop.f32.mrf.mxu0  ;;  %v5433_v10 = vld [vmem:[%s7936_s5 + $0xe8] sm:$0xff]  ;;  %v3321_v37 = vpack.c.bf16 %v3313_v16, %v3313_v16 }
 0x562   :  { %3652 = vmatpush.bf16.msra.mxu2 %v5426_v63  ;;  %v2721_v8 = vadd.f32 %v8149_v22, %v2424_v1  ;;  %v8155_v63 = vld [vmem:[#allocation44_spill] sm:$0xff]  ;;  %v8160_v1 = vld [vmem:[#allocation59_spill] sm:$0xff] }
 0x563   :  { %v3240_v27 = vmax.f32 %v3227_v57, %v3228_v31  ;;  %v3184_v31 = vpop.f32.mrf.mxu1  ;;  %v2478_v46 = vadd.f32 %v8160_v1, %v8159_v41 }
 0x564   :  { %v2883_v23 = vpop.f32.mrf.mxu2  ;;  %v2932_v36 = vpop.f32.mrf.mxu3  ;;  %3779 = vmatpush.bf16.msra.mxu3 %v5434_v24 }
 0x565   :  { %v3252_v6 = vadd.f32 %v7679_v44, %v3240_v27  ;;  %v2966_v3 = vadd.f32 %v2883_v23, %v2719_v51  ;;  %v2967_v13 = vadd.f32 %v2932_v36, %v2720_v18  ;;  %v2723_v27 = vadd.f32 %v8155_v63, %v2427_v54  ;;  %v3280_v54 = vld [vmem:[#allocation3] sm:$0x1] }
 0x566   :  { %3653 = vmatpush.bf16.msra.mxu2 %v5425_v17 }
 0x567   :  { %v3260_v49 = vmax.f32 %v3252_v6, 0.0  ;;  %v3213_v32 = vadd.f32 %v3130_v60, %v2966_v3  ;;  %v3214_v28 = vadd.f32 %v3179_v9, %v2967_v13  ;;  %v2476_v60 = vadd.f32 %v8154_v30, %v8153_v25  ;;  %v5432_v6 = vld [vmem:[%s7936_s5 + $0xe0] sm:$0xff] }
 0x568   :  { %3780 = vmatpush.bf16.msra.mxu3 %v5433_v10  ;;  %v8157_v3 = vld [vmem:[#allocation38_spill] sm:$0xff]  ;;  %v3282_v25 = vld [vmem:[#allocation3 + $0x10] sm:$0x1] }
 0x569   :  { %3271 = vst [vmem:[#allocation3 + $0x18] sm:$0xff] %v3260_v49  ;;  %v3229_v50 = vmax.f32 %v7622_v47, %v3213_v32  ;;  %v3230_v5 = vmax.f32 %v7624_v33, %v3214_v28  ;;  %v5423_v33 = vld [vmem:[%s7936_s5 + $0x98] sm:$0xff]  ;;  %v3135_v57 = vpop.f32.mrf.mxu0  ;;  %v2724_v51 = vadd.f32 %v8156_v43, %v2476_v60  ;;  %v8158_v13 = vld [vmem:[#allocation58_spill] sm:$0xff] }
 0x56a   :  { %3654 = vmatpush.bf16.msra.mxu2 %v5424_v56  ;;  %v2429_v35 = vadd.f32 %v8158_v13, %v8157_v3  ;;  %v5420_v32 = vld [vmem:[%s7936_s5 + $0x80] sm:$0xff]  ;;  %v5431_v28 = vld [vmem:[%s7936_s5 + $0xd8] sm:$0xff] }
 0x56b   :  { %v3241_v12 = vmax.f32 %v3229_v50, %v3230_v5  ;;  %v8162_v5 = vld [vmem:[#allocation51_spill] sm:$0xff] }
 0x56c   :  { %v2885_v47 = vpop.f32.mrf.mxu2  ;;  %v2934_v15 = vpop.f32.mrf.mxu3  ;;  %3781 = vmatpush.bf16.msra.mxu3 %v5432_v6  ;;  %v2726_v2 = vadd.f32 %v8162_v5, %v2478_v46 }
 0x56d   :  { %v3253_v59 = vadd.f32 %v7679_v44, %v3241_v12  ;;  %v2968_v14 = vadd.f32 %v2885_v47, %v2721_v8  ;;  %v2969_v48 = vadd.f32 %v2934_v15, %v2722_v11  ;;  %v3186_v8 = vpop.f32.mrf.mxu1  ;;  %v5430_v11 = vld [vmem:[%s7936_s5 + $0xd0] sm:$0xff] }
 0x56e   :  { %3655 = vmatpush.bf16.msra.mxu2 %v5423_v33 }
 0x56f   :  { %v3261_v9 = vmax.f32 %v3253_v59, 0.0  ;;  %v3215_v42 = vadd.f32 %v3132_v4, %v2968_v14  ;;  %v3216_v62 = vadd.f32 %v3181_v7, %v2969_v48  ;;  %v8161_v7 = vld [vmem:[#allocation50_spill] sm:$0xff]  ;;  %v3281_v14 = vld [vmem:[#allocation3 + $0x8] sm:$0x1]  ;;  %v3314_v48 = vld [vmem:[#allocation3 + $0x11] sm:$0x1] }
 0x570   :  { %v2725_v50 = vadd.f32 %v8161_v7, %v2429_v35  ;;  %3782 = vmatpush.bf16.msra.mxu3 %v5431_v28  ;;  %v3312_v59 = vld [vmem:[#allocation3 + $0x1] sm:$0x1]  ;;  %v3289_v60 = vpack.c.bf16 %v3281_v14, %v3281_v14  ;;  %v3315_v10 = vld [vmem:[#allocation3 + $0x19] sm:$0x1] }
 0x571   :  { %3273 = vst [vmem:[#allocation3 + $0x20] sm:$0xff] %v3261_v9  ;;  %v3231_v40 = vmax.f32 %v7632_v45, %v3215_v42  ;;  %v3232_v20 = vmax.f32 %v7634_v39, %v3216_v62  ;;  %v5421_v45 = vld [vmem:[%s7936_s5 + $0x88] sm:$0xff]  ;;  %v3137_v22 = vpop.f32.mrf.mxu0  ;;  %v3320_v30 = vpack.c.bf16 %v3312_v59, %v3312_v59  ;;  %v7806_v42 = vld [vmem:[#allocation3 + $0x2] sm:$0x1]  ;;  %v7808_v62 = vld [vmem:[#allocation3 + $0x3] sm:$0x1]  ;;  %v3323_v13 = vpack.c.bf16 %v3315_v10, %v3315_v10 }
 0x572   :  { %3656 = vmatpush.bf16.msra.mxu2 %v5422_v26  ;;  %v5429_v9 = vld [vmem:[%s7936_s5 + $0xc8] sm:$0xff] }
 0x573   :  { %v3242_v55 = vmax.f32 %v3231_v40, %v3232_v20  ;;  %v3322_v40 = vpack.c.bf16 %v3314_v48, %v3314_v48  ;;  %v3539_v20 = vld [vmem:[#allocation3 + $0xa] sm:$0x1] }
 0x574   :  { %v2888_v29 = vpop.f32.mrf.mxu2  ;;  %v2937_v18 = vpop.f32.mrf.mxu3  ;;  %3783 = vmatpush.bf16.msra.mxu3 %v5430_v11  ;;  %v3547_v6 = vpack.c.bf16 %v3539_v20, %v3539_v20 }
 0x575   :  { %v3254_v39 = vadd.f32 %v7679_v44, %v3242_v55  ;;  %v2970_v23 = vadd.f32 %v2888_v29, %v2723_v27  ;;  %v2971_v36 = vadd.f32 %v2937_v18, %v2724_v51  ;;  %v3354_v27 = vunpack.c.l.b16 %v3321_v37 }
 0x576   :  { %3657 = vmatpush.bf16.msra.mxu2 %v5421_v45  ;;  %v3546_v51 = vpack.c.bf16 %v7806_v42, %v7806_v42  ;;  %v3673_v29 = vpack.c.bf16 %v7808_v62, %v7808_v62  ;;  %v3353_v45 = vunpack.c.l.b16 %v3320_v30  ;;  %v3355_v35 = vunpack.c.l.b16 %v3322_v40 }
 0x577   :  { %v3262_v17 = vmax.f32 %v3254_v39, 0.0  ;;  %v3217_v61 = vadd.f32 %v3135_v57, %v2970_v23  ;;  %v3218_v53 = vadd.f32 %v3184_v31, %v2971_v36  ;;  %v3288_v57 = vpack.c.bf16 %v3280_v54, %v3280_v54  ;;  %v5428_v36 = vld [vmem:[%s7936_s5 + $0xc0] sm:$0xff] }
 0x578   :  { %v3290_v31 = vpack.c.bf16 %v3282_v25, %v3282_v25  ;;  %v3316_v63 = vld [vmem:[#allocation3 + $0x21] sm:$0x1]  ;;  %v3284_v43 = vld [vmem:[#allocation3 + $0x20] sm:$0x1]  ;;  %v3454_v23 = vunpack.c.l.b16 %v3289_v60  ;;  %3784 = vmatpush.bf16.msra.mxu3 %v5429_v9  ;;  %v3541_v25 = vld [vmem:[#allocation3 + $0x1a] sm:$0x1] }
 0x579   :  { %3275 = vst [vmem:[#allocation3 + $0x28] sm:$0xff] %v3262_v17  ;;  %v3233_v34 = vmax.f32 %v7648_v19, %v3217_v61  ;;  %v3234_v49 = vmax.f32 %v7650_v38, %v3218_v53  ;;  %v3324_v46 = vpack.c.bf16 %v3316_v63, %v3316_v63  ;;  %v3292_v61 = vpack.c.bf16 %v3284_v43, %v3284_v43 }
 0x57a   :  { %3658 = vmatpush.bf16.msra.mxu2 %v5420_v32  ;;  %v3453_v53 = vunpack.c.l.b16 %v3288_v57  ;;  %v3361_v32 = vrot.slane %v3354_v27, 7  ;;  %v3461_v5 = vrot.slane %v3454_v23, 7  ;;  %v3549_v27 = vpack.c.bf16 %v3541_v25, %v3541_v25 }
 0x57b   :  { %v3243_v4 = vmax.f32 %v3233_v34, %v3234_v49  ;;  %v3455_v34 = vunpack.c.l.b16 %v3290_v31  ;;  %v3668_v31 = vld [vmem:[#allocation3 + $0x1b] sm:$0x1] }
 0x57c   :  { %v2890_v56 = vpop.f32.mrf.mxu2  ;;  %v2939_v21 = vpop.f32.mrf.mxu3  ;;  %3785 = vmatpush.bf16.msra.mxu3 %v5428_v36  ;;  %v3462_v48 = vsel %vm3362_vm1, %v3461_v5, %v3453_v53  ;;  %v3542_v36 = vld [vmem:[#allocation3 + $0x22] sm:$0x1] }
 0x57d   :  { %v3255_v19 = vadd.f32 %v7679_v44, %v3243_v4  ;;  %v2972_v38 = vadd.f32 %v2890_v56, %v2725_v50  ;;  %v2973_v12 = vadd.f32 %v2939_v21, %v2726_v2  ;;  %v3540_v4 = vld [vmem:[#allocation3 + $0x12] sm:$0x1]  ;;  %v7818_v2 = vunpack.c.l.b16 %v3547_v6  ;;  %v3669_v6 = vld [vmem:[#allocation3 + $0x23] sm:$0x1] }
 0x57e   :  { %v3356_v56 = vunpack.c.l.b16 %v3323_v13  ;;  %v3364_v21 = vrot.slane %v3355_v35, 6  ;;  %v3463_v16 = vrot.slane %v3455_v34, 6  ;;  %v3548_v11 = vpack.c.bf16 %v3540_v4, %v3540_v4 }
 0x57f   :  { %v3263_v47 = vmax.f32 %v3255_v19, 0.0  ;;  %v3219_v15 = vadd.f32 %v3137_v22, %v2972_v38  ;;  %v3220_v33 = vadd.f32 %v3186_v8, %v2973_v12  ;;  %v3667_v38 = vld [vmem:[#allocation3 + $0x13] sm:$0x1]  ;;  %v3357_v22 = vunpack.c.l.b16 %v3324_v46 }
 0x580   :  { %v3317_v18 = vld [vmem:[#allocation3 + $0x29] sm:$0x1]  ;;  %v3285_v39 = vld [vmem:[#allocation3 + $0x28] sm:$0x1]  ;;  %v3457_v8 = vunpack.c.l.b16 %v3292_v61  ;;  %v3367_v37 = vrot.slane %v3356_v56, 5  ;;  %v7826_v20 = vunpack.c.l.b16 %v3548_v11  ;;  %v3550_v4 = vpack.c.bf16 %v3542_v36, %v3542_v36 }
 0x581   :  { %3277 = vst [vmem:[#allocation3 + $0x30] sm:$0xff] %v3263_v47  ;;  %v3235_v24 = vmax.f32 %v7658_v52, %v3219_v15  ;;  %v3236_v0 = vmax.f32 %v7660_v58, %v3220_v33  ;;  %v3666_v52 = vld [vmem:[#allocation3 + $0xb] sm:$0x1]  ;;  %v3283_v58 = vld [vmem:[#allocation3 + $0x18] sm:$0x1]  ;;  %v3325_v49 = vpack.c.bf16 %v3317_v18, %v3317_v18  ;;  %v3293_v28 = vpack.c.bf16 %v3285_v39, %v3285_v39 }
 0x582   :  { %v3291_v41 = vpack.c.bf16 %v3283_v58, %v3283_v58  ;;  %v3363_v15 = vsel %vm3362_vm1, %v3361_v32, %v3353_v45  ;;  %v3370_v60 = vrot.slane %v3357_v22, 4  ;;  %v3467_v40 = vrot.slane %v3457_v8, 4  ;;  %v3543_v13 = vld [vmem:[#allocation3 + $0x2a] sm:$0x1]  ;;  %v3670_v35 = vld [vmem:[#allocation3 + $0x2b] sm:$0x1] }
 0x583   :  { %v3244_v26 = vmax.f32 %v3235_v24, %v3236_v0  ;;  %v3358_v47 = vunpack.c.l.b16 %v3325_v49  ;;  %v3458_v33 = vunpack.c.l.b16 %v3293_v28  ;;  %v3675_v24 = vpack.c.bf16 %v3667_v38, %v3667_v38 }
 0x584   :  { %v3456_v19 = vunpack.c.l.b16 %v3291_v41  ;;  %v3366_v0 = vsel %vm3365_vm2, %v3364_v21, %v3363_v15  ;;  %v3676_v41 = vpack.c.bf16 %v3668_v31, %v3668_v31  ;;  %v5443_v21 = vld [vmem:[%s7936_s5 + $0x138] sm:$0xff]  ;;  %v3678_v38 = vpack.c.bf16 %v3670_v35, %v3670_v35  ;;  %v5440_v35 = vld [vmem:[%s7936_s5 + $0x120] sm:$0xff] }
 0x585   :  { %v3256_v55 = vadd.f32 %v7679_v44, %v3244_v26  ;;  %v3674_v44 = vpack.c.bf16 %v3666_v52, %v3666_v52  ;;  %v3464_v26 = vsel %vm3365_vm2, %v3463_v16, %v3462_v48  ;;  %v3373_v10 = vrot.slane %v3358_v47, 3 }
 0x586   :  { %v3465_v54 = vrot.slane %v3456_v19, 5  ;;  %v3469_v57 = vrot.slane %v3458_v33, 3  ;;  %v7828_v43 = vunpack.c.l.b16 %v3675_v24  ;;  %v3369_v45 = vsel %vm3368_vm3, %v3367_v37, %v3366_v0  ;;  %v5442_v37 = vld [vmem:[%s7936_s5 + $0x130] sm:$0xff] }
 0x587   :  { %v3264_v3 = vmax.f32 %v3256_v55, 0.0  ;;  %v7820_v12 = vunpack.c.l.b16 %v3674_v44  ;;  %v3372_v44 = vsel %vm3371_vm4, %v3370_v60, %v3369_v45  ;;  %v3551_v19 = vpack.c.bf16 %v3543_v13, %v3543_v13  ;;  %v3795_v13 = vld [vmem:[#allocation3 + $0x1c] sm:$0x1] }
 0x588   :  { %v3318_v1 = vld [vmem:[#allocation3 + $0x31] sm:$0x1]  ;;  %v3286_v17 = vld [vmem:[#allocation3 + $0x30] sm:$0x1]  ;;  %v3466_v23 = vsel %vm3368_vm3, %v3465_v54, %v3464_v26  ;;  %v3544_v53 = vld [vmem:[#allocation3 + $0x32] sm:$0x1]  ;;  %v3582_v15 = vunpack.c.l.b16 %v3549_v27  ;;  %v3583_v48 = vunpack.c.l.b16 %v3550_v4  ;;  %v3706_v24 = vunpack.c.l.b16 %v3673_v29 }
 0x589   :  { %3279 = vst [vmem:[#allocation3 + $0x38] sm:$0xff] %v3264_v3  ;;  %v3326_v7 = vpack.c.bf16 %v3318_v1, %v3318_v1  ;;  %v3294_v50 = vpack.c.bf16 %v3286_v17, %v3286_v17  ;;  %v3468_v3 = vsel %vm3371_vm4, %v3467_v40, %v3466_v23  ;;  %v3375_v1 = vsel %vm3374_vm5, %v3373_v10, %v3372_v44  ;;  %v3671_v34 = vld [vmem:[#allocation3 + $0x33] sm:$0x1]  ;;  %v3798_v4 = vld [vmem:[#allocation3 + $0x34] sm:$0x1] }
 0x58a   :  { %v3470_v17 = vsel %vm3374_vm5, %v3469_v57, %v3468_v3  ;;  %v3552_v16 = vpack.c.bf16 %v3544_v53, %v3544_v53  ;;  %v3679_v11 = vpack.c.bf16 %v3671_v34, %v3671_v34  ;;  %v3584_v54 = vunpack.c.l.b16 %v3551_v19  ;;  %v3797_v34 = vld [vmem:[#allocation3 + $0x2c] sm:$0x1] }
 0x58b   :  { %v3359_v59 = vunpack.c.l.b16 %v3326_v7  ;;  %v3459_v14 = vunpack.c.l.b16 %v3294_v50  ;;  %v3677_v50 = vpack.c.bf16 %v3669_v6, %v3669_v6  ;;  %v3587_v25 = vrot.slane %v7818_v2, 7  ;;  %v5441_v2 = vld [vmem:[%s7936_s5 + $0x128] sm:$0xff]  ;;  %v3794_v6 = vld [vmem:[#allocation3 + $0x14] sm:$0x1] }
 0x58c   :  { %v3714_v60 = vrot.slane %v7820_v12, 7  ;;  %v3589_v42 = vrot.slane %v7826_v20, 6  ;;  %v3716_v26 = vrot.slane %v7828_v43, 6  ;;  %v3591_v29 = vrot.slane %v3582_v15, 5 }
 0x58d   :  { %v3376_v55 = vrot.slane %v3359_v59, 2  ;;  %v3471_v63 = vrot.slane %v3459_v14, 2  ;;  %v3709_v59 = vunpack.c.l.b16 %v3676_v41  ;;  %v3579_v14 = vunpack.c.l.b16 %v3546_v51 }
 0x58e   :  { %v3710_v0 = vunpack.c.l.b16 %v3677_v50  ;;  %v3712_v51 = vunpack.c.l.b16 %v3679_v11  ;;  %v3593_v10 = vrot.slane %v3583_v48, 4  ;;  %v3595_v12 = vrot.slane %v3584_v54, 3  ;;  %v3792_v50 = vld [vmem:[#allocation3 + $0x4] sm:$0x1] }
 0x58f   :  { %v3378_v49 = vsel %vm3377_vm6, %v3376_v55, %v3375_v1  ;;  %v3472_v32 = vsel %vm3377_vm6, %v3471_v63, %v3470_v17  ;;  %v3588_v57 = vsel %vm3362_vm1, %v3587_v25, %v3579_v14  ;;  %v3715_v31 = vsel %vm3362_vm1, %v3714_v60, %v3706_v24  ;;  %v5438_v14 = vld [vmem:[%s7936_s5 + $0x110] sm:$0xff] }
 0x590   :  { %v3319_v30 = vld [vmem:[#allocation3 + $0x39] sm:$0x1]  ;;  %v3287_v9 = vld [vmem:[#allocation3 + $0x38] sm:$0x1]  ;;  %v3545_v28 = vld [vmem:[#allocation3 + $0x3a] sm:$0x1]  ;;  %v3590_v55 = vsel %vm3365_vm2, %v3589_v42, %v3588_v57  ;;  %v3717_v27 = vsel %vm3365_vm2, %v3716_v26, %v3715_v31  ;;  %v3805_v19 = vpack.c.bf16 %v3797_v34, %v3797_v34 }
 0x591   :  { %v3327_v52 = vpack.c.bf16 %v3319_v30, %v3319_v30  ;;  %v3295_v58 = vpack.c.bf16 %v3287_v9, %v3287_v9  ;;  %v3672_v7 = vld [vmem:[#allocation3 + $0x3b] sm:$0x1]  ;;  %v3553_v47 = vpack.c.bf16 %v3545_v28, %v3545_v28  ;;  %v3711_v30 = vunpack.c.l.b16 %v3678_v38 }
 0x592   :  { %v3680_v33 = vpack.c.bf16 %v3672_v7, %v3672_v7  ;;  %v3585_v9 = vunpack.c.l.b16 %v3552_v16  ;;  %v3724_v43 = vrot.slane %v3712_v51, 2  ;;  %v3592_v45 = vsel %vm3368_vm3, %v3591_v29, %v3590_v55  ;;  %v5451_v31 = vld [vmem:[%s7938_s7 + $0x38] sm:$0xff]  ;;  %v5449_v55 = vld [vmem:[%s7938_s7 + $0x28] sm:$0xff] }
 0x593   :  { %v3360_v18 = vunpack.c.l.b16 %v3327_v52  ;;  %v3460_v39 = vunpack.c.l.b16 %v3295_v58  ;;  %v3586_v62 = vunpack.c.l.b16 %v3553_v47  ;;  %v3718_v52 = vrot.slane %v3709_v59, 5 }
 0x594   :  { %v3713_v40 = vunpack.c.l.b16 %v3680_v33  ;;  %v3720_v58 = vrot.slane %v3710_v0, 4  ;;  %v3722_v20 = vrot.slane %v3711_v30, 3  ;;  %v3597_v63 = vrot.slane %v3585_v9, 2  ;;  %v5437_v9 = vld [vmem:[%s7936_s5 + $0x108] sm:$0xff] }
 0x595   :  { %v3379_v46 = vrot.slane %v3360_v18, 1  ;;  %v3473_v61 = vrot.slane %v3460_v39, 1  ;;  %v3793_v18 = vld [vmem:[#allocation3 + $0xc] sm:$0x1]  ;;  %v3599_v39 = vrot.slane %v3586_v62, 1  ;;  %v3719_v23 = vsel %vm3368_vm3, %v3718_v52, %v3717_v27  ;;  %v5447_v27 = vld [vmem:[%s7938_s7 + $0x18] sm:$0xff] }
 0x596   :  { %v3726_v36 = vrot.slane %v3713_v40, 1  ;;  %v3594_v44 = vsel %vm3371_vm4, %v3593_v10, %v3592_v45  ;;  %v3721_v3 = vsel %vm3371_vm4, %v3720_v58, %v3719_v23  ;;  %v3801_v17 = vpack.c.bf16 %v3793_v18, %v3793_v18  ;;  %v5436_v10 = vld [vmem:[%s7936_s5 + $0x100] sm:$0xff] }
 0x597   :  { %v3381_v5 = vsel %vm3380_vm7, %v3379_v46, %v3378_v49  ;;  %v3474_v56 = vsel %vm3380_vm7, %v3473_v61, %v3472_v32  ;;  %v3596_v41 = vsel %vm3374_vm5, %v3595_v12, %v3594_v44  ;;  %v3723_v1 = vsel %vm3374_vm5, %v3722_v20, %v3721_v3  ;;  %v3796_v46 = vld [vmem:[#allocation3 + $0x24] sm:$0x1]  ;;  %v5450_v20 = vld [vmem:[%s7938_s7 + $0x30] sm:$0xff]  ;;  %v5459_v44 = vld [vmem:[#allocation6 + $0x38] sm:$0xff] }
 0x598   :  { %v3382_v22 = vpack.c.b16 %v3381_v5, %v3381_v5  ;;  %v3475_v8 = vpack.c.b16 %v3474_v56, %v3474_v56  ;;  %v3598_v61 = vsel %vm3377_vm6, %v3597_v63, %v3596_v41  ;;  %v3725_v53 = vsel %vm3377_vm6, %v3724_v43, %v3723_v1  ;;  %v3799_v5 = vld [vmem:[#allocation3 + $0x3c] sm:$0x1]  ;;  %v5448_v63 = vld [vmem:[%s7938_s7 + $0x20] sm:$0xff]  ;;  %v5446_v43 = vld [vmem:[%s7938_s7 + $0x10] sm:$0xff] }
 0x599   :  { %v3802_v49 = vpack.c.bf16 %v3794_v6, %v3794_v6  ;;  %v3600_v32 = vsel %vm3380_vm7, %v3599_v39, %v3598_v61  ;;  %v3727_v28 = vsel %vm3380_vm7, %v3726_v36, %v3725_v53  ;;  %v3803_v7 = vpack.c.bf16 %v3795_v13, %v3795_v13  ;;  %v5445_v39 = vld [vmem:[%s7938_s7 + $0x8] sm:$0xff]  ;;  %v5444_v6 = vld [vmem:[%s7938_s7] sm:$0xff]  ;;  %v5458_v3 = vld [vmem:[#allocation6 + $0x30] sm:$0xff] }
 0x59a   :  { %3440 = vmatmul.bf16.vlgmr.msrb.gmra.mxu2 %v3382_v22  ;;  %3533 = vmatmul.bf16.vlgmr.msrb.gmra.mxu3 %v3475_v8  ;;  %v3804_v56 = vpack.c.bf16 %v3796_v46, %v3796_v46  ;;  %v3834_v38 = vunpack.c.l.b16 %v3801_v17  ;;  %v3601_v22 = vpack.c.b16 %v3600_v32, %v3600_v32  ;;  %v3728_v8 = vpack.c.b16 %v3727_v28, %v3727_v28  ;;  %v5457_v13 = vld [vmem:[#allocation6 + $0x28] sm:$0xff]  ;;  %v5456_v1 = vld [vmem:[#allocation6 + $0x20] sm:$0xff]  ;;  %v5455_v46 = vld [vmem:[#allocation6 + $0x18] sm:$0xff] }
 0x59b   :  { %3905 = vmatpush.bf16.msrb.mxu2 %v5443_v21  ;;  %v5439_v21 = vld [vmem:[%s7936_s5 + $0x118] sm:$0xff]  ;;  %v3806_v16 = vpack.c.bf16 %v3798_v4, %v3798_v4  ;;  %v3835_v11 = vunpack.c.l.b16 %v3802_v49  ;;  %v3800_v47 = vpack.c.bf16 %v3792_v50, %v3792_v50  ;;  %v3807_v15 = vpack.c.bf16 %v3799_v5, %v3799_v5  ;;  %3994 = vmatpush.bf16.msrb.mxu3 %v5451_v31  ;;  %v5454_v49 = vld [vmem:[#allocation6 + $0x10] sm:$0xff]  ;;  %v5469_v28 = vld [vmem:[%s7937_s6] ss:$0 sm:$0xff] }
 0x59c   :  { %v3836_v33 = vunpack.c.l.b16 %v3803_v7  ;;  %v3837_v59 = vunpack.c.l.b16 %v3804_v56  ;;  %v3838_v48 = vunpack.c.l.b16 %v3805_v19  ;;  %v3841_v24 = vrot.slane %v3834_v38, 7  ;;  %v5453_v19 = vld [vmem:[#allocation6 + $0x8] sm:$0xff]  ;;  %v5452_v38 = vld [vmem:[#allocation6] sm:$0xff] }
 0x59d   :  { %v3839_v0 = vunpack.c.l.b16 %v3806_v16  ;;  %v3833_v54 = vunpack.c.l.b16 %v3800_v47  ;;  %v3840_v25 = vunpack.c.l.b16 %v3807_v15 }
 0x59e   :  { %v3845_v30 = vrot.slane %v3836_v33, 5  ;;  %v3847_v60 = vrot.slane %v3837_v59, 4  ;;  %v3849_v51 = vrot.slane %v3838_v48, 3  ;;  %v5471_v33 = vld [vmem:[%s7941_s10] ss:$0 sm:$0xff] }
 0x59f   :  { %3906 = vmatpush.bf16.msrb.mxu2 %v5442_v37  ;;  %v3843_v37 = vrot.slane %v3835_v11, 6  ;;  %v3842_v42 = vsel %vm3362_vm1, %v3841_v24, %v3833_v54  ;;  %v3851_v62 = vrot.slane %v3839_v0, 2  ;;  %v3853_v40 = vrot.slane %v3840_v25, 1  ;;  %3995 = vmatpush.bf16.msrb.mxu3 %v5450_v20 }
 0x5a1   :  { %v3844_v26 = vsel %vm3365_vm2, %v3843_v37, %v3842_v42 }
 0x5a2   :  { %v3846_v29 = vsel %vm3368_vm3, %v3845_v30, %v3844_v26 }
 0x5a3   :  { %3907 = vmatpush.bf16.msrb.mxu2 %v5441_v2  ;;  %v3848_v52 = vsel %vm3371_vm4, %v3847_v60, %v3846_v29  ;;  %3996 = vmatpush.bf16.msrb.mxu3 %v5449_v55 }
 0x5a4   :  { %v3850_v58 = vsel %vm3374_vm5, %v3849_v51, %v3848_v52 }
 0x5a5   :  { %v3852_v2 = vsel %vm3377_vm6, %v3851_v62, %v3850_v58 }
 0x5a6   :  { %v3854_v57 = vsel %vm3380_vm7, %v3853_v40, %v3852_v2 }
 0x5a7   :  { %3908 = vmatpush.bf16.msrb.mxu2 %v5440_v35  ;;  %v3855_v12 = vpack.c.b16 %v3854_v57, %v3854_v57  ;;  %3997 = vmatpush.bf16.msrb.mxu3 %v5448_v63 }
 0x5aa   :  { %3659 = vmatmul.bf16.vlgmr.msra.gmra.mxu2 %v3601_v22  ;;  %3786 = vmatmul.bf16.vlgmr.msra.gmra.mxu3 %v3728_v8  ;;  %v5470_v22 = vld [vmem:[%s7939_s8] ss:$0 sm:$0xff] }
 0x5ab   :  { %3909 = vmatpush.bf16.msrb.mxu2 %v5439_v21  ;;  %3998 = vmatpush.bf16.msrb.mxu3 %v5447_v27 }
 0x5af   :  { %3910 = vmatpush.bf16.msrb.mxu2 %v5438_v14  ;;  %3999 = vmatpush.bf16.msrb.mxu3 %v5446_v43 }
 0x5b3   :  { %3911 = vmatpush.bf16.msrb.mxu2 %v5437_v9  ;;  %4000 = vmatpush.bf16.msrb.mxu3 %v5445_v39 }
 0x5b7   :  { %3912 = vmatpush.bf16.msrb.mxu2 %v5436_v10  ;;  %4001 = vmatpush.bf16.msrb.mxu3 %v5444_v6 }
 0x5ba   :  { %3913 = vmatmul.bf16.vlgmr.msrb.gmra.mxu2 %v3855_v12 }
 0x5bb   :  { %4077 = vmatpush.bf16.msra.mxu2 %v5459_v44 }
 0x5bf   :  { %4078 = vmatpush.bf16.msra.mxu2 %v5458_v3 }
 0x5c3   :  { %4079 = vmatpush.bf16.msra.mxu2 %v5457_v13 }
 0x5c7   :  { %4080 = vmatpush.bf16.msra.mxu2 %v5456_v1 }
 0x5cb   :  { %4081 = vmatpush.bf16.msra.mxu2 %v5455_v46 }
 0x5cf   :  { %4082 = vmatpush.bf16.msra.mxu2 %v5454_v49 }
 0x5d3   :  { %4083 = vmatpush.bf16.msra.mxu2 %v5453_v19 }
 0x5d7   :  { %4084 = vmatpush.bf16.msra.mxu2 %v5452_v38 }
 0x61d   :  { %v3441_v18 = vpop.f32.mrf.mxu2  ;;  %v3534_v45 = vpop.f32.mrf.mxu3 }
 0x61e   :  { %v3535_v53 = vadd.f32 %v3534_v45, %v3441_v18 }
 0x625   :  { %v3443_v23 = vpop.f32.mrf.mxu2  ;;  %v3536_v36 = vpop.f32.mrf.mxu3 }
 0x62d   :  { %v3660_v35 = vpop.f32.mrf.mxu2  ;;  %v3787_v41 = vpop.f32.mrf.mxu3 }
 0x62e   :  { %v3664_v34 = vadd.f32 %v3660_v35, %v3535_v53 }
 0x630   :  { %v3791_v32 = vadd.f32 %v3787_v41, %v3664_v34 }
 0x635   :  { %v3662_v17 = vpop.f32.mrf.mxu2  ;;  %v3789_v61 = vpop.f32.mrf.mxu3 }
 0x63d   :  { %v3914_v4 = vpop.f32.mrf.mxu2 }
 0x63e   :  { %v3918_v7 = vadd.f32 %v3914_v4, %v3791_v32 }
 0x640   :  { %v3923_v50 = vadd.f32 %v5469_v28, %v3918_v7 }
 0x642   :  { %v3924_v5 = vmax.f32 %v3923_v50, 0.0 }
 0x644   :  { %v3925_v56 = vpack.c.bf16 %v3924_v5, %v3924_v5 }
 0x645   :  { %v3916_v21 = vpop.f32.mrf.mxu2 }
 0x646   :  { %4002 = vmatmul.bf16.vlgmr.msrb.gmra.mxu3 %v3925_v56 }
 0x6c9   :  { %v4003_v8 = vpop.f32.mrf.mxu3 }
 0x6ca   :  { %v4004_v16 = vadd.f32 %v5470_v22, %v4003_v8 }
 0x6cc   :  { %v4007_v11 = vmax.f32 %v4004_v16, 0.0 }
 0x6ce   :  { %v4008_v47 = vpack.c.bf16 %v4007_v11, %v4007_v11 }
 0x6d0   :  { %4085 = vmatmul.bf16.vlgmr.msra.gmra.mxu2 %v4008_v47 }
 0x6d1   :  { %v4005_v15 = vpop.f32.mrf.mxu3 }
 0x753   :  { %v4086_v59 = vpop.f32.mrf.mxu2 }
 0x754   :  { %v4087_v14 = vadd.f32 %v5471_v33, %v4086_v59 }
 0x756   :  { %4090 = vst [vmem:[%s7942_s11] sm:$0xff] %v4087_v14 }
 0x75b   :  { %v4088_v48 = vpop.f32.mrf.mxu2 }
 0x75c   :  { %4095 = vsyncpa [#allocation5], 1 }
 0x75d   :  { %4096 = vsyncpa [#allocation7], 1 }

</bundles_post_ra>
